<compile_context>
chip_gen: v7x
topology: tpu7x:2x2x1
jax: 0.10.0
libtpu: 0.0.40
codegen_flags: <defaults>
</compile_context>

<pallas_src>
import functools

import numpy as np
import jax
import jax.numpy as jnp
from jax.experimental import pallas as pl
from jax.experimental.pallas import tpu as pltpu

_LANE = 128  # TPU lane width; output channels are padded to a multiple of this


def _im2col_3x3(a):
    """(H, W, C) -> (H*W, 9*C) patch matrix for a 3x3 / pad-1 / stride-1 conv.

    Tap order is (kh, kw) row-major, input-channel minor, matching the
    flattened weights from `_flatten_conv_weight`.  Shifts are static slices +
    zero concatenation (the zero border IS the conv padding), done in the
    input dtype (bf16), so the per-tap reshape (H, W, C) -> (H*W, C) is a
    contiguous leading-dim merge.
    """
    # TODO(synk): express the dy/dx shifts with pltpu.roll on the merged
    # (H*W, C) view + iota border masks to keep them in the XLU slot; kept as
    # slice+concat here because sublane rotates of packed bf16 are not a
    # universally supported lowering.
    # TODO(synk): for very low channel counts (stem, Cin=3-8) a lane-dense
    # (H, W*Cin) view with lane rolls by Cin would avoid mostly-empty lanes.
    H, W, C = a.shape
    zrow = jnp.zeros((1, W, C), a.dtype)
    zcol = jnp.zeros((H, 1, C), a.dtype)
    shifted_w = {
        -1: jnp.concatenate([zcol, a[:, :W - 1, :]], axis=1),  # reads x[., j-1]
        0: a,
        1: jnp.concatenate([a[:, 1:, :], zcol], axis=1),       # reads x[., j+1]
    }
    taps = []
    for dy in (-1, 0, 1):
        for dx in (-1, 0, 1):
            t = shifted_w[dx]
            if dy == -1:
                t = jnp.concatenate([zrow, t[:H - 1]], axis=0)  # reads x[i-1, .]
            elif dy == 1:
                t = jnp.concatenate([t[1:], zrow], axis=0)      # reads x[i+1, .]
            taps.append(t.reshape(H * W, C))
    return jnp.concatenate(taps, axis=-1)                       # (H*W, 9*C)


def _basic_block_kernel(x_ref, w1_ref, w2_ref, *rest,
                        stride, H, W, Cin, Pp, has_proj):
    """One batch element: conv1+ReLU, conv2, shortcut, residual add, ReLU."""
    rest = list(rest)
    out_ref = rest.pop()                       # output is always last
    wsc_ref = rest.pop(0) if has_proj else None
    sel_ref = rest.pop(0) if stride > 1 else None

    s = stride
    Ho, Wo = H // s, W // s

    x = x_ref[0]                                               # (H, W, Cin) bf16

    # ---- conv1: 3x3, stride s, pad 1, bias=False  (ONE bf16 im2col matmul) ----
    p1 = _im2col_3x3(x)                                        # (H*W, 9*Cin) bf16
    if s > 1:
        # Decimate patch rows BEFORE the matmul (one-hot row gather on the
        # MXU): avoids s^2 wasted conv1 FLOPs and avoids strided/sublane-split
        # reshapes.  Exact, since every selection row has a single 1.
        sel = sel_ref[...]                                     # (Ho*Wo, H*W) bf16
        p1 = jnp.dot(sel, p1,
                     preferred_element_type=jnp.float32).astype(jnp.bfloat16)
    h1 = jnp.dot(p1, w1_ref[...], preferred_element_type=jnp.float32)
    h1 = jnp.maximum(h1, 0.0)                                  # (Ho*Wo, Pp) f32

    # ---- conv2: 3x3, stride 1, pad 1  (bf16 im2col, 128-lane-aligned taps) ----
    h1_bf = h1.astype(jnp.bfloat16).reshape(Ho, Wo, Pp)
    p2 = _im2col_3x3(h1_bf)                                    # (Ho*Wo, 9*Pp) bf16
    acc = jnp.dot(p2, w2_ref[...], preferred_element_type=jnp.float32)

    # ---- shortcut ----
    x2d = x.reshape(H * W, Cin)                                # bf16
    if s > 1:
        xs = jnp.dot(sel, x2d,
                     preferred_element_type=jnp.float32).astype(jnp.bfloat16)
    else:
        xs = x2d                                               # (Ho*Wo, Cin)
    if has_proj:
        # 1x1 projection conv, stride s (columns zero-padded to Pp)
        acc = acc + jnp.dot(xs, wsc_ref[...], preferred_element_type=jnp.float32)
    else:
        # identity shortcut (Cin == P, stride == 1): plain VPU add
        if Pp > Cin:
            xs = jnp.concatenate(
                [xs, jnp.zeros((Ho * Wo, Pp - Cin), xs.dtype)], axis=-1)
        acc = acc + xs.astype(jnp.float32)

    # ---- final ReLU + bf16 lane-dense (Pp multiple of 128) store ----
    out_ref[0] = jnp.maximum(acc, 0.0).astype(out_ref.dtype).reshape(Ho, Wo, Pp)


def _flatten_conv_weight(w_oihw, n_out, n_in=None):
    """OIHW (O, I, kh, kw) -> (kh*kw*n_in, n_out) bf16, tap-major, in-ch minor.

    Output channels are zero-padded from O up to n_out (lane-dense matmul N /
    stores); input channels are optionally zero-padded from I up to n_in to
    match a lane-padded activation.
    """
    O, I, KH, KW = w_oihw.shape
    n_in = I if n_in is None else n_in
    w = jnp.transpose(w_oihw, (2, 3, 1, 0))                    # (KH, KW, I, O)
    if n_in > I:
        w = jnp.pad(w, ((0, 0), (0, 0), (0, n_in - I), (0, 0)))
    w = w.reshape(KH * KW * n_in, O)
    if n_out > O:
        w = jnp.pad(w, ((0, 0), (0, n_out - O)))
    return w.astype(jnp.bfloat16)


def _stride_select_matrix(H, W, s):
    """One-hot (Ho*Wo, H*W) bf16 matrix gathering rows (io*s, jo*s)."""
    Ho, Wo = H // s, W // s
    r = np.arange(Ho * Wo)
    tgt = (r // Wo) * s * W + (r % Wo) * s
    sel = np.zeros((Ho * Wo, H * W), np.float32)
    sel[r, tgt] = 1.0
    return jnp.asarray(sel, dtype=jnp.bfloat16)


def basic_block_pallas(x_nchw, w1_oihw, w2_oihw, wsc_oihw, stride=1):
    """Pallas BasicBlock forward.  x: NCHW; weights: OIHW (PyTorch). Returns bf16 NCHW."""
    B, Cin, H, W = x_nchw.shape
    P = w1_oihw.shape[0]
    has_proj = wsc_oihw is not None
    if not has_proj:
        # PyTorch BasicBlock uses an identity shortcut only in this case.
        assert stride == 1 and Cin == P, \
            "identity shortcut requires stride == 1 and in_planes == planes"
    if stride != 1:
        assert H % stride == 0 and W % stride == 0, \
            "stride>1 path assumes spatial dims divisible by stride"
    Ho, Wo = H // stride, W // stride
    Pp = ((P + _LANE - 1) // _LANE) * _LANE       # lane-padded out channels

    # glue: NCHW -> NHWC bf16 activations, flattened bf16 weights (no jnp.pad
    # of the activations -- the halo is handled inside the kernel).
    x = jnp.transpose(x_nchw, (0, 2, 3, 1)).astype(jnp.bfloat16)   # (B, H, W, Cin)
    w1f = _flatten_conv_weight(w1_oihw, Pp)             # (9*Cin, Pp)  lane-padded N
    w2f = _flatten_conv_weight(w2_oihw, Pp, n_in=Pp)    # (9*Pp, Pp)   lane-padded K & N

    inputs = [x, w1f, w2f]
    in_specs = [
        pl.BlockSpec((1, H, W, Cin), lambda b: (b, 0, 0, 0)),
        pl.BlockSpec((9 * Cin, Pp), lambda b: (0, 0)),
        pl.BlockSpec((9 * Pp, Pp), lambda b: (0, 0)),
    ]
    if has_proj:
        wscf = _flatten_conv_weight(wsc_oihw, Pp)       # (Cin, Pp)
        inputs.append(wscf)
        in_specs.append(pl.BlockSpec((Cin, Pp), lambda b: (0, 0)))
    if stride > 1:
        sel = _stride_select_matrix(H, W, stride)       # (Ho*Wo, H*W)
        inputs.append(sel)
        in_specs.append(pl.BlockSpec((Ho * Wo, H * W), lambda b: (0, 0)))

    kernel = functools.partial(_basic_block_kernel, stride=stride, H=H, W=W,
                               Cin=Cin, Pp=Pp, has_proj=has_proj)

    # One image per grid step is plenty for these toy shapes.
    # TODO(synk): for real ResNet feature maps (e.g. 56x56x64), tile output
    # rows with a 1-row halo (grid=(B, cdiv(Ho, TH))) so the working set fits
    # v7x's 64 MiB VMEM and batch-1 inference still feeds both TensorCores.
    out_padded = pl.pallas_call(
        kernel,
        out_shape=jax.ShapeDtypeStruct((B, Ho, Wo, Pp), jnp.bfloat16),
        grid_spec=pltpu.PrefetchScalarGridSpec(
            num_scalar_prefetch=0,
            grid=(B,),
            in_specs=in_specs,
            out_specs=pl.BlockSpec((1, Ho, Wo, Pp), lambda b: (b, 0, 0, 0)),
        ),
        compiler_params=pltpu.CompilerParams(
            dimension_semantics=("parallel",),
            vmem_limit_bytes=48 * 1024 * 1024),
    )(*inputs)

    # drop the lane padding, back to NCHW (bf16; next layer consumes bf16)
    return jnp.transpose(out_padded[..., :P], (0, 3, 1, 2))


def basic_block_ref(x_nchw, w1, w2, wsc, stride=1):
    """Pure-JAX f32 reference matching the PyTorch forward."""
    dn = ('NCHW', 'OIHW', 'NCHW')

    def conv(x, w, s, p):
        return jax.lax.conv_general_dilated(
            x, w, (s, s), ((p, p), (p, p)), dimension_numbers=dn)

    out = jax.nn.relu(conv(x_nchw, w1, stride, 1))
    out = conv(out, w2, 1, 1)
    sc = x_nchw if wsc is None else conv(x_nchw, wsc, stride, 0)
    return jax.nn.relu(out + sc)


def _check(out, ref):
    np.testing.assert_allclose(np.asarray(out.astype(jnp.float32)),
                               np.asarray(ref), rtol=3e-2, atol=2e-2)


if __name__ == "__main__":
    key = jax.random.PRNGKey(0)
    kx, k1, k2, k3, k4, k5, k6, k7 = jax.random.split(key, 8)

    # Case 1: BasicBlock(in_planes=4, planes=8, stride=1) -> 1x1 projection shortcut
    B, Cin, H, W, P = 2, 4, 16, 16, 8
    x = jax.random.normal(kx, (B, Cin, H, W), dtype=jnp.float32)
    w1 = 0.1 * jax.random.normal(k1, (P, Cin, 3, 3), dtype=jnp.float32)   # conv1.weight
    w2 = 0.1 * jax.random.normal(k2, (P, P, 3, 3), dtype=jnp.float32)     # conv2.weight
    wsc = 0.1 * jax.random.normal(k3, (P, Cin, 1, 1), dtype=jnp.float32)  # shortcut[0].weight

    out = jax.block_until_ready(basic_block_pallas(x, w1, w2, wsc, stride=1))
    _check(out, basic_block_ref(x, w1, w2, wsc, stride=1))
    assert out.shape == (B, P, H, W) and out.dtype == jnp.bfloat16

    # Case 2: BasicBlock(in_planes=8, planes=8, stride=1) -> identity shortcut
    C2 = 8
    x2 = jax.random.normal(k4, (B, C2, H, W), dtype=jnp.float32)
    w1b = 0.1 * jax.random.normal(k5, (C2, C2, 3, 3), dtype=jnp.float32)
    w2b = 0.1 * jax.random.normal(k6, (C2, C2, 3, 3), dtype=jnp.float32)

    out2 = jax.block_until_ready(basic_block_pallas(x2, w1b, w2b, None, stride=1))
    _check(out2, basic_block_ref(x2, w1b, w2b, None, stride=1))
    assert out2.shape == (B, C2, H, W)

    # Case 3: BasicBlock(in_planes=4, planes=8, stride=2) -> strided projection
    out3 = jax.block_until_ready(basic_block_pallas(x, w1, w2, wsc, stride=2))
    wsc2 = 0.1 * jax.random.normal(k7, (P, Cin, 1, 1), dtype=jnp.float32)
    out3b = jax.block_until_ready(basic_block_pallas(x, w1, w2, wsc2, stride=2))
    _check(out3, basic_block_ref(x, w1, w2, wsc, stride=2))
    _check(out3b, basic_block_ref(x, w1, w2, wsc2, stride=2))
    assert out3.shape == (B, P, H // 2, W // 2)

    print("KERNEL_OK")
</pallas_src>

<mosaic_0001>
module attributes {stable_mosaic.version = 11 : i64} {
  func.func @_basic_block_kernel(%arg0: i32, %arg1: memref<1x16x16x4xbf16, #tpu.memory_space<vmem>>, %arg2: memref<36x128xbf16, #tpu.memory_space<vmem>>, %arg3: memref<1152x128xbf16, #tpu.memory_space<vmem>>, %arg4: memref<4x128xbf16, #tpu.memory_space<vmem>>, %arg5: memref<1x16x16x128xbf16, #tpu.memory_space<vmem>>) attributes {dimension_semantics = [#tpu.dimension_semantics<parallel>], iteration_bounds = array<i64: 2>, scalar_prefetch = 0 : i64, scratch_operands = 0 : i64, tpu.core_type = #tpu.core_type<tc>, window_params = [{transform_indices = @transform_0, window_bounds = array<i64: 1, 16, 16, 4>}, {pipeline_mode = #tpu.pipeline_mode<synchronous>, transform_indices = @transform_1, window_bounds = array<i64: 36, 128>}, {pipeline_mode = #tpu.pipeline_mode<synchronous>, transform_indices = @transform_2, window_bounds = array<i64: 1152, 128>}, {pipeline_mode = #tpu.pipeline_mode<synchronous>, transform_indices = @transform_3, window_bounds = array<i64: 4, 128>}, {transform_indices = @transform_4, window_bounds = array<i64: 1, 16, 16, 128>}]} {
    %c0 = arith.constant 0 : index
    %c0_0 = arith.constant 0 : index
    %c0_1 = arith.constant 0 : index
    %c0_2 = arith.constant 0 : index
    %0 = vector.load %arg1[%c0, %c0_0, %c0_1, %c0_2] : memref<1x16x16x4xbf16, #tpu.memory_space<vmem>>, vector<1x16x16x4xbf16>
    %1 = vector.shape_cast %0 : vector<1x16x16x4xbf16> to vector<16x16x4xbf16>
    %cst = arith.constant 0.000000e+00 : bf16
    %2 = vector.broadcast %cst : bf16 to vector<1x16x4xbf16>
    %cst_3 = arith.constant 0.000000e+00 : bf16
    %3 = vector.broadcast %cst_3 : bf16 to vector<16x1x4xbf16>
    %4 = vector.extract_strided_slice %1 {offsets = [0, 0, 0], sizes = [16, 15, 4], strides = [1, 1, 1]} : vector<16x16x4xbf16> to vector<16x15x4xbf16>
    %5 = tpu.concatenate %3, %4 in 1 : vector<16x1x4xbf16>, vector<16x15x4xbf16> -> vector<16x16x4xbf16>
    %6 = vector.extract_strided_slice %1 {offsets = [0, 1, 0], sizes = [16, 15, 4], strides = [1, 1, 1]} : vector<16x16x4xbf16> to vector<16x15x4xbf16>
    %7 = tpu.concatenate %6, %3 in 1 : vector<16x15x4xbf16>, vector<16x1x4xbf16> -> vector<16x16x4xbf16>
    %8 = vector.extract_strided_slice %5 {offsets = [0, 0, 0], sizes = [15, 16, 4], strides = [1, 1, 1]} : vector<16x16x4xbf16> to vector<15x16x4xbf16>
    %9 = tpu.concatenate %2, %8 in 0 : vector<1x16x4xbf16>, vector<15x16x4xbf16> -> vector<16x16x4xbf16>
    %10 = vector.shape_cast %9 : vector<16x16x4xbf16> to vector<256x4xbf16>
    %11 = vector.extract_strided_slice %1 {offsets = [0, 0, 0], sizes = [15, 16, 4], strides = [1, 1, 1]} : vector<16x16x4xbf16> to vector<15x16x4xbf16>
    %12 = tpu.concatenate %2, %11 in 0 : vector<1x16x4xbf16>, vector<15x16x4xbf16> -> vector<16x16x4xbf16>
    %13 = vector.shape_cast %12 : vector<16x16x4xbf16> to vector<256x4xbf16>
    %14 = vector.extract_strided_slice %7 {offsets = [0, 0, 0], sizes = [15, 16, 4], strides = [1, 1, 1]} : vector<16x16x4xbf16> to vector<15x16x4xbf16>
    %15 = tpu.concatenate %2, %14 in 0 : vector<1x16x4xbf16>, vector<15x16x4xbf16> -> vector<16x16x4xbf16>
    %16 = vector.shape_cast %15 : vector<16x16x4xbf16> to vector<256x4xbf16>
    %17 = vector.shape_cast %5 : vector<16x16x4xbf16> to vector<256x4xbf16>
    %18 = vector.shape_cast %1 : vector<16x16x4xbf16> to vector<256x4xbf16>
    %19 = vector.shape_cast %7 : vector<16x16x4xbf16> to vector<256x4xbf16>
    %20 = vector.extract_strided_slice %5 {offsets = [1, 0, 0], sizes = [15, 16, 4], strides = [1, 1, 1]} : vector<16x16x4xbf16> to vector<15x16x4xbf16>
    %21 = tpu.concatenate %20, %2 in 0 : vector<15x16x4xbf16>, vector<1x16x4xbf16> -> vector<16x16x4xbf16>
    %22 = vector.shape_cast %21 : vector<16x16x4xbf16> to vector<256x4xbf16>
    %23 = vector.extract_strided_slice %1 {offsets = [1, 0, 0], sizes = [15, 16, 4], strides = [1, 1, 1]} : vector<16x16x4xbf16> to vector<15x16x4xbf16>
    %24 = tpu.concatenate %23, %2 in 0 : vector<15x16x4xbf16>, vector<1x16x4xbf16> -> vector<16x16x4xbf16>
    %25 = vector.shape_cast %24 : vector<16x16x4xbf16> to vector<256x4xbf16>
    %26 = vector.extract_strided_slice %7 {offsets = [1, 0, 0], sizes = [15, 16, 4], strides = [1, 1, 1]} : vector<16x16x4xbf16> to vector<15x16x4xbf16>
    %27 = tpu.concatenate %26, %2 in 0 : vector<15x16x4xbf16>, vector<1x16x4xbf16> -> vector<16x16x4xbf16>
    %28 = vector.shape_cast %27 : vector<16x16x4xbf16> to vector<256x4xbf16>
    %29 = tpu.concatenate %10, %13, %16, %17, %18, %19, %22, %25, %28 in 1 : vector<256x4xbf16>, vector<256x4xbf16>, vector<256x4xbf16>, vector<256x4xbf16>, vector<256x4xbf16>, vector<256x4xbf16>, vector<256x4xbf16>, vector<256x4xbf16>, vector<256x4xbf16> -> vector<256x36xbf16>
    %c0_4 = arith.constant 0 : index
    %c0_5 = arith.constant 0 : index
    %30 = vector.load %arg2[%c0_4, %c0_5] : memref<36x128xbf16, #tpu.memory_space<vmem>>, vector<36x128xbf16>
    %cst_6 = arith.constant dense<0.000000e+00> : vector<256x128xf32>
    %31 = tpu.matmul %29, %30, %cst_6 {dimension_numbers = #tpu.dot_dimension_numbers<[1], [0], [0], [1], [0, 0, 1, 1], [], []>} : vector<256x36xbf16>, vector<36x128xbf16>, vector<256x128xf32> -> vector<256x128xf32>
    %cst_7 = arith.constant 0.000000e+00 : f32
    %32 = vector.broadcast %cst_7 : f32 to vector<256x128xf32>
    %33 = arith.maximumf %31, %32 : vector<256x128xf32>
    %34 = arith.truncf %33 : vector<256x128xf32> to vector<256x128xbf16>
    %35 = vector.shape_cast %34 : vector<256x128xbf16> to vector<16x16x128xbf16>
    %cst_8 = arith.constant 0.000000e+00 : bf16
    %36 = vector.broadcast %cst_8 : bf16 to vector<1x16x128xbf16>
    %cst_9 = arith.constant 0.000000e+00 : bf16
    %37 = vector.broadcast %cst_9 : bf16 to vector<16x1x128xbf16>
    %38 = vector.extract_strided_slice %35 {offsets = [0, 0, 0], sizes = [16, 15, 128], strides = [1, 1, 1]} : vector<16x16x128xbf16> to vector<16x15x128xbf16>
    %39 = tpu.concatenate %37, %38 in 1 : vector<16x1x128xbf16>, vector<16x15x128xbf16> -> vector<16x16x128xbf16>
    %40 = vector.extract_strided_slice %35 {offsets = [0, 1, 0], sizes = [16, 15, 128], strides = [1, 1, 1]} : vector<16x16x128xbf16> to vector<16x15x128xbf16>
    %41 = tpu.concatenate %40, %37 in 1 : vector<16x15x128xbf16>, vector<16x1x128xbf16> -> vector<16x16x128xbf16>
    %42 = vector.extract_strided_slice %39 {offsets = [0, 0, 0], sizes = [15, 16, 128], strides = [1, 1, 1]} : vector<16x16x128xbf16> to vector<15x16x128xbf16>
    %43 = tpu.concatenate %36, %42 in 0 : vector<1x16x128xbf16>, vector<15x16x128xbf16> -> vector<16x16x128xbf16>
    %44 = vector.shape_cast %43 : vector<16x16x128xbf16> to vector<256x128xbf16>
    %45 = vector.extract_strided_slice %35 {offsets = [0, 0, 0], sizes = [15, 16, 128], strides = [1, 1, 1]} : vector<16x16x128xbf16> to vector<15x16x128xbf16>
    %46 = tpu.concatenate %36, %45 in 0 : vector<1x16x128xbf16>, vector<15x16x128xbf16> -> vector<16x16x128xbf16>
    %47 = vector.shape_cast %46 : vector<16x16x128xbf16> to vector<256x128xbf16>
    %48 = vector.extract_strided_slice %41 {offsets = [0, 0, 0], sizes = [15, 16, 128], strides = [1, 1, 1]} : vector<16x16x128xbf16> to vector<15x16x128xbf16>
    %49 = tpu.concatenate %36, %48 in 0 : vector<1x16x128xbf16>, vector<15x16x128xbf16> -> vector<16x16x128xbf16>
    %50 = vector.shape_cast %49 : vector<16x16x128xbf16> to vector<256x128xbf16>
    %51 = vector.shape_cast %39 : vector<16x16x128xbf16> to vector<256x128xbf16>
    %52 = vector.shape_cast %35 : vector<16x16x128xbf16> to vector<256x128xbf16>
    %53 = vector.shape_cast %41 : vector<16x16x128xbf16> to vector<256x128xbf16>
    %54 = vector.extract_strided_slice %39 {offsets = [1, 0, 0], sizes = [15, 16, 128], strides = [1, 1, 1]} : vector<16x16x128xbf16> to vector<15x16x128xbf16>
    %55 = tpu.concatenate %54, %36 in 0 : vector<15x16x128xbf16>, vector<1x16x128xbf16> -> vector<16x16x128xbf16>
    %56 = vector.shape_cast %55 : vector<16x16x128xbf16> to vector<256x128xbf16>
    %57 = vector.extract_strided_slice %35 {offsets = [1, 0, 0], sizes = [15, 16, 128], strides = [1, 1, 1]} : vector<16x16x128xbf16> to vector<15x16x128xbf16>
    %58 = tpu.concatenate %57, %36 in 0 : vector<15x16x128xbf16>, vector<1x16x128xbf16> -> vector<16x16x128xbf16>
    %59 = vector.shape_cast %58 : vector<16x16x128xbf16> to vector<256x128xbf16>
    %60 = vector.extract_strided_slice %41 {offsets = [1, 0, 0], sizes = [15, 16, 128], strides = [1, 1, 1]} : vector<16x16x128xbf16> to vector<15x16x128xbf16>
    %61 = tpu.concatenate %60, %36 in 0 : vector<15x16x128xbf16>, vector<1x16x128xbf16> -> vector<16x16x128xbf16>
    %62 = vector.shape_cast %61 : vector<16x16x128xbf16> to vector<256x128xbf16>
    %63 = tpu.concatenate %44, %47, %50, %51, %52, %53, %56, %59, %62 in 1 : vector<256x128xbf16>, vector<256x128xbf16>, vector<256x128xbf16>, vector<256x128xbf16>, vector<256x128xbf16>, vector<256x128xbf16>, vector<256x128xbf16>, vector<256x128xbf16>, vector<256x128xbf16> -> vector<256x1152xbf16>
    %c0_10 = arith.constant 0 : index
    %c0_11 = arith.constant 0 : index
    %64 = vector.load %arg3[%c0_10, %c0_11] : memref<1152x128xbf16, #tpu.memory_space<vmem>>, vector<1152x128xbf16>
    %cst_12 = arith.constant dense<0.000000e+00> : vector<256x128xf32>
    %65 = tpu.matmul %63, %64, %cst_12 {dimension_numbers = #tpu.dot_dimension_numbers<[1], [0], [0], [1], [0, 0, 1, 1], [], []>} : vector<256x1152xbf16>, vector<1152x128xbf16>, vector<256x128xf32> -> vector<256x128xf32>
    %66 = vector.shape_cast %1 : vector<16x16x4xbf16> to vector<256x4xbf16>
    %c0_13 = arith.constant 0 : index
    %c0_14 = arith.constant 0 : index
    %67 = vector.load %arg4[%c0_13, %c0_14] : memref<4x128xbf16, #tpu.memory_space<vmem>>, vector<4x128xbf16>
    %cst_15 = arith.constant dense<0.000000e+00> : vector<256x128xf32>
    %68 = tpu.matmul %66, %67, %cst_15 {dimension_numbers = #tpu.dot_dimension_numbers<[1], [0], [0], [1], [0, 0, 1, 1], [], []>} : vector<256x4xbf16>, vector<4x128xbf16>, vector<256x128xf32> -> vector<256x128xf32>
    %69 = arith.addf %65, %68 : vector<256x128xf32>
    %cst_16 = arith.constant 0.000000e+00 : f32
    %70 = vector.broadcast %cst_16 : f32 to vector<256x128xf32>
    %71 = arith.maximumf %69, %70 : vector<256x128xf32>
    %72 = arith.truncf %71 : vector<256x128xf32> to vector<256x128xbf16>
    %73 = vector.shape_cast %72 : vector<256x128xbf16> to vector<16x16x128xbf16>
    %c0_17 = arith.constant 0 : index
    %c0_18 = arith.constant 0 : index
    %c0_19 = arith.constant 0 : index
    %c0_20 = arith.constant 0 : index
    %74 = vector.load %arg5[%c0_17, %c0_18, %c0_19, %c0_20] : memref<1x16x16x128xbf16, #tpu.memory_space<vmem>>, vector<1x16x16x128xbf16>
    %75 = vector.shape_cast %74 : vector<1x16x16x128xbf16> to vector<16x16x128xbf16>
    %76 = vector.shape_cast %73 : vector<16x16x128xbf16> to vector<1x16x16x128xbf16>
    tpu.vector_store %arg5[%c0_17, %c0_18, %c0_19, %c0_20], %76 {strides = array<i32>} : memref<1x16x16x128xbf16, #tpu.memory_space<vmem>>, vector<1x16x16x128xbf16>,
    return
  }
  func.func @transform_0(%arg0: i32) -> (i32, i32, i32, i32) {
    %c0_i32 = arith.constant 0 : i32
    %c0_i32_0 = arith.constant 0 : i32
    %c0_i32_1 = arith.constant 0 : i32
    %c0_i32_2 = arith.constant 0 : i32
    return %arg0, %c0_i32, %c0_i32_0, %c0_i32_1 : i32, i32, i32, i32
  }
  func.func @transform_1(%arg0: i32) -> (i32, i32) {
    %c0_i32 = arith.constant 0 : i32
    %c0_i32_0 = arith.constant 0 : i32
    %c0_i32_1 = arith.constant 0 : i32
    return %c0_i32, %c0_i32_0 : i32, i32
  }
  func.func @transform_2(%arg0: i32) -> (i32, i32) {
    %c0_i32 = arith.constant 0 : i32
    %c0_i32_0 = arith.constant 0 : i32
    %c0_i32_1 = arith.constant 0 : i32
    return %c0_i32, %c0_i32_0 : i32, i32
  }
  func.func @transform_3(%arg0: i32) -> (i32, i32) {
    %c0_i32 = arith.constant 0 : i32
    %c0_i32_0 = arith.constant 0 : i32
    %c0_i32_1 = arith.constant 0 : i32
    return %c0_i32, %c0_i32_0 : i32, i32
  }
  func.func @transform_4(%arg0: i32) -> (i32, i32, i32, i32) {
    %c0_i32 = arith.constant 0 : i32
    %c0_i32_0 = arith.constant 0 : i32
    %c0_i32_1 = arith.constant 0 : i32
    %c0_i32_2 = arith.constant 0 : i32
    return %arg0, %c0_i32, %c0_i32_0, %c0_i32_1 : i32, i32, i32, i32
  }
}

</mosaic_0001>

<bundles_post_ra>
// kernel: tpu_custom_call.1
= control target key start
LH: loop header
LB: loop body
LE: loop exit
PB: predicated region body
PF: predicated region fallthrough
CT: control target
= control target key end

     0   :  { %9 = vsyncpa [#allocation3], 0  ;;  %s6181_s0 = inlined_call_operand.vmem [shape: bf16[2,16,16,4], index: 0, kind: input, shape index: {}]   ;;  %s6182_s1 = inlined_call_operand.vmem [shape: bf16[36,128], index: 1, kind: input, shape index: {}]   ;;  %s6183_s2 = inlined_call_operand.hbm [shape: bf16[1152,128], index: 2, kind: input, shape index: {}]   ;;  %s6184_s3 = inlined_call_operand.vmem [shape: bf16[4,128], index: 3, kind: input, shape index: {}]   ;;  %s6185_s4 = inlined_call_operand.hbm [shape: bf16[2,16,16,128], index: 4, kind: output, shape index: {}]  }
   0x1   :  { %10 = vsyncpa [#allocation4], 0 }
   0x2   :  { %12 = vsyncpa [#allocation4 + $0x1], 0  ;;  %s4829_s15 = smov 0   ;;  %s4831_s16 = smov 0  }
   0x3   :  { %s4833_s17 = smov 0   ;;  %s4835_s18 = smov 0  }
   0x4 LB: > { %s4850_s19 = sadd.s32 4294967295, %s4788_s18   ;;  %s3441_s20 = sadd.s32 4294967294, %s4788_s18   ;;  %s4788_s18 = sphi %s4835_s18, %s6246_s18   ;;  %s4784_s17 = sphi %s4833_s17, %s6245_s17   ;;  %s4780_s16 = sphi %s4831_s16, %s6244_s16   ;;  %s4776_s15 = sphi %s4829_s15, %s6243_s15  }
   0x5   : > { %s4854_s21 = sadd.s32 1, %s4788_s18   ;;  %s114_s22 = sadd.s32 1, %s4784_s17 }
   0x6   : > { %s111_s23 = ssub.s32 %s4788_s18, %s4854_s21  ;;  %p124_p0 = scmp.ne.s32.totalorder %s4784_s17, %s4780_s16 }
   0x7   : > { %p112_p1 = scmp.eq.s32.totalorder %s111_s23, 0  ;;  %p125_p2 = scmp.eq.s32.totalorder %s4850_s19, 1 }
   0x8   : > { %p130_p3 = scmp.ne.s32.totalorder %s4780_s16, %s4776_s15  ;;  %p131_p4 = scmp.eq.s32.totalorder %s3441_s20, 1 }
   0x9   : > { %s4865_s24 = scalar_select %p112_p1, %s4784_s17, %s114_s22  }
   0xa   : > { %p4867_p5 = por %p125_p2, %p124_p0  ;;  %p4871_p6 = por %p131_p4, %p130_p3 }
   0xb   : > { %p3442_p7 = scmp.ge.s32.totalorder %s4788_s18, 1  ;;  %p138_p8 = scmp.lt.s32.totalorder %s4788_s18, 3 }
   0xc   : > { %s6207_s25 = scalar_select %p4867_p5, 1, 0 }
   0xd   : > { %s6208_s26 = scalar_select %p4871_p6, 1, 0 }
   0xe   : > { %p6186_p9 = scmp.eq.s32.totalorder %s4850_s19, 0  ;;  %p4878_p10 = pnand %p3442_p7, %p138_p8 }
   0xf   : > { %s4790_s28 = smov [#allocation2]   ;;  %s4694_s7 = scalar_lea.hbm %s6183_s2, 9216 }
  0x10   : > { %s6209_s27 = scalar_select %p4878_p10, 1, 0 }
  0x11   : > { %s153_s29 = sshll.u32 %s4790_s28, 4  ;;  %p4539_p11 = pneg %p4878_p10  ;;  %s154_s29 = int_to_ptr.vmem [resolvable:$true] %s153_s29 }
  0x12   : > { %p4695_p13 = scmp.ne.s32.totalorder %s6183_s2, %s4694_s7  ;;  %p4701_p3 = scmp.lt.u32.totalorder %s4694_s7, %s6183_s2 }
  0x13   : > { %p4886_p12 = pnand %p6186_p9, %p4539_p11 }
  0x15   : > { %p4696_p0 = pneg %p4886_p12 }
  0x17   : > { %p4697_p1 = pnand %p4696_p0, %p4695_p13 }
  0x19   : > { %p4698_p2 = pneg %p4697_p1 }
  0x1b   : > { %p4703_p4 = pnand %p4701_p3, %p4698_p2 }
  0x1d   : > { %4706 = shalt.err (!%p4703_p4)
}
  0x1e   : > { %s4707_s12 = scalar_lea.vmem %s154_s29, 9216  ;;  %p4715_p9 = scmp.lt.s32.totalorder %s154_s29, %s154_s29 }
  0x1f   : > { %p4708_p7 = scmp.ne.s32.totalorder %s154_s29, %s4707_s12  ;;  %p4716_p6 = scmp.lt.s32.totalorder %s4707_s12, %s4707_s12 }
  0x21   : > { %p4710_p8 = pnand %p4708_p7, %p4696_p0  ;;  %p4717_p5 = por %p4716_p6, %p4715_p9 }
  0x23   : > { %p4711_p11 = pneg %p4710_p8 }
  0x25   : > { %p4718_p10 = pnand %p4717_p5, %p4711_p11 }
  0x27   : > { %4721 = shalt.err (!%p4718_p10)
}
  0x28   : > { %s4791_s13 = smov 64   ;;  %s4792_s14 = smov 4  }
  0x29   : > { %4542 = dma.hbm_to_vmem [thread:$0]  (!%p4886_p12), %s6183_s2, 9216, %s154_s29, [#allocation3], %s4791_s13, %s4791_s13, %s4792_s14  }
  0x2a   : > { %p6211_p13 = scmp.ne.s32.totalorder %s6209_s27, 0 }
  0x2c   : > { %180 = sbr.rel (%p6211_p13) target bundleno = 1083 (0x43b), region = 36 }
  0x33   : > { %p6212_p1 = scmp.eq.s32.totalorder %s4850_s19, 0 }
  0x35   : > { %4767 = dma.done.wait (%p6212_p1), [#allocation3], 9216   ;;  %p6213_p0 = pmov %p6212_p1 }
  0x36   : > { %v6189_v0 = vmov 0   ;;  %s4794_s23 = smov 4   ;;  %s4795_s28 = smov 8   ;;  %vm519_vm0 = vcmask 1047552   ;;  %vm520_vm1 = vsmask.f32 7424 }
  0x37   : > { %4769 = vsyncadd (%p6213_p0), [#allocation3], 4294958080  ;;  %539 = vrot.lane.b32.xlu0 %v6189_v0, %s4794_s23  ;;  %586 = vrot.lane.b32.xlu1 %v6189_v0, %s4795_s28  ;;  %p206_p5 = scmp.lt.s32.totalorder %s4850_s19, 1  ;;  %vm453_vm2 = vsmask.f32 256  ;;  %vm452_vm3 = vcmask 1040384  }
  0x38   : > { %s4796_s7 = smov 16   ;;  %vm4936_vm4 = vmand %vm519_vm0, %vm520_vm1  ;;  %s4797_s8 = smov 12   ;;  %v4604_v24 = vld [vmem:[%s6182_s1] sm:$0xff]   ;;  %vm829_vm6 = vcmask 31744   ;;  %v4605_v28 = vld [vmem:[%s6182_s1 + $0x8] sm:$0xff]   ;;  %vm1162_vm7 = vcmask 1041408  }
  0x39   : > { %s207_s27 = scalar_select %p206_p5, %s4850_s19, 1  ;;  %vm4941_vm5 = vmand %vm452_vm3, %vm453_vm2  ;;  %4248 = vmatprep.subr.bf16.mxu0 %v4604_v24  ;;  %v4607_v31 = vld [vmem:[%s6182_s1 + $0x10] ss:$0 sps:$4 sm:$0x33]   ;;  %vm878_vm8 = vcmask 64512   ;;  %vm911_vm9 = vcmask 97280  }
  0x3a   : > { %s4798_s11 = smov 20   ;;  %4249 = vmatpush3.bf16.msra.mxu0 %v4604_v24  ;;  %s4799_s14 = smov 24   ;;  %v1164_v34 = vsel %vm1162_vm7, %v4607_v31, 0  ;;  %vm944_vm10 = vcmask 130048   ;;  %vm977_vm11 = vcmask 162816   ;;  %vm1010_vm12 = vcmask 195584  }
  0x3b   : > { %s3611_s29 = sshll.u32 %s207_s27, 7  ;;  %4250 = vmatprep.subr.bf16.mxu0 %v4605_v28  ;;  %s4800_s27 = smov 28   ;;  %vm1043_vm13 = vcmask 228352   ;;  %vm1076_vm14 = vcmask 261120   ;;  %vm1129_vm15 = vcmask 293888  }
  0x3c   : > { %s4921_s6 = scalar_lea.vmem %s6181_s0, %s3611_s29  ;;  %s4801_s29 = smov 32  }
  0x3d   : > { %v4595_v1 = vld [vmem:[%s4921_s6] sm:$0xff]   ;;  %v4925_v2 = vld [vmem:[%s4921_s6 + $0x8] sm:$0xff]   ;;  %v4933_v7 = vld [vmem:[%s4921_s6 + $0x10] sm:$0xff]   ;;  %p6241_p9 = scmp.ne.s32.totalorder %s6207_s25, 0 }
  0x3e   : > { %541 = vrot.lane.b32.xlu0 %v4595_v1, %s4794_s23  ;;  %v325_v3 = vshrl.u32 %v4595_v1, 16  ;;  %v328_v4 = vshll.u32 %v4595_v1, 16  ;;  %668 = vrot.lane.b32.xlu1 %v4925_v2, %s4796_s7  ;;  %v332_v5 = vshrl.u32 %v4925_v2, 16  ;;  %v335_v6 = vshll.u32 %v4925_v2, 16  ;;  %v4967_v25 = vld [vmem:[%s4921_s6 + $0x40] sm:$0xff]   ;;  %v4598_v32 = vld [vmem:[%s4921_s6 + $0x18] sm:$0xff]  }
  0x3f   : > { %v339_v16 = vshrl.u32 %v4933_v7, 16  ;;  %v342_v20 = vshll.u32 %v4933_v7, 16  ;;  %4304 = vmatprep.mubr.msk.bf16.mxu1 %vm829_vm6, %v4967_v25  ;;  %4251 = vmatpush3.bf16.msra.mxu0 %v4605_v28  ;;  %v346_v35 = vshrl.u32 %v4598_v32, 16  ;;  %v349_v38 = vshll.u32 %v4598_v32, 16  ;;  %v4599_v40 = vld [vmem:[%s4921_s6 + $0x20] sm:$0xff]   ;;  %v4600_v52 = vld [vmem:[%s4921_s6 + $0x28] sm:$0xff]  }
  0x40   : > { %v471_v8 = vrot.slane %v328_v4, 1  ;;  %v327_v10 = vrot.slane %v325_v3, 7  ;;  %v334_v12 = vrot.slane %v332_v5, 7  ;;  %v473_v15 = vrot.slane %v335_v6, 1  ;;  %4530 = vmatprep.subr.msk.bf16.mxu0 %vm1162_vm7, %v4607_v31  ;;  %v4601_v58 = vld [vmem:[%s4921_s6 + $0x30] sm:$0xff]  }
  0x41   : > { %v341_v23 = vrot.slane %v339_v16, 7  ;;  %v475_v29 = vrot.slane %v342_v20, 1  ;;  %v348_v37 = vrot.slane %v346_v35, 7  ;;  %v477_v41 = vrot.slane %v349_v38, 1 }
  0x42   : > { %666 = vrot.lane.b32.xlu0 %v4595_v1, %s4796_s7  ;;  %v472_v13 = vor.u32 %v471_v8, %v325_v3  ;;  %v330_v14 = vor.u32 %v328_v4, %v327_v10  ;;  %v337_v17 = vor.u32 %v335_v6, %v334_v12  ;;  %v474_v22 = vor.u32 %v473_v15, %v332_v5 }
  0x43   : > { %v344_v27 = vor.u32 %v342_v20, %v341_v23  ;;  %v476_v33 = vor.u32 %v475_v29, %v339_v16  ;;  %4253 = vmatpush3.bf16.msra.mxu0 %v1164_v34  ;;  %v351_v39 = vor.u32 %v349_v38, %v348_v37  ;;  %v353_v43 = vshrl.u32 %v4599_v40, 16  ;;  %v5101_v34 = vld [vmem:[%s4921_s6 + $0x48] sm:$0xff]  }
  0x44   : > { %v522_v18 = vsel %vm4936_vm4, %v472_v13, 0  ;;  %v4951_v19 = vsel %vm4941_vm5, 0, %v330_v14  ;;  %v4959_v21 = vsel %vm4941_vm5, 0, %v337_v17  ;;  %v523_v26 = vsel %vm4936_vm4, %v474_v22, 0 }
  0x45   : > { %588 = vrot.lane.b32.xlu1 %v522_v18, %s4795_s28  ;;  %v4982_v30 = vsel %vm4941_vm5, 0, %v344_v27  ;;  %v524_v36 = vsel %vm4936_vm4, %v476_v33, 0  ;;  %v5008_v42 = vsel %vm4941_vm5, 0, %v351_v39  ;;  %v355_v44 = vrot.slane %v353_v43, 7 }
  0x46   : > { %634 = vrot.lane.b32.xlu0 %v4951_v19, %s4797_s8  ;;  %v356_v45 = vshll.u32 %v4599_v40, 16  ;;  %v478_v46 = vor.u32 %v477_v41, %v346_v35  ;;  %v360_v54 = vshrl.u32 %v4600_v52, 16  ;;  %v363_v56 = vshll.u32 %v4600_v52, 16 }
  0x47   : > { %v367_v61 = vshrl.u32 %v4601_v58, 16  ;;  %v370_v63 = vshll.u32 %v4601_v58, 16  ;;  %v381_v17 = vshrl.u32 %v4967_v25, 16  ;;  %v384_v22 = vshll.u32 %v4967_v25, 16 }
  0x48   : > { %v358_v47 = vor.u32 %v356_v45, %v355_v44  ;;  %v525_v48 = vsel %vm4936_vm4, %v478_v46, 0  ;;  %v479_v50 = vrot.slane %v356_v45, 1  ;;  %v362_v55 = vrot.slane %v360_v54, 7 }
  0x49   : > { %636 = vrot.lane.b32.xlu1 %v4959_v21, %s4797_s8  ;;  %v481_v59 = vrot.slane %v363_v56, 1  ;;  %v369_v62 = vrot.slane %v367_v61, 7  ;;  %v483_v5 = vrot.slane %v370_v63, 1  ;;  %v383_v20 = vrot.slane %v381_v17, 7 }
  0x4a   : > { %699 = vrot.lane.b32.xlu0 %v522_v18, %s4798_s11  ;;  %v5023_v49 = vsel %vm4941_vm5, 0, %v358_v47  ;;  %v480_v51 = vor.u32 %v479_v50, %v353_v43  ;;  %v365_v57 = vor.u32 %v363_v56, %v362_v55  ;;  %v487_v29 = vrot.slane %v384_v22, 1  ;;  %v5117_v47 = vld [vmem:[%s4921_s6 + $0x50] sm:$0xff]  }
  0x4b   : > { %v482_v1 = vor.u32 %v481_v59, %v360_v54  ;;  %v372_v3 = vor.u32 %v370_v63, %v369_v62  ;;  %v484_v6 = vor.u32 %v483_v5, %v367_v61  ;;  %v388_v37 = vshrl.u32 %v5101_v34, 16 }
  0x4c   : > { %v526_v53 = vsel %vm4936_vm4, %v480_v51, 0  ;;  %v5043_v60 = vsel %vm4941_vm5, 0, %v365_v57  ;;  %v488_v33 = vor.u32 %v487_v29, %v381_v17  ;;  %v391_v41 = vshll.u32 %v5101_v34, 16  ;;  %v5167_v29 = vld [vmem:[%s4921_s6 + $0x58] sm:$0xff]  }
  0x4d   : > { %701 = vrot.lane.b32.xlu1 %v523_v26, %s4798_s11  ;;  %v5060_v4 = vsel %vm4941_vm5, 0, %v372_v3  ;;  %v528_v8 = vsel %vm4936_vm4, %v484_v6, 0  ;;  %v395_v55 = vshrl.u32 %v5117_v47, 16 }
  0x4e   : > { %731 = vrot.lane.b32.xlu0 %v4959_v21, %s4799_s14  ;;  %v489_v54 = vrot.slane %v391_v41, 1 }
  0x51   : > { %733 = vrot.lane.b32.xlu1 %v4982_v30, %s4799_s14 }
  0x52   : > { %765 = vrot.lane.b32.xlu0 %v4925_v2, %s4800_s27 }
  0x55   : > { %767 = vrot.lane.b32.xlu1 %v4933_v7, %s4800_s27 }
  0x56   : > { %797 = vrot.lane.b32.xlu0 %v523_v26, %s4801_s29 }
  0x59   : > { %799 = vrot.lane.b32.xlu1 %v524_v36, %s4801_s29 }
  0x5a   : > { %543 = vrot.lane.b32.xlu0 %v4925_v2, %s4794_s23  ;;  %v527_v2 = vsel %vm4936_vm4, %v482_v1, 0  ;;  %v397_v1 = vrot.slane %v395_v55, 7 }
  0x5d   : > { %545 = vrot.lane.b32.xlu1 %v4933_v7, %s4794_s23 }
  0x5e   : > { %590 = vrot.lane.b32.xlu0 %v523_v26, %s4795_s28  ;;  %v386_v26 = vor.u32 %v384_v22, %v383_v20 }
  0x60   : > { %v5095_v28 = vsel %vm4941_vm5, 0, %v386_v26 }
  0x61   : > { %592 = vrot.lane.b32.xlu1 %v524_v36, %s4795_s28 }
  0x62   : > { %638 = vrot.lane.b32.xlu0 %v4982_v30, %s4797_s8 }
  0x65   : > { %640 = vrot.lane.b32.xlu1 %v5008_v42, %s4797_s8 }
  0x66   : > { %670 = vrot.lane.b32.xlu0 %v4933_v7, %s4796_s7  ;;  %v4602_v7 = vld [vmem:[%s4921_s6 + $0x38] sm:$0xff]  }
  0x67   : > { %v374_v10 = vshrl.u32 %v4602_v7, 16  ;;  %v377_v13 = vshll.u32 %v4602_v7, 16 }
  0x69   : > { %672 = vrot.lane.b32.xlu1 %v4598_v32, %s4796_s7  ;;  %v376_v12 = vrot.slane %v374_v10, 7  ;;  %v485_v16 = vrot.slane %v377_v13, 1 }
  0x6a   : > { %703 = vrot.lane.b32.xlu0 %v524_v36, %s4798_s11  ;;  %v530_v36 = vsel %vm4936_vm4, %v488_v33, 0 }
  0x6b   : > { %v379_v14 = vor.u32 %v377_v13, %v376_v12  ;;  %v486_v18 = vor.u32 %v485_v16, %v374_v10 }
  0x6d   : > { %705 = vrot.lane.b32.xlu1 %v525_v48, %s4798_s11  ;;  %v5079_v15 = vsel %vm4941_vm5, 0, %v379_v14  ;;  %v529_v24 = vsel %vm4936_vm4, %v486_v18, 0 }
  0x6e   : > { %735 = vrot.lane.b32.xlu0 %v5008_v42, %s4799_s14 }
  0x71   : > { %737 = vrot.lane.b32.xlu1 %v5023_v49, %s4799_s14 }
  0x72   : > { %769 = vrot.lane.b32.xlu0 %v4598_v32, %s4800_s27 }
  0x75   : > { %771 = vrot.lane.b32.xlu1 %v4599_v40, %s4800_s27 }
  0x76   : > { %801 = vrot.lane.b32.xlu0 %v525_v48, %s4801_s29 }
  0x79   : > { %803 = vrot.lane.b32.xlu1 %v526_v53, %s4801_s29 }
  0x7a   : > { %547 = vrot.lane.b32.xlu0 %v4598_v32, %s4794_s23 }
  0x7d   : > { %549 = vrot.lane.b32.xlu1 %v4599_v40, %s4794_s23 }
  0x7e   : > { %594 = vrot.lane.b32.xlu0 %v525_v48, %s4795_s28 }
  0x81   : > { %596 = vrot.lane.b32.xlu1 %v526_v53, %s4795_s28 }
  0x82   : > { %642 = vrot.lane.b32.xlu0 %v5023_v49, %s4797_s8 }
  0x85   : > { %644 = vrot.lane.b32.xlu1 %v5043_v60, %s4797_s8 }
  0x86   : > { %674 = vrot.lane.b32.xlu0 %v4599_v40, %s4796_s7  ;;  %v390_v40 = vrot.slane %v388_v37, 7 }
  0x88   : > { %v393_v46 = vor.u32 %v391_v41, %v390_v40 }
  0x89   : > { %676 = vrot.lane.b32.xlu1 %v4600_v52, %s4796_s7 }
  0x8a   : > { %707 = vrot.lane.b32.xlu0 %v526_v53, %s4798_s11  ;;  %v5126_v53 = vsel %vm4941_vm5, 0, %v393_v46 }
  0x8d   : > { %709 = vrot.lane.b32.xlu1 %v527_v2, %s4798_s11 }
  0x8e   : > { %739 = vrot.lane.b32.xlu0 %v5043_v60, %s4799_s14 }
  0x91   : > { %741 = vrot.lane.b32.xlu1 %v5060_v4, %s4799_s14 }
  0x92   : > { %773 = vrot.lane.b32.xlu0 %v4600_v52, %s4800_s27 }
  0x95   : > { %775 = vrot.lane.b32.xlu1 %v4601_v58, %s4800_s27 }
  0x96   : > { %805 = vrot.lane.b32.xlu0 %v527_v2, %s4801_s29 }
  0x99   : > { %807 = vrot.lane.b32.xlu1 %v528_v8, %s4801_s29 }
  0x9a   : > { %551 = vrot.lane.b32.xlu0 %v4600_v52, %s4794_s23 }
  0x9d   : > { %553 = vrot.lane.b32.xlu1 %v4601_v58, %s4794_s23 }
  0x9e   : > { %598 = vrot.lane.b32.xlu0 %v527_v2, %s4795_s28  ;;  %v398_v2 = vshll.u32 %v5117_v47, 16 }
  0xa0   : > { %v400_v14 = vor.u32 %v398_v2, %v397_v1 }
  0xa1   : > { %600 = vrot.lane.b32.xlu1 %v528_v8, %s4795_s28 }
  0xa2   : > { %646 = vrot.lane.b32.xlu0 %v5060_v4, %s4797_s8  ;;  %v5160_v22 = vsel %vm4941_vm5, 0, %v400_v14 }
  0xa5   : > { %648 = vrot.lane.b32.xlu1 %v5079_v15, %s4797_s8 }
  0xa6   : > { %678 = vrot.lane.b32.xlu0 %v4601_v58, %s4796_s7 }
  0xa9   : > { %680 = vrot.lane.b32.xlu1 %v4602_v7, %s4796_s7  ;;  %v540_v23 = vpop.permute.xlu0 %539  ;;  %v587_v27 = vpop.permute.xlu1 %586 }
  0xaa   : > { %711 = vrot.lane.b32.xlu0 %v528_v8, %s4798_s11  ;;  %v832_v45 = vsel %vm829_vm6, 0, %v540_v23  ;;  %v491_v23 = vrot.slane %v398_v2, 1 }
  0xab   : > { %v880_v51 = vsel %vm878_vm8, %v832_v45, %v587_v27 }
  0xac   : > { %v492_v27 = vor.u32 %v491_v23, %v395_v55 }
  0xad   : > { %713 = vrot.lane.b32.xlu1 %v529_v24, %s4798_s11 }
  0xae   : > { %743 = vrot.lane.b32.xlu0 %v5079_v15, %s4799_s14  ;;  %v532_v33 = vsel %vm4936_vm4, %v492_v27, 0  ;;  %v5235_v27 = vld [vmem:[%s4921_s6 + $0x68] sm:$0xff]  }
  0xb0   : > { %v542_v31 = vpop.permute.xlu0 %541  ;;  %v669_v32 = vpop.permute.xlu1 %668 }
  0xb1   : > { %745 = vrot.lane.b32.xlu1 %v5095_v28, %s4799_s14  ;;  %v835_v56 = vsel %vm829_vm6, %v4951_v19, %v542_v31  ;;  %v490_v19 = vor.u32 %v489_v54, %v388_v37 }
  0xb2   : > { %777 = vrot.lane.b32.xlu0 %v4602_v7, %s4800_s27 }
  0xb3   : > { %v531_v13 = vsel %vm4936_vm4, %v490_v19, 0 }
  0xb4   : > { %v667_v35 = vpop.permute.xlu0 %666 }
  0xb5   : > { %779 = vrot.lane.b32.xlu1 %v4967_v25, %s4800_s27 }
  0xb6   : > { %809 = vrot.lane.b32.xlu0 %v529_v24, %s4801_s29 }
  0xb7   : > { %v589_v38 = vpop.permute.xlu1 %588 }
  0xb8   : > { %v635_v39 = vpop.permute.xlu0 %634  ;;  %v882_v58 = vsel %vm878_vm8, %v835_v56, %v589_v38 }
  0xb9   : > { %811 = vrot.lane.b32.xlu1 %v530_v36, %s4801_s29  ;;  %v913_v52 = vsel %vm911_vm9, %v880_v51, %v635_v39  ;;  %v405_v39 = vshll.u32 %v5167_v29, 16 }
  0xba   : > { %555 = vrot.lane.b32.xlu0 %v4602_v7, %s4794_s23  ;;  %v946_v62 = vsel %vm944_vm10, %v913_v52, %v667_v35  ;;  %v402_v35 = vshrl.u32 %v5167_v29, 16 }
  0xbb   : > { %v637_v43 = vpop.permute.xlu1 %636 }
  0xbc   : > { %v700_v44 = vpop.permute.xlu0 %699  ;;  %v915_v61 = vsel %vm911_vm9, %v882_v58, %v637_v43  ;;  %v404_v38 = vrot.slane %v402_v35, 7 }
  0xbd   : > { %557 = vrot.lane.b32.xlu1 %v4967_v25, %s4794_s23  ;;  %v979_v63 = vsel %vm977_vm11, %v946_v62, %v700_v44  ;;  %v948_v6 = vsel %vm944_vm10, %v915_v61, %v669_v32  ;;  %v5183_v44 = vld [vmem:[%s4921_s6 + $0x60] sm:$0xff]  }
  0xbe   : > { %602 = vrot.lane.b32.xlu0 %v529_v24, %s4795_s28  ;;  %v407_v43 = vor.u32 %v405_v39, %v404_v38  ;;  %v409_v52 = vshrl.u32 %v5183_v44, 16  ;;  %v412_v19 = vshll.u32 %v5183_v44, 16 }
  0xbf   : > { %v702_v48 = vpop.permute.xlu1 %701 }
  0xc0   : > { %v732_v50 = vpop.permute.xlu0 %731  ;;  %v981_v10 = vsel %vm977_vm11, %v948_v6, %v702_v48  ;;  %v5192_v51 = vsel %vm4941_vm5, 0, %v407_v43 }
  0xc1   : > { %604 = vrot.lane.b32.xlu1 %v530_v36, %s4795_s28  ;;  %v1012_v3 = vsel %vm1010_vm12, %v979_v63, %v732_v50  ;;  %v493_v50 = vrot.slane %v405_v39, 1  ;;  %v411_v63 = vrot.slane %v409_v52, 7  ;;  %v419_v39 = vshll.u32 %v5235_v27, 16 }
  0xc2   : > { %650 = vrot.lane.b32.xlu0 %v5095_v28, %s4797_s8 }
  0xc3   : > { %v734_v57 = vpop.permute.xlu1 %733 }
  0xc4   : > { %v766_v59 = vpop.permute.xlu0 %765  ;;  %v1014_v12 = vsel %vm1010_vm12, %v981_v10, %v734_v57 }
  0xc5   : > { %652 = vrot.lane.b32.xlu1 %v5126_v53, %s4797_s8  ;;  %v1045_v7 = vsel %vm1043_vm13, %v1012_v3, %v766_v59  ;;  %v494_v59 = vor.u32 %v493_v50, %v402_v35  ;;  %v416_v35 = vshrl.u32 %v5235_v27, 16 }
  0xc6   : > { %682 = vrot.lane.b32.xlu0 %v4967_v25, %s4796_s7 }
  0xc7   : > { %v768_v5 = vpop.permute.xlu1 %767  ;;  %v418_v38 = vrot.slane %v416_v35, 7 }
  0xc8   : > { %v798_v8 = vpop.permute.xlu0 %797  ;;  %v1047_v16 = vsel %vm1043_vm13, %v1014_v12, %v768_v5  ;;  %v414_v12 = vor.u32 %v412_v19, %v411_v63 }
  0xc9   : > { %684 = vrot.lane.b32.xlu1 %v5101_v34, %s4796_s7  ;;  %v1078_v25 = vsel %vm1076_vm14, %v1045_v7, %v798_v8  ;;  %v421_v43 = vor.u32 %v419_v39, %v418_v38  ;;  %v4620_v38 = vld [vmem:[#allocation2 + $0x58] sm:$0xff]  }
  0xca   : > { %715 = vrot.lane.b32.xlu0 %v530_v36, %s4798_s11  ;;  %4254 = vmatprep.mubr.msk.bf16.mxu0 %vm1129_vm15, %v1078_v25  ;;  %v533_v25 = vsel %vm4936_vm4, %v494_v59, 0 }
  0xcb   : > { %v800_v17 = vpop.permute.xlu1 %799 }
  0xcc   : > { %v1080_v18 = vsel %vm1076_vm14, %v1047_v16, %v800_v17  ;;  %v544_v20 = vpop.permute.xlu0 %543 }
  0xcd   : > { %717 = vrot.lane.b32.xlu1 %v531_v13, %s4798_s11  ;;  %4255 = vmatmul.mubr.msk.bf16.vlgmr.msra.gmra.mrb[0].mxu0 %vm1129_vm15, %v1080_v18  ;;  %v838_v46 = vsel %vm829_vm6, %v4959_v21, %v544_v20  ;;  %v5228_v18 = vsel %vm4941_vm5, 0, %v414_v12  ;;  %v495_v20 = vrot.slane %v412_v19, 1  ;;  %v4614_v19 = vld [vmem:[#allocation2 + $0x40] sm:$0xff]  }
  0xce   : > { %747 = vrot.lane.b32.xlu0 %v5126_v53, %s4799_s14 }
  0xcf   : > { %v546_v24 = vpop.permute.xlu1 %545 }
  0xd0   : > { %v591_v26 = vpop.permute.xlu0 %590  ;;  %v841_v21 = vsel %vm829_vm6, %v4982_v30, %v546_v24 }
  0xd1   : > { %749 = vrot.lane.b32.xlu1 %v5160_v22, %s4799_s14  ;;  %v884_v54 = vsel %vm878_vm8, %v838_v46, %v591_v26  ;;  %v496_v26 = vor.u32 %v495_v20, %v409_v52  ;;  %v497_v52 = vrot.slane %v419_v39, 1  ;;  %v4617_v20 = vld [vmem:[#allocation2 + $0x8] sm:$0xff]  }
  0xd2   : > { %781 = vrot.lane.b32.xlu0 %v5101_v34, %s4800_s27 }
  0xd3   : > { %v593_v31 = vpop.permute.xlu1 %592  ;;  %v498_v63 = vor.u32 %v497_v52, %v416_v35  ;;  %v4619_v35 = vld [vmem:[#allocation2 + $0x10] sm:$0xff]  }
  0xd4   : > { %v639_v32 = vpop.permute.xlu0 %638  ;;  %v886_v61 = vsel %vm878_vm8, %v841_v21, %v593_v31 }
  0xd5   : > { %783 = vrot.lane.b32.xlu1 %v5117_v47, %s4800_s27  ;;  %v917_v56 = vsel %vm911_vm9, %v884_v54, %v639_v32  ;;  %v1727_v54 = vld [vmem:[%s6184_s3] sm:$0x3] }
  0xd6   : > { %813 = vrot.lane.b32.xlu0 %v531_v13, %s4801_s29  ;;  %4532 = vmatprep.subr.msk.bf16.mxu1 %vm1162_vm7, %v1727_v54  ;;  %v1761_v21 = vsel %vm1162_vm7, %v1727_v54, 0 }
  0xd7   : > { %v641_v36 = vpop.permute.xlu1 %640  ;;  %4531 = vmatprep.subr.msk.bf16.mxu0 %vm1162_vm7, %v1727_v54  ;;  %4369 = vmatpush3.bf16.msra.mxu1 %v1761_v21 }
  0xd8   : > { %v671_v37 = vpop.permute.xlu0 %670  ;;  %v919_v1 = vsel %vm911_vm9, %v886_v61, %v641_v36  ;;  %4287 = vmatpush3.bf16.msra.mxu0 %v1761_v21  ;;  %3776 = vmatprep.subr.bf16.mxu1 %v4614_v19  ;;  %v4625_v21 = vld [vmem:[#allocation2 + $0x28] sm:$0xff]  }
  0xd9   : > { %815 = vrot.lane.b32.xlu1 %v532_v33, %s4801_s29  ;;  %v950_v58 = vsel %vm944_vm10, %v917_v56, %v671_v37 }
  0xda   : > { %559 = vrot.lane.b32.xlu0 %v5101_v34, %s4794_s23  ;;  %4305 = vmatmul.mubr.msk.bf16.vlgmr.msra.gmra.mrb[0].mxu1 %vm829_vm6, %v5101_v34 }
  0xdb   : > { %v673_v40 = vpop.permute.xlu1 %672  ;;  %4308 = vmatprep.mubr.msk.bf16.mxu1 %vm829_vm6, %v5117_v47 }
  0xdc   : > { %v704_v41 = vpop.permute.xlu0 %703  ;;  %v952_v3 = vsel %vm944_vm10, %v919_v1, %v673_v40 }
  0xdd   : > { %561 = vrot.lane.b32.xlu1 %v5117_v47, %s4794_s23  ;;  %v983_v62 = vsel %vm977_vm11, %v950_v58, %v704_v41 }
  0xde   : > { %606 = vrot.lane.b32.xlu0 %v531_v13, %s4795_s28 }
  0xdf   : > { %v706_v45 = vpop.permute.xlu1 %705 }
  0xe0   : > { %v736_v48 = vpop.permute.xlu0 %735  ;;  %v985_v7 = vsel %vm977_vm11, %v952_v3, %v706_v45  ;;  %v5251_v45 = vld [vmem:[%s4921_s6 + $0x70] sm:$0xff]  }
  0xe1   : > { %608 = vrot.lane.b32.xlu1 %v532_v33, %s4795_s28  ;;  %v1016_v30 = vsel %vm1010_vm12, %v983_v62, %v736_v48  ;;  %v423_v56 = vshrl.u32 %v5251_v45, 16  ;;  %v426_v3 = vshll.u32 %v5251_v45, 16 }
  0xe2   : > { %654 = vrot.lane.b32.xlu0 %v5160_v22, %s4797_s8  ;;  %4309 = vmatmul.mubr.msk.bf16.gmra.mrb[4].mxu1 %vm829_vm6, %v5167_v29 }
  0xe3   : > { %v738_v55 = vpop.permute.xlu1 %737  ;;  %4312 = vmatprep.mubr.msk.bf16.mxu1 %vm829_vm6, %v5183_v44 }
  0xe4   : > { %v770_v57 = vpop.permute.xlu0 %769  ;;  %v1018_v10 = vsel %vm1010_vm12, %v985_v7, %v738_v55  ;;  %v5263_v55 = vsel %vm4941_vm5, 0, %v421_v43 }
  0xe5   : > { %656 = vrot.lane.b32.xlu1 %v5192_v51, %s4797_s8  ;;  %v1049_v5 = vsel %vm1043_vm13, %v1016_v30, %v770_v57 }
  0xe6   : > { %686 = vrot.lane.b32.xlu0 %v5117_v47, %s4796_s7 }
  0xe7   : > { %v772_v2 = vpop.permute.xlu1 %771 }
  0xe8   : > { %v802_v6 = vpop.permute.xlu0 %801  ;;  %v1051_v13 = vsel %vm1043_vm13, %v1018_v10, %v772_v2  ;;  %v425_v2 = vrot.slane %v423_v56, 7 }
  0xe9   : > { %v1082_v8 = vsel %vm1076_vm14, %v1049_v5, %v802_v6  ;;  %688 = vrot.lane.b32.xlu1 %v5167_v29, %s4796_s7 }
  0xea   : > { %719 = vrot.lane.b32.xlu0 %v532_v33, %s4798_s11  ;;  %4258 = vmatprep.mubr.msk.bf16.mxu0 %vm1129_vm15, %v1082_v8  ;;  %v534_v33 = vsel %vm4936_vm4, %v496_v26, 0 }
  0xeb   : > { %v804_v14 = vpop.permute.xlu1 %803  ;;  %4313 = vmatmul.mubr.msk.bf16.gmra.mrb[8].mxu1 %vm829_vm6, %v5235_v27 }
  0xec   : > { %v1084_v16 = vsel %vm1076_vm14, %v1051_v13, %v804_v14  ;;  %v548_v17 = vpop.permute.xlu0 %547  ;;  %v4616_v14 = vld [vmem:[#allocation2 + $0x48] sm:$0xff]   ;;  %4316 = vmatprep.mubr.msk.bf16.mxu1 %vm829_vm6, %v5251_v45 }
  0xed   : > { %721 = vrot.lane.b32.xlu1 %v533_v25, %s4798_s11  ;;  %4259 = vmatmul.mubr.msk.bf16.gmra.mrb[4].mxu0 %vm1129_vm15, %v1084_v16  ;;  %v844_v48 = vsel %vm829_vm6, %v5008_v42, %v548_v17  ;;  %v535_v16 = vsel %vm4936_vm4, %v498_v63, 0  ;;  %v428_v17 = vor.u32 %v426_v3, %v425_v2  ;;  %v4627_v63 = vld [vmem:[#allocation2 + $0x30] sm:$0xff]  }
  0xee   : > { %751 = vrot.lane.b32.xlu0 %v5192_v51, %s4799_s14 }
  0xef   : > { %v550_v23 = vpop.permute.xlu1 %549 }
  0xf0   : > { %v595_v24 = vpop.permute.xlu0 %594  ;;  %v847_v61 = vsel %vm829_vm6, %v5023_v49, %v550_v23  ;;  %v4615_v49 = vld [vmem:[#allocation2] sm:$0xff]  }
  0xf1   : > { %753 = vrot.lane.b32.xlu1 %v5228_v18, %s4799_s14  ;;  %v888_v42 = vsel %vm878_vm8, %v844_v48, %v595_v24  ;;  %3777 = vmatpush3.bf16.msra.mxu1 %v4615_v49  ;;  %v4629_v49 = vld [vmem:[#allocation2 + $0x38] sm:$0xff]  }
  0xf2   : > { %785 = vrot.lane.b32.xlu0 %v5167_v29, %s4800_s27  ;;  %3778 = vmatprep.subr.bf16.mxu1 %v4616_v14 }
  0xf3   : > { %v597_v31 = vpop.permute.xlu1 %596 }
  0xf4   : > { %v643_v32 = vpop.permute.xlu0 %642  ;;  %v890_v1 = vsel %vm878_vm8, %v847_v61, %v597_v31  ;;  %v4618_v31 = vld [vmem:[#allocation2 + $0x50] sm:$0xff]  }
  0xf5   : > { %787 = vrot.lane.b32.xlu1 %v5183_v44, %s4800_s27  ;;  %v921_v58 = vsel %vm911_vm9, %v888_v42, %v643_v32  ;;  %3779 = vmatpush3.bf16.msra.mxu1 %v4617_v20  ;;  %v5308_v32 = vsel %vm4941_vm5, 0, %v428_v17  ;;  %v4626_v61 = vld [vmem:[#allocation2 + $0x70] sm:$0xff]  }
  0xf6   : > { %817 = vrot.lane.b32.xlu0 %v533_v25, %s4801_s29  ;;  %3780 = vmatprep.subr.bf16.mxu1 %v4618_v31 }
  0xf7   : > { %v645_v36 = vpop.permute.xlu1 %644 }
  0xf8   : > { %v675_v37 = vpop.permute.xlu0 %674  ;;  %v923_v5 = vsel %vm911_vm9, %v890_v1, %v645_v36 }
  0xf9   : > { %819 = vrot.lane.b32.xlu1 %v534_v33, %s4801_s29  ;;  %v954_v62 = vsel %vm944_vm10, %v921_v58, %v675_v37  ;;  %3781 = vmatpush3.bf16.msra.mxu1 %v4619_v35 }
  0xfa   : > { %563 = vrot.lane.b32.xlu0 %v5167_v29, %s4794_s23  ;;  %3782 = vmatprep.subr.bf16.mxu1 %v4620_v38  ;;  %v3466_v38 = vcombine.low %v6189_v0, %v6189_v0 }
  0xfb   : > { %v677_v40 = vpop.permute.xlu1 %676 }
  0xfc   : > { %v708_v41 = vpop.permute.xlu0 %707  ;;  %v956_v8 = vsel %vm944_vm10, %v923_v5, %v677_v40  ;;  %v5323_v40 = vld [vmem:[%s4921_s6 + $0x78] sm:$0xff]  }
  0xfd   : > { %565 = vrot.lane.b32.xlu1 %v5183_v44, %s4794_s23  ;;  %v987_v30 = vsel %vm977_vm11, %v954_v62, %v708_v41  ;;  %v4621_v41 = vld [vmem:[#allocation2 + $0x18] sm:$0xff]   ;;  %v430_v48 = vshrl.u32 %v5323_v40, 16  ;;  %4317 = vmatmul.mubr.msk.bf16.gmra.mrb[12].mxu1 %vm829_vm6, %v5323_v40 }
  0xfe   : > { %610 = vrot.lane.b32.xlu0 %v533_v25, %s4795_s28  ;;  %3783 = vmatpush3.bf16.msra.mxu1 %v4621_v41  ;;  %v4630_v41 = vld [vmem:[#allocation2 + $0xc0] sm:$0xff]  }
  0xff   : > { %v710_v46 = vpop.permute.xlu1 %709  ;;  %v432_v42 = vrot.slane %v430_v48, 7  ;;  %2388 = vmatprep.mubr.bf16.mxu1 %v6189_v0  ;;  %3888 = vmatprep.subr.bf16.mxu0 %v4630_v41 }
 0x100   : > { %v740_v50 = vpop.permute.xlu0 %739  ;;  %v989_v12 = vsel %vm977_vm11, %v956_v8, %v710_v46 }
 0x101   : > { %612 = vrot.lane.b32.xlu1 %v534_v33, %s4795_s28  ;;  %v1020_v6 = vsel %vm1010_vm12, %v987_v30, %v740_v50  ;;  %v4623_v50 = vld [vmem:[#allocation2 + $0x20] sm:$0xff]   ;;  %v4628_v30 = vld [vmem:[#allocation2 + $0x78] sm:$0xff]  }
 0x102   : > { %658 = vrot.lane.b32.xlu0 %v5228_v18, %s4797_s8 }
 0x103   : > { %v742_v57 = vpop.permute.xlu1 %741 }
 0x104   : > { %v774_v59 = vpop.permute.xlu0 %773  ;;  %v1022_v34 = vsel %vm1010_vm12, %v989_v12, %v742_v57  ;;  %v433_v57 = vshll.u32 %v5323_v40, 16 }
 0x105   : > { %660 = vrot.lane.b32.xlu1 %v5263_v55, %s4797_s8  ;;  %v1053_v10 = vsel %vm1043_vm13, %v1020_v6, %v774_v59 }
 0x106   : > { %690 = vrot.lane.b32.xlu0 %v5183_v44, %s4796_s7  ;;  %v4622_v44 = vld [vmem:[#allocation2 + $0x60] sm:$0xff]   ;;  %v435_v62 = vor.u32 %v433_v57, %v432_v42 }
 0x107   : > { %v776_v7 = vpop.permute.xlu1 %775  ;;  %3784 = vmatprep.subr.bf16.mxu1 %v4622_v44 }
 0x108   : > { %v806_v25 = vpop.permute.xlu0 %805  ;;  %v1055_v47 = vsel %vm1043_vm13, %v1022_v34, %v776_v7  ;;  %3785 = vmatpush3.bf16.msra.mxu1 %v4623_v50  ;;  %v470_v2 = vsel %vm4941_vm5, 0, %v435_v62 }
 0x109   : > { %v1086_v13 = vsel %vm1076_vm14, %v1053_v10, %v806_v25  ;;  %692 = vrot.lane.b32.xlu1 %v5235_v27, %s4796_s7 }
 0x10a   : > { %723 = vrot.lane.b32.xlu0 %v534_v33, %s4798_s11  ;;  %4262 = vmatprep.mubr.msk.bf16.mxu0 %vm1129_vm15, %v1086_v13  ;;  %v499_v33 = vrot.slane %v426_v3, 1  ;;  %v501_v3 = vrot.slane %v433_v57, 1 }
 0x10b   : > { %v808_v23 = vpop.permute.xlu1 %807 }
 0x10c   : > { %v1088_v24 = vsel %vm1076_vm14, %v1055_v47, %v808_v23  ;;  %v552_v26 = vpop.permute.xlu0 %551  ;;  %v500_v39 = vor.u32 %v499_v33, %v423_v56  ;;  %v4624_v56 = vld [vmem:[#allocation2 + $0x68] sm:$0xff]   ;;  %v502_v13 = vor.u32 %v501_v3, %v430_v48 }
 0x10d   : > { %725 = vrot.lane.b32.xlu1 %v535_v16, %s4798_s11  ;;  %4263 = vmatmul.mubr.msk.bf16.gmra.mrb[8].mxu0 %vm1129_vm15, %v1088_v24 }
 0x10e   : > { %755 = vrot.lane.b32.xlu0 %v5263_v55, %s4799_s14  ;;  %v536_v46 = vsel %vm4936_vm4, %v500_v39, 0  ;;  %3786 = vmatprep.subr.bf16.mxu1 %v4624_v56  ;;  %v537_v24 = vsel %vm4936_vm4, %v502_v13, 0 }
 0x10f   : > { %v5310_v36 = vpop.permute.xlu1 %553  ;;  %3787 = vmatpush3.bf16.msra.mxu1 %v4625_v21 }
 0x110   : > { %v599_v37 = vpop.permute.xlu0 %598  ;;  %3788 = vmatprep.subr.bf16.mxu1 %v4626_v61  ;;  %v853_v8 = vsel %vm829_vm6, %v5060_v4, %v5310_v36 }
 0x111   : > { %757 = vrot.lane.b32.xlu1 %v5308_v32, %s4799_s14 }
 0x112   : > { %789 = vrot.lane.b32.xlu0 %v5235_v27, %s4800_s27 }
 0x113   : > { %v601_v29 = vpop.permute.xlu1 %600  ;;  %3789 = vmatpush3.bf16.msra.mxu1 %v4627_v63 }
 0x114   : > { %v647_v43 = vpop.permute.xlu0 %646  ;;  %3790 = vmatprep.subr.bf16.mxu1 %v4628_v30  ;;  %v894_v25 = vsel %vm878_vm8, %v853_v8, %v601_v29 }
 0x115   : > { %791 = vrot.lane.b32.xlu1 %v5251_v45, %s4800_s27 }
 0x116   : > { %821 = vrot.lane.b32.xlu0 %v535_v16, %s4801_s29 }
 0x117   : > { %v649_v52 = vpop.permute.xlu1 %648  ;;  %3791 = vmatpush3.bf16.msra.mxu1 %v4629_v49 }
 0x118   : > { %v679_v54 = vpop.permute.xlu0 %678  ;;  %v927_v14 = vsel %vm911_vm9, %v894_v25, %v649_v52 }
 0x119   : > { %823 = vrot.lane.b32.xlu1 %v536_v46, %s4801_s29 }
 0x11a   : > { %567 = vrot.lane.b32.xlu0 %v5235_v27, %s4794_s23  ;;  %v850_v27 = vsel %vm829_vm6, %v5043_v60, %v552_v26  ;;  %2389 = vmatmul.mubr.bf16.vlgmr.msra.gmra.mrb[16].mxu1 %v6189_v0 }
 0x11b   : > { %v681_v58 = vpop.permute.xlu1 %680  ;;  %v892_v5 = vsel %vm878_vm8, %v850_v27, %v599_v37 }
 0x11c   : > { %v712_v59 = vpop.permute.xlu0 %711  ;;  %v925_v60 = vsel %vm911_vm9, %v892_v5, %v647_v43  ;;  %v960_v4 = vsel %vm944_vm10, %v927_v14, %v681_v58 }
 0x11d   : > { %569 = vrot.lane.b32.xlu1 %v5251_v45, %s4794_s23  ;;  %v958_v10 = vsel %vm944_vm10, %v925_v60, %v679_v54 }
 0x11e   : > { %614 = vrot.lane.b32.xlu0 %v535_v16, %s4795_s28  ;;  %v991_v12 = vsel %vm977_vm11, %v958_v10, %v712_v59 }
 0x11f   : > { %v714_v19 = vpop.permute.xlu1 %713 }
 0x120   : > { %v744_v1 = vpop.permute.xlu0 %743  ;;  %v993_v47 = vsel %vm977_vm11, %v960_v4, %v714_v19 }
 0x121   : > { %616 = vrot.lane.b32.xlu1 %v536_v46, %s4795_s28  ;;  %v1024_v34 = vsel %vm1010_vm12, %v991_v12, %v744_v1  ;;  %s203_s28 = sand.u32 1, %s4780_s16  }
 0x122   : > { %662 = vrot.lane.b32.xlu0 %v5308_v32, %s4797_s8 }
 0x123   : > { %v746_v6 = vpop.permute.xlu1 %745 }
 0x124   : > { %v778_v7 = vpop.permute.xlu0 %777 }
 0x125   : > { %664 = vrot.lane.b32.xlu1 %v470_v2, %s4797_s8  ;;  %v1057_v17 = vsel %vm1043_vm13, %v1024_v34, %v778_v7  ;;  %s3644_s8 = sshll.u32 %s4850_s19, 11  ;;  %s6139_s19 = scalar_lea.sflag [#allocation4], %s203_s28 }
 0x126   : > { %694 = vrot.lane.b32.xlu0 %v5251_v45, %s4796_s7  ;;  %v1026_v45 = vsel %vm1010_vm12, %v993_v47, %v746_v6  ;;  %s6131_s12 = scalar_lea.hbm %s6185_s4, %s3644_s8 }
 0x127   : > { %v780_v16 = vpop.permute.xlu1 %779 }
 0x128   : > { %v810_v20 = vpop.permute.xlu0 %809  ;;  %v1059_v26 = vsel %vm1043_vm13, %v1026_v45, %v780_v16 }
 0x129   : > { %v1090_v23 = vsel %vm1076_vm14, %v1057_v17, %v810_v20  ;;  %696 = vrot.lane.b32.xlu1 %v5323_v40, %s4796_s7 }
 0x12a   : > { %727 = vrot.lane.b32.xlu0 %v536_v46, %s4798_s11  ;;  %4266 = vmatprep.mubr.msk.bf16.mxu0 %vm1129_vm15, %v1090_v23 }
 0x12b   : > { %v812_v31 = vpop.permute.xlu1 %811 }
 0x12c   : > { %v1092_v33 = vsel %vm1076_vm14, %v1059_v26, %v812_v31  ;;  %v556_v35 = vpop.permute.xlu0 %555 }
 0x12d   : > { %729 = vrot.lane.b32.xlu1 %v537_v24, %s4798_s11  ;;  %4267 = vmatmul.mubr.msk.bf16.gmra.mrb[12].mxu0 %vm1129_vm15, %v1092_v33  ;;  %v856_v52 = vsel %vm829_vm6, %v5079_v15, %v556_v35 }
 0x12e   : > { %759 = vrot.lane.b32.xlu0 %v470_v2, %s4799_s14 }
 0x12f   : > { %v558_v36 = vpop.permute.xlu1 %557 }
 0x130   : > { %v603_v37 = vpop.permute.xlu0 %602  ;;  %v859_v21 = vsel %vm829_vm6, %v5095_v28, %v558_v36 }
 0x131   : > { %761 = vrot.lane.b32.xlu1 %v6189_v0, %s4799_s14  ;;  %v896_v54 = vsel %vm878_vm8, %v856_v52, %v603_v37  ;;  %s4802_s14 = smov [#allocation5]  }
 0x132   : > { %793 = vrot.lane.b32.xlu0 %v5323_v40, %s4800_s27  ;;  %s4726_s20 = sshll.u32 %s4802_s14, 4  ;;  %s4727_s20 = int_to_ptr.vmem [resolvable:$false] %s4726_s20 }
 0x133   : > { %v605_v39 = vpop.permute.xlu1 %604  ;;  %s4728_s22 = scalar_lea.vmem %s4727_s20, 4096 }
 0x134   : > { %v651_v29 = vpop.permute.xlu0 %650  ;;  %v898_v59 = vsel %vm878_vm8, %v859_v21, %v605_v39 }
 0x135   : > { %795 = vrot.lane.b32.xlu1 %v3466_v38, %s4800_s27  ;;  %v929_v42 = vsel %vm911_vm9, %v896_v54, %v651_v29 }
 0x136   : > { %825 = vrot.lane.b32.xlu0 %v537_v24, %s4801_s29 }
 0x137   : > { %v653_v43 = vpop.permute.xlu1 %652 }
 0x138   : > { %v683_v44 = vpop.permute.xlu0 %682  ;;  %v931_v62 = vsel %vm911_vm9, %v898_v59, %v653_v43 }
 0x139   : > { %827 = vrot.lane.b32.xlu1 %v6189_v0, %s4801_s29  ;;  %v962_v58 = vsel %vm944_vm10, %v929_v42, %v683_v44 }
 0x13b   : > { %v685_v46 = vpop.permute.xlu1 %684 }
 0x13c   : > { %v716_v48 = vpop.permute.xlu0 %715  ;;  %v964_v19 = vsel %vm944_vm10, %v931_v62, %v685_v46 }
 0x13d   : > { %v995_v61 = vsel %vm977_vm11, %v962_v58, %v716_v48 }
 0x13f   : > { %v718_v50 = vpop.permute.xlu1 %717 }
 0x140   : > { %v748_v40 = vpop.permute.xlu0 %747  ;;  %v997_v30 = vsel %vm977_vm11, %v964_v19, %v718_v50 }
 0x141   : > { %v1028_v15 = vsel %vm1010_vm12, %v995_v61, %v748_v40 }
 0x143   : > { %v750_v56 = vpop.permute.xlu1 %749 }
 0x144   : > { %v782_v57 = vpop.permute.xlu0 %781  ;;  %v1030_v2 = vsel %vm1010_vm12, %v997_v30, %v750_v56 }
 0x145   : > { %v1061_v27 = vsel %vm1043_vm13, %v1028_v15, %v782_v57 }
 0x147   : > { %v784_v63 = vpop.permute.xlu1 %783 }
 0x148   : > { %v814_v1 = vpop.permute.xlu0 %813  ;;  %v1063_v3 = vsel %vm1043_vm13, %v1030_v2, %v784_v63 }
 0x149   : > { %v1094_v28 = vsel %vm1076_vm14, %v1061_v27, %v814_v1 }
 0x14a   : > { %4270 = vmatprep.mubr.msk.bf16.mxu0 %vm1129_vm15, %v1094_v28 }
 0x14b   : > { %v816_v49 = vpop.permute.xlu1 %815 }
 0x14c   : > { %v1096_v5 = vsel %vm1076_vm14, %v1063_v3, %v816_v49  ;;  %v560_v6 = vpop.permute.xlu0 %559 }
 0x14d   : > { %4271 = vmatmul.mubr.msk.bf16.gmra.mrb[16].mxu0 %vm1129_vm15, %v1096_v5  ;;  %v862_v16 = vsel %vm829_vm6, %v5126_v53, %v560_v6 }
 0x14f   : > { %v562_v60 = vpop.permute.xlu1 %561 }
 0x150   : > { %v607_v7 = vpop.permute.xlu0 %606  ;;  %v865_v45 = vsel %vm829_vm6, %v5160_v22, %v562_v60 }
 0x151   : > { %v900_v17 = vsel %vm878_vm8, %v862_v16, %v607_v7 }
 0x153   : > { %v609_v8 = vpop.permute.xlu1 %608 }
 0x154   : > { %v655_v10 = vpop.permute.xlu0 %654  ;;  %v902_v26 = vsel %vm878_vm8, %v865_v45, %v609_v8 }
 0x155   : > { %v933_v47 = vsel %vm911_vm9, %v900_v17, %v655_v10  ;;  %v4647_v17 = vld [vmem:[#allocation2 + $0x100] sm:$0xff]  }
 0x157   : > { %v657_v25 = vpop.permute.xlu1 %656 }
 0x158   : > { %v687_v12 = vpop.permute.xlu0 %686  ;;  %v935_v33 = vsel %vm911_vm9, %v902_v26, %v657_v25 }
 0x159   : > { %v966_v24 = vsel %vm944_vm10, %v933_v47, %v687_v12 }
 0x15b   : > { %v689_v13 = vpop.permute.xlu1 %688 }
 0x15c   : > { %v720_v14 = vpop.permute.xlu0 %719  ;;  %v968_v36 = vsel %vm944_vm10, %v935_v33, %v689_v13 }
 0x15d   : > { %v999_v31 = vsel %vm977_vm11, %v966_v24, %v720_v14  ;;  %v4646_v14 = vld [vmem:[#allocation2 + $0x140] sm:$0xff]  }
 0x15e   : > { %4000 = vmatprep.subr.bf16.mxu1 %v4646_v14  ;;  %v4651_v14 = vld [vmem:[#allocation2 + $0x110] sm:$0xff]  }
 0x15f   : > { %v722_v34 = vpop.permute.xlu1 %721  ;;  %4001 = vmatpush3.bf16.msra.mxu1 %v4647_v17  ;;  %v4637_v17 = vld [vmem:[#allocation2 + $0x98] sm:$0xff]  }
 0x160   : > { %v752_v4 = vpop.permute.xlu0 %751  ;;  %v1001_v39 = vsel %vm977_vm11, %v968_v36, %v722_v34 }
 0x161   : > { %v1032_v53 = vsel %vm1010_vm12, %v999_v31, %v752_v4 }
 0x163   : > { %v754_v20 = vpop.permute.xlu1 %753 }
 0x164   : > { %v786_v23 = vpop.permute.xlu0 %785  ;;  %v1034_v41 = vsel %vm1010_vm12, %v1001_v39, %v754_v20 }
 0x165   : > { %v1065_v37 = vsel %vm1043_vm13, %v1032_v53, %v786_v23 }
 0x167   : > { %v788_v35 = vpop.permute.xlu1 %787 }
 0x168   : > { %v818_v38 = vpop.permute.xlu0 %817  ;;  %v1067_v29 = vsel %vm1043_vm13, %v1034_v41, %v788_v35 }
 0x169   : > { %v1098_v22 = vsel %vm1076_vm14, %v1065_v37, %v818_v38 }
 0x16a   : > { %4274 = vmatprep.mubr.msk.bf16.mxu0 %vm1129_vm15, %v1098_v22 }
 0x16b   : > { %v820_v43 = vpop.permute.xlu1 %819 }
 0x16c   : > { %v1100_v44 = vsel %vm1076_vm14, %v1067_v29, %v820_v43  ;;  %v564_v46 = vpop.permute.xlu0 %563 }
 0x16d   : > { %4275 = vmatmul.mubr.msk.bf16.gmra.mrb[20].mxu0 %vm1129_vm15, %v1100_v44  ;;  %v868_v58 = vsel %vm829_vm6, %v5192_v51, %v564_v46 }
 0x16f   : > { %v566_v48 = vpop.permute.xlu1 %565 }
 0x170   : > { %v611_v50 = vpop.permute.xlu0 %610  ;;  %v871_v19 = vsel %vm829_vm6, %v5228_v18, %v566_v48 }
 0x171   : > { %v904_v61 = vsel %vm878_vm8, %v868_v58, %v611_v50 }
 0x173   : > { %v613_v52 = vpop.permute.xlu1 %612 }
 0x174   : > { %v659_v40 = vpop.permute.xlu0 %658  ;;  %v906_v1 = vsel %vm878_vm8, %v871_v19, %v613_v52 }
 0x175   : > { %v937_v15 = vsel %vm911_vm9, %v904_v61, %v659_v40  ;;  %v4648_v40 = vld [vmem:[#allocation2 + $0x148] sm:$0xff]  }
 0x176   : > { %4002 = vmatprep.subr.bf16.mxu1 %v4648_v40 }
 0x177   : > { %v661_v54 = vpop.permute.xlu1 %660 }
 0x178   : > { %v691_v56 = vpop.permute.xlu0 %690  ;;  %v939_v28 = vsel %vm911_vm9, %v906_v1, %v661_v54  ;;  %v4649_v54 = vld [vmem:[#allocation2 + $0x108] sm:$0xff]  }
 0x179   : > { %v970_v27 = vsel %vm944_vm10, %v937_v15, %v691_v56  ;;  %4003 = vmatpush3.bf16.msra.mxu1 %v4649_v54 }
 0x17b   : > { %v693_v42 = vpop.permute.xlu1 %692 }
 0x17c   : > { %v724_v57 = vpop.permute.xlu0 %723  ;;  %v972_v3 = vsel %vm944_vm10, %v939_v28, %v693_v42 }
 0x17d   : > { %v1003_v30 = vsel %vm977_vm11, %v970_v27, %v724_v57 }
 0x17f   : > { %v726_v21 = vpop.permute.xlu1 %725 }
 0x180   : > { %v756_v59 = vpop.permute.xlu0 %755  ;;  %v1005_v6 = vsel %vm977_vm11, %v972_v3, %v726_v21  ;;  %v4686_v3 = vld [vmem:[%s4921_s6] sm:$0xff]  }
 0x181   : > { %v1036_v51 = vsel %vm1010_vm12, %v1003_v30, %v756_v59 }
 0x183   : > { %v758_v62 = vpop.permute.xlu1 %757 }
 0x184   : > { %v790_v63 = vpop.permute.xlu0 %789  ;;  %v1038_v60 = vsel %vm1010_vm12, %v1005_v6, %v758_v62  ;;  %v4650_v6 = vld [vmem:[#allocation2 + $0x150] sm:$0xff]  }
 0x185   : > { %v1069_v49 = vsel %vm1043_vm13, %v1036_v51, %v790_v63  ;;  %4004 = vmatprep.subr.bf16.mxu1 %v4650_v6 }
 0x186   : > { %4005 = vmatpush3.bf16.msra.mxu1 %v4651_v14 }
 0x187   : > { %v792_v2 = vpop.permute.xlu1 %791 }
 0x188   : > { %v822_v5 = vpop.permute.xlu0 %821  ;;  %v1071_v7 = vsel %vm1043_vm13, %v1038_v60, %v792_v2 }
 0x189   : > { %v1102_v18 = vsel %vm1076_vm14, %v1069_v49, %v822_v5 }
 0x18a   : > { %4278 = vmatprep.mubr.msk.bf16.mxu0 %vm1129_vm15, %v1102_v18  ;;  %v4631_v18 = vld [vmem:[#allocation2 + $0x80] sm:$0xff]  }
 0x18b   : > { %v824_v8 = vpop.permute.xlu1 %823 }
 0x18c   : > { %v1104_v10 = vsel %vm1076_vm14, %v1071_v7, %v824_v8  ;;  %v568_v25 = vpop.permute.xlu0 %567  ;;  %v4632_v7 = vld [vmem:[#allocation2 + $0xc8] sm:$0xff]  }
 0x18d   : > { %4279 = vmatmul.mubr.msk.bf16.gmra.mrb[24].mxu0 %vm1129_vm15, %v1104_v10  ;;  %v874_v24 = vsel %vm829_vm6, %v5263_v55, %v568_v25  ;;  %v4687_v8 = vld [vmem:[%s4921_s6 + $0x8] sm:$0xff]  }
 0x18e   : > { %v4633_v25 = vld [vmem:[#allocation2 + $0x88] sm:$0xff]  }
 0x18f   : > { %v570_v12 = vpop.permute.xlu1 %569 }
 0x190   : > { %v615_v13 = vpop.permute.xlu0 %614  ;;  %v877_v44 = vsel %vm829_vm6, %v5308_v32, %v570_v12  ;;  %v4688_v12 = vld [vmem:[%s4921_s6 + $0x10] sm:$0xff]  }
 0x191   : > { %v908_v35 = vsel %vm878_vm8, %v874_v24, %v615_v13  ;;  %v4634_v13 = vld [vmem:[#allocation2 + $0xd0] sm:$0xff]  }
 0x193   : > { %v617_v34 = vpop.permute.xlu1 %616 }
 0x194   : > { %v663_v16 = vpop.permute.xlu0 %662  ;;  %v910_v48 = vsel %vm878_vm8, %v877_v44, %v617_v34  ;;  %v4635_v34 = vld [vmem:[#allocation2 + $0x90] sm:$0xff]   ;;  %v4653_v44 = vld [vmem:[#allocation2 + $0x118] sm:$0xff]  }
 0x195   : > { %v941_v22 = vsel %vm911_vm9, %v908_v35, %v663_v16  ;;  %v4636_v16 = vld [vmem:[#allocation2 + $0xd8] sm:$0xff]   ;;  %v4640_v35 = vld [vmem:[#allocation2 + $0xe8] sm:$0xff]  }
 0x197   : > { %v665_v4 = vpop.permute.xlu1 %664 }
 0x198   : > { %v695_v20 = vpop.permute.xlu0 %694  ;;  %v943_v56 = vsel %vm911_vm9, %v910_v48, %v665_v4  ;;  %v4689_v4 = vld [vmem:[%s4921_s6 + $0x18] sm:$0xff]  }
 0x199   : > { %v974_v55 = vsel %vm944_vm10, %v941_v22, %v695_v20  ;;  %v4690_v20 = vld [vmem:[%s4921_s6 + $0x20] sm:$0xff]  }
 0x19b   : > { %v697_v47 = vpop.permute.xlu1 %696 }
 0x19c   : > { %v728_v23 = vpop.permute.xlu0 %727  ;;  %v976_v21 = vsel %vm944_vm10, %v943_v56, %v697_v47  ;;  %v4638_v47 = vld [vmem:[#allocation2 + $0xe0] sm:$0xff]  }
 0x19d   : > { %v1007_v50 = vsel %vm977_vm11, %v974_v55, %v728_v23  ;;  %v4642_v55 = vld [vmem:[#allocation2 + $0xf0] sm:$0xff]  }
 0x19f   : > { %v730_v45 = vpop.permute.xlu1 %729 }
 0x1a0   : > { %v760_v26 = vpop.permute.xlu0 %759  ;;  %v4256_v31 = vpop.f32.mrb[0].mxu0  ;;  %v1009_v61 = vsel %vm977_vm11, %v976_v21, %v730_v45  ;;  %v4693_v21 = vld [vmem:[%s4921_s6 + $0x38] sm:$0xff]  }
 0x1a1   : > { %v1200_v33 = vpop.f32.mrb[1].mxu0  ;;  %v1329_v36 = vmax.f32 %v4256_v31, 0.0  ;;  %v1040_v42 = vsel %vm1010_vm12, %v1007_v50, %v760_v26  ;;  %v4639_v26 = vld [vmem:[#allocation2 + $0xa0] sm:$0xff]   ;;  %v4643_v50 = vld [vmem:[#allocation2 + $0xb0] sm:$0xff]  }
 0x1a2   : > { %v4257_v53 = vpop.f32.mrb[2].mxu0  ;;  %v1327_v41 = vmax.f32 %v1200_v33, 0.0 }
 0x1a3   : > { %v1330_v37 = vmax.f32 %v4257_v53, 0.0  ;;  %v762_v38 = vpop.permute.xlu1 %761  ;;  %v1203_v39 = vpop.f32.mrb[3].mxu0 }
 0x1a4   : > { %v1328_v29 = vmax.f32 %v1203_v39, 0.0  ;;  %v794_v43 = vpop.permute.xlu0 %793  ;;  %v1042_v15 = vsel %vm1010_vm12, %v1009_v61, %v762_v38  ;;  %v4691_v39 = vld [vmem:[%s4921_s6 + $0x28] sm:$0xff]  }
 0x1a5   : > { %v5459_v46 = vpack.c.bf16 %v1330_v37, %v1329_v36  ;;  %v1073_v32 = vsel %vm1043_vm13, %v1040_v42, %v794_v43  ;;  %v4652_v43 = vld [vmem:[#allocation2 + $0x158] sm:$0xff]  }
 0x1a6   : > { %v5463_v52 = vpack.c.bf16 %v1328_v29, %v1327_v41  ;;  %v4641_v41 = vld [vmem:[#allocation2 + $0xa8] sm:$0xff]   ;;  %v4692_v29 = vld [vmem:[%s4921_s6 + $0x30] sm:$0xff]   ;;  %4006 = vmatprep.subr.bf16.mxu1 %v4652_v43  ;;  %v4644_v42 = vld [vmem:[#allocation2 + $0xf8] sm:$0xff]   ;;  %s3447_s6 = sshll.u32 %s203_s28, 7 }
 0x1a7   : > { %v796_v57 = vpop.permute.xlu1 %795  ;;  %v1383_v27 = vshrl.u32 %v5459_v46, 16  ;;  %v1386_v5 = vshll.u32 %v5459_v46, 16  ;;  %4007 = vmatpush3.bf16.msra.mxu1 %v4653_v44  ;;  %v4663_v43 = vld [vmem:[#allocation2 + $0x190] sm:$0xff]   ;;  %s6082_s7 = scalar_lea.vmem [#allocation5], %s3447_s6 }
 0x1a8   : > { %v826_v58 = vpop.permute.xlu0 %825  ;;  %2396 = vmatprep.mubr.bf16.mxu1 %v5463_v52  ;;  %v1376_v59 = vshrl.u32 %v5463_v52, 16  ;;  %v1379_v19 = vshll.u32 %v5463_v52, 16  ;;  %v1075_v1 = vsel %vm1043_vm13, %v1042_v15, %v796_v57  ;;  %v4654_v15 = vld [vmem:[#allocation2 + $0x1c0] sm:$0xff]   ;;  %v4664_v44 = vld [vmem:[#allocation2 + $0x170] sm:$0xff]   ;;  %s3367_s9 = sshll.u32 %s6082_s7, 4  ;;  %s6133_s9 = int_to_ptr.vmem [resolvable:$true] %s3367_s9 }
 0x1a9   : > { %v1106_v62 = vsel %vm1076_vm14, %v1073_v32, %v826_v58  ;;  %v1385_v49 = vrot.slane %v1383_v27, 7  ;;  %v4645_v58 = vld [vmem:[#allocation2 + $0xb8] sm:$0xff]   ;;  %s4722_s13 = scalar_lea.vmem %s6133_s9, 2048  ;;  %p4729_p2 = scmp.lt.s32.totalorder %s6133_s9, %s4727_s20 }
 0x1aa   : > { %4282 = vmatprep.mubr.msk.bf16.mxu0 %vm1129_vm15, %v1106_v62  ;;  %v1378_v63 = vrot.slane %v1376_v59, 7  ;;  %p4723_p6 = scmp.ne.s32.totalorder %s6133_s9, %s4722_s13  ;;  %p4730_p3 = scmp.lt.s32.totalorder %s4728_s22, %s4722_s13 }
 0x1ab   : > { %v828_v30 = vpop.permute.xlu1 %827  ;;  %v1388_v60 = vor.u32 %v1386_v5, %v1385_v49 }
 0x1ac   : > { %v1108_v28 = vsel %vm1076_vm14, %v1075_v1, %v828_v30  ;;  %v1381_v51 = vor.u32 %v1379_v19, %v1378_v63  ;;  %v4656_v63 = vld [vmem:[#allocation2 + $0x160] sm:$0xff]   ;;  %p4724_p10 = pnand %p4723_p6, %p6241_p9  ;;  %p4731_p4 = por %p4730_p3, %p4729_p2 }
 0x1ad   : > { %4283 = vmatmul.mubr.msk.bf16.gmra.mrb[28].mxu0 %vm1129_vm15, %v1108_v28  ;;  %v5501_v10 = vsel %vm4941_vm5, 0, %v1388_v60  ;;  %v4655_v30 = vld [vmem:[#allocation2 + $0x180] sm:$0xff]   ;;  %4008 = vmatprep.subr.bf16.mxu1 %v4656_v63  ;;  %v1519_v28 = vrot.slane %v1379_v19, 1  ;;  %v1521_v19 = vrot.slane %v1386_v5, 1 }
 0x1ae   : > { %v5486_v2 = vsel %vm4941_vm5, 0, %v1381_v51  ;;  %4288 = vmatprep.mubr.msk.bf16.mxu0 %vm829_vm6, %v4686_v3  ;;  %p4725_p12 = pneg %p4724_p10 }
 0x1af   : > { %2397 = vmatmul.mubr.bf16.gmra.mrb[20].mxu1 %v5486_v2  ;;  %v1520_v3 = vor.u32 %v1519_v28, %v1376_v59 }
 0x1b0   : > { %2404 = vmatprep.mubr.bf16.mxu1 %v5459_v46  ;;  %p4732_p7 = pnand %p4731_p4, %p4725_p12 }
 0x1b1   : > { %v5549_v49 = vsel %vm4936_vm4, %v1520_v3, 0 }
 0x1b5   : > { %4289 = vmatmul.mubr.msk.bf16.vlgmr.msra.gmra.mrb[32].mxu0 %vm829_vm6, %v4687_v8 }
 0x1b6   : > { %3889 = vmatpush3.bf16.msra.mxu0 %v4631_v18  ;;  %4292 = vmatprep.mubr.msk.bf16.mxu0 %vm829_vm6, %v4688_v12  ;;  %v1522_v18 = vor.u32 %v1521_v19, %v1383_v27  ;;  %v4659_v27 = vld [vmem:[#allocation2 + $0x188] sm:$0xff]  }
 0x1b7   : > { %2405 = vmatmul.mubr.bf16.gmra.mrb[24].mxu1 %v5501_v10  ;;  %3890 = vmatprep.subr.bf16.mxu0 %v4632_v7 }
 0x1b8   : > { %v5559_v14 = vsel %vm4936_vm4, %v1522_v18, 0  ;;  %v4666_v18 = vld [vmem:[#allocation2 + $0x1d8] sm:$0xff]  }
 0x1ba   : > { %3891 = vmatpush3.bf16.msra.mxu0 %v4633_v25 }
 0x1bb   : > { %3892 = vmatprep.subr.bf16.mxu0 %v4634_v13 }
 0x1bd   : > { %4293 = vmatmul.mubr.msk.bf16.gmra.mrb[36].mxu0 %vm829_vm6, %v4689_v4 }
 0x1be   : > { %3893 = vmatpush3.bf16.msra.mxu0 %v4635_v34  ;;  %4296 = vmatprep.mubr.msk.bf16.mxu0 %vm829_vm6, %v4690_v20  ;;  %v4661_v20 = vld [vmem:[#allocation2 + $0x128] sm:$0xff]  }
 0x1bf   : > { %3894 = vmatprep.subr.bf16.mxu0 %v4636_v16  ;;  %v4658_v16 = vld [vmem:[#allocation2 + $0x1c8] sm:$0xff]  }
 0x1c0   : > { %v4260_v23 = vpop.f32.mrb[4].mxu0 }
 0x1c1   : > { %v1216_v45 = vpop.f32.mrb[5].mxu0  ;;  %v1333_v31 = vmax.f32 %v4260_v23, 0.0 }
 0x1c2   : > { %v4261_v24 = vpop.f32.mrb[6].mxu0  ;;  %3895 = vmatpush3.bf16.msra.mxu0 %v4637_v17  ;;  %v1331_v36 = vmax.f32 %v1216_v45, 0.0  ;;  %v4660_v17 = vld [vmem:[#allocation2 + $0x168] sm:$0xff]  }
 0x1c3   : > { %v1334_v33 = vmax.f32 %v4261_v24, 0.0  ;;  %v1219_v53 = vpop.f32.mrb[7].mxu0  ;;  %3896 = vmatprep.subr.bf16.mxu0 %v4638_v47 }
 0x1c4   : > { %v1332_v37 = vmax.f32 %v1219_v53, 0.0 }
 0x1c5   : > { %v5510_v38 = vpack.c.bf16 %v1334_v33, %v1333_v31  ;;  %4297 = vmatmul.mubr.msk.bf16.gmra.mrb[40].mxu0 %vm829_vm6, %v4691_v39 }
 0x1c6   : > { %v5514_v22 = vpack.c.bf16 %v1332_v37, %v1331_v36  ;;  %3897 = vmatpush3.bf16.msra.mxu0 %v4639_v26  ;;  %4300 = vmatprep.mubr.msk.bf16.mxu0 %vm829_vm6, %v4692_v29  ;;  %v4662_v29 = vld [vmem:[#allocation2 + $0x1d0] sm:$0xff]  }
 0x1c7   : > { %3898 = vmatprep.subr.bf16.mxu0 %v4640_v35  ;;  %v1397_v56 = vshrl.u32 %v5510_v38, 16  ;;  %v1400_v62 = vshll.u32 %v5510_v38, 16 }
 0x1c8   : > { %2412 = vmatprep.mubr.bf16.mxu1 %v5514_v22  ;;  %v1390_v48 = vshrl.u32 %v5514_v22, 16  ;;  %v1393_v54 = vshll.u32 %v5514_v22, 16 }
 0x1c9   : > { %v1399_v61 = vrot.slane %v1397_v56, 7  ;;  %v1525_v53 = vrot.slane %v1400_v62, 1 }
 0x1ca   : > { %3899 = vmatpush3.bf16.msra.mxu0 %v4641_v41  ;;  %v1392_v40 = vrot.slane %v1390_v48, 7  ;;  %v1523_v5 = vrot.slane %v1393_v54, 1 }
 0x1cb   : > { %3900 = vmatprep.subr.bf16.mxu0 %v4642_v55  ;;  %v1402_v1 = vor.u32 %v1400_v62, %v1399_v61  ;;  %v1526_v39 = vor.u32 %v1525_v53, %v1397_v56 }
 0x1cc   : > { %v1395_v57 = vor.u32 %v1393_v54, %v1392_v40  ;;  %v1524_v47 = vor.u32 %v1523_v5, %v1390_v48  ;;  %v4665_v40 = vld [vmem:[#allocation2 + $0x130] sm:$0xff]  }
 0x1cd   : > { %4301 = vmatmul.mubr.msk.bf16.gmra.mrb[44].mxu0 %vm829_vm6, %v4693_v21  ;;  %v5542_v51 = vsel %vm4941_vm5, 0, %v1402_v1  ;;  %v5592_v55 = vsel %vm4936_vm4, %v1526_v39, 0 }
 0x1ce   : > { %3901 = vmatpush3.bf16.msra.mxu0 %v4643_v50  ;;  %2549 = vmatprep.mubr.bf16.mxu0 %v5486_v2  ;;  %v5529_v32 = vsel %vm4941_vm5, 0, %v1395_v57  ;;  %v4657_v2 = vld [vmem:[#allocation2 + $0x120] sm:$0xff]   ;;  %v5575_v31 = vsel %vm4936_vm4, %v1524_v47, 0  ;;  %6219 = vst [vmem:[#allocation9_spill] sm:$0xff] %v5592_v55 }
 0x1cf   : > { %2413 = vmatmul.mubr.bf16.gmra.mrb[28].mxu1 %v5529_v32  ;;  %3902 = vmatprep.subr.bf16.mxu0 %v4644_v42  ;;  %6218 = vst [vmem:[#allocation8_spill] sm:$0xff] %v5575_v31 }
 0x1d0   : > { %2420 = vmatprep.mubr.bf16.mxu1 %v5510_v38  ;;  %4009 = vmatpush3.bf16.msra.mxu1 %v4657_v2 }
 0x1d1   : > { %4010 = vmatprep.subr.bf16.mxu1 %v4660_v17 }
 0x1d2   : > { %3903 = vmatpush3.bf16.msra.mxu0 %v4645_v58 }
 0x1d3   : > { %4112 = vmatprep.subr.bf16.mxu0 %v4654_v15 }
 0x1d4   : > { %4011 = vmatpush3.bf16.msra.mxu1 %v4661_v20 }
 0x1d5   : > { %2550 = vmatmul.mubr.bf16.vlgmr.msra.gmra.mrb[48].mxu0 %v6189_v0  ;;  %4012 = vmatprep.subr.bf16.mxu1 %v4664_v44  ;;  %v4675_v44 = vld [vmem:[#allocation2 + $0x1f0] sm:$0xff]  }
 0x1d6   : > { %2557 = vmatprep.mubr.bf16.mxu0 %v5501_v10  ;;  %4113 = vmatpush3.bf16.msra.mxu0 %v4655_v30 }
 0x1d7   : > { %2421 = vmatmul.mubr.bf16.gmra.mrb[32].mxu1 %v5542_v51  ;;  %4114 = vmatprep.subr.bf16.mxu0 %v4658_v16 }
 0x1d8   : > { %4013 = vmatpush3.bf16.msra.mxu1 %v4665_v40  ;;  %v4677_v40 = vld [vmem:[#allocation2 + $0x1f8] sm:$0xff]  }
 0x1da   : > { %4115 = vmatpush3.bf16.msra.mxu0 %v4659_v27 }
 0x1db   : > { %4116 = vmatprep.subr.bf16.mxu0 %v4662_v29  ;;  %v5640_v29 = vld [vmem:[#allocation2 + $0x200] sm:$0xff]  }
 0x1dd   : > { %2558 = vmatmul.mubr.bf16.gmra.mrb[52].mxu0 %v5549_v49 }
 0x1de   : > { %2565 = vmatprep.mubr.bf16.mxu0 %v5529_v32  ;;  %4117 = vmatpush3.bf16.msra.mxu0 %v4663_v43 }
 0x1df   : > { %4118 = vmatprep.subr.bf16.mxu0 %v4666_v18 }
 0x1e0   : > { %v4264_v6 = vpop.f32.mrb[8].mxu0 }
 0x1e1   : > { %v1232_v60 = vpop.f32.mrb[9].mxu0  ;;  %v1337_v8 = vmax.f32 %v4264_v6, 0.0 }
 0x1e2   : > { %v4265_v7 = vpop.f32.mrb[10].mxu0  ;;  %v1335_v12 = vmax.f32 %v1232_v60, 0.0 }
 0x1e3   : > { %v1338_v59 = vmax.f32 %v4265_v7, 0.0  ;;  %v1235_v25 = vpop.f32.mrb[11].mxu0  ;;  %v4667_v7 = vld [vmem:[#allocation2 + $0x198] sm:$0xff]  }
 0x1e4   : > { %v1336_v13 = vmax.f32 %v1235_v25, 0.0  ;;  %4119 = vmatpush3.bf16.msra.mxu0 %v4667_v7 }
 0x1e5   : > { %v5561_v34 = vpack.c.bf16 %v1338_v59, %v1337_v8  ;;  %2566 = vmatmul.mubr.bf16.gmra.mrb[56].mxu0 %v5559_v14  ;;  %v4668_v8 = vld [vmem:[#allocation2 + $0x178] sm:$0xff]  }
 0x1e6   : > { %v5564_v4 = vpack.c.bf16 %v1336_v13, %v1335_v12  ;;  %2573 = vmatprep.mubr.bf16.mxu0 %v5542_v51  ;;  %v4669_v59 = vld [vmem:[#allocation2 + $0x138] sm:$0xff]   ;;  %4014 = vmatprep.subr.bf16.mxu1 %v4668_v8 }
 0x1e7   : > { %v1411_v45 = vshrl.u32 %v5561_v34, 16  ;;  %v1414_v37 = vshll.u32 %v5561_v34, 16  ;;  %4015 = vmatpush3.bf16.msra.mxu1 %v4669_v59 }
 0x1e8   : > { %2428 = vmatprep.mubr.bf16.mxu1 %v5564_v4  ;;  %v1404_v23 = vshrl.u32 %v5564_v4, 16  ;;  %v1407_v26 = vshll.u32 %v5564_v4, 16  ;;  %4320 = vmatprep.subr.bf16.mxu1 %v5640_v29 }
 0x1e9   : > { %v1413_v35 = vrot.slane %v1411_v45, 7  ;;  %v1529_v25 = vrot.slane %v1414_v37, 1 }
 0x1ea   : > { %v1406_v24 = vrot.slane %v1404_v23, 7  ;;  %v1527_v48 = vrot.slane %v1407_v26, 1 }
 0x1eb   : > { %v1416_v41 = vor.u32 %v1414_v37, %v1413_v35  ;;  %v1530_v20 = vor.u32 %v1529_v25, %v1411_v45  ;;  %v4671_v35 = vld [vmem:[#allocation2 + $0x1a0] sm:$0xff]   ;;  %v4672_v37 = vld [vmem:[#allocation2 + $0x1e8] sm:$0xff]  }
 0x1ec   : > { %v1409_v33 = vor.u32 %v1407_v26, %v1406_v24  ;;  %v1528_v54 = vor.u32 %v1527_v48, %v1404_v23  ;;  %v4670_v26 = vld [vmem:[#allocation2 + $0x1e0] sm:$0xff]   ;;  %v4676_v48 = vld [vmem:[#allocation2 + $0x1b0] sm:$0xff]  }
 0x1ed   : > { %2574 = vmatmul.mubr.bf16.gmra.mrb[60].mxu0 %v5575_v31  ;;  %v5597_v50 = vsel %vm4941_vm5, 0, %v1416_v41  ;;  %v3792_v56 = vpop.f32.mrb[16].mxu1  ;;  %4120 = vmatprep.subr.bf16.mxu0 %v4670_v26  ;;  %v4673_v41 = vld [vmem:[#allocation2 + $0x1a8] sm:$0xff]  }
 0x1ee   : > { %v5582_v36 = vsel %vm4941_vm5, 0, %v1409_v33  ;;  %v3793_v42 = vpop.f32.mrb[17].mxu1  ;;  %v5603_v57 = vsel %vm4936_vm4, %v1528_v54, 0  ;;  %v5631_v33 = vsel %vm4936_vm4, %v1530_v20, 0  ;;  %4121 = vmatpush3.bf16.msra.mxu0 %v4671_v35  ;;  %v4678_v54 = vld [vmem:[#allocation2 + $0x1b8] sm:$0xff]  }
 0x1ef   : > { %2429 = vmatmul.mubr.bf16.gmra.mrb[36].mxu1 %v5582_v36  ;;  %2581 = vmatprep.mubr.bf16.mxu0 %v5582_v36  ;;  %v5605_v21 = vadd.f32 %v3793_v42, %v3792_v56  ;;  %v3795_v61 = vpop.f32.mrb[18].mxu1 }
 0x1f0   : > { %2436 = vmatprep.mubr.bf16.mxu1 %v5561_v34  ;;  %v3796_v15 = vpop.f32.mrb[19].mxu1  ;;  %4122 = vmatprep.subr.bf16.mxu0 %v4672_v37 }
 0x1f1   : > { %v5608_v1 = vadd.f32 %v3796_v15, %v3795_v61 }
 0x1f2   : > { %4123 = vmatpush3.bf16.msra.mxu0 %v4673_v41 }
 0x1f3   : > { %4124 = vmatprep.subr.bf16.mxu0 %v4675_v44 }
 0x1f5   : > { %2582 = vmatmul.mubr.bf16.gmra.mrb[64].mxu0 %v5592_v55 }
 0x1f6   : > { %2589 = vmatprep.mubr.bf16.mxu0 %v5597_v50  ;;  %4125 = vmatpush3.bf16.msra.mxu0 %v4676_v48 }
 0x1f7   : > { %2437 = vmatmul.mubr.bf16.gmra.mrb[40].mxu1 %v5597_v50  ;;  %4126 = vmatprep.subr.bf16.mxu0 %v4677_v40 }
 0x1fa   : > { %4127 = vmatpush3.bf16.msra.mxu0 %v4678_v54 }
 0x1fd   : > { %2590 = vmatmul.mubr.bf16.gmra.mrb[68].mxu0 %v5603_v57 }
 0x200   : > { %v4268_v58 = vpop.f32.mrb[12].mxu0 }
 0x201   : > { %v1248_v62 = vpop.f32.mrb[13].mxu0  ;;  %v1341_v30 = vmax.f32 %v4268_v58, 0.0 }
 0x202   : > { %v4269_v63 = vpop.f32.mrb[14].mxu0  ;;  %v1339_v3 = vmax.f32 %v1248_v62, 0.0 }
 0x203   : > { %v1342_v28 = vmax.f32 %v4269_v63, 0.0  ;;  %v1251_v2 = vpop.f32.mrb[15].mxu0 }
 0x204   : > { %v1340_v19 = vmax.f32 %v1251_v2, 0.0 }
 0x205   : > { %v5610_v6 = vpack.c.bf16 %v1342_v28, %v1341_v30 }
 0x206   : > { %v5612_v60 = vpack.c.bf16 %v1340_v19, %v1339_v3 }
 0x207   : > { %v1425_v12 = vshrl.u32 %v5610_v6, 16  ;;  %v1428_v17 = vshll.u32 %v5610_v6, 16 }
 0x208   : > { %2444 = vmatprep.mubr.bf16.mxu1 %v5612_v60  ;;  %v1418_v13 = vshrl.u32 %v5612_v60, 16  ;;  %v1421_v27 = vshll.u32 %v5612_v60, 16 }
 0x209   : > { %v1427_v5 = vrot.slane %v1425_v12, 7  ;;  %v1533_v3 = vrot.slane %v1428_v17, 1 }
 0x20a   : > { %v1420_v16 = vrot.slane %v1418_v13, 7  ;;  %v1531_v53 = vrot.slane %v1421_v27, 1 }
 0x20b   : > { %v1430_v23 = vor.u32 %v1428_v17, %v1427_v5 }
 0x20c   : > { %v1423_v47 = vor.u32 %v1421_v27, %v1420_v16  ;;  %v1532_v39 = vor.u32 %v1531_v53, %v1418_v13  ;;  %v1534_v13 = vor.u32 %v1533_v3, %v1425_v12 }
 0x20d   : > { %v5637_v45 = vsel %vm4941_vm5, 0, %v1430_v23 }
 0x20e   : > { %v5625_v24 = vsel %vm4941_vm5, 0, %v1423_v47  ;;  %v5646_v43 = vsel %vm4936_vm4, %v1532_v39, 0  ;;  %v5668_v17 = vsel %vm4936_vm4, %v1534_v13, 0 }
 0x20f   : > { %2445 = vmatmul.mubr.bf16.gmra.mrb[44].mxu1 %v5625_v24  ;;  %2597 = vmatprep.mubr.bf16.mxu0 %v5625_v24 }
 0x210   : > { %2452 = vmatprep.mubr.bf16.mxu1 %v5610_v6  ;;  %2598 = vmatmul.mubr.bf16.gmra.mrb[72].mxu0 %v5631_v33 }
 0x211   : > { %2605 = vmatprep.mubr.bf16.mxu0 %v5637_v45 }
 0x217   : > { %2453 = vmatmul.mubr.bf16.gmra.mrb[48].mxu1 %v5637_v45 }
 0x218   : > { %2606 = vmatmul.mubr.bf16.gmra.mrb[76].mxu0 %v5646_v43 }
 0x220   : > { %v4272_v56 = vpop.f32.mrb[16].mxu0 }
 0x221   : > { %v1264_v42 = vpop.f32.mrb[17].mxu0  ;;  %v1345_v61 = vmax.f32 %v4272_v56, 0.0 }
 0x222   : > { %v4273_v58 = vpop.f32.mrb[18].mxu0  ;;  %v1343_v63 = vmax.f32 %v1264_v42, 0.0 }
 0x223   : > { %v1346_v62 = vmax.f32 %v4273_v58, 0.0  ;;  %v1267_v15 = vpop.f32.mrb[19].mxu0 }
 0x224   : > { %v1344_v30 = vmax.f32 %v1267_v15, 0.0 }
 0x225   : > { %v5649_v28 = vpack.c.bf16 %v1346_v62, %v1345_v61 }
 0x226   : > { %v5651_v2 = vpack.c.bf16 %v1344_v30, %v1343_v63 }
 0x227   : > { %v1439_v19 = vshrl.u32 %v5649_v28, 16  ;;  %v1442_v25 = vshll.u32 %v5649_v28, 16 }
 0x228   : > { %2460 = vmatprep.mubr.bf16.mxu1 %v5651_v2  ;;  %v1432_v18 = vshrl.u32 %v5651_v2, 16  ;;  %v1435_v59 = vshll.u32 %v5651_v2, 16 }
 0x229   : > { %v1441_v7 = vrot.slane %v1439_v19, 7  ;;  %v1537_v56 = vrot.slane %v1442_v25, 1 }
 0x22a   : > { %v1434_v8 = vrot.slane %v1432_v18, 7  ;;  %v1535_v20 = vrot.slane %v1435_v59, 1 }
 0x22b   : > { %v1444_v16 = vor.u32 %v1442_v25, %v1441_v7  ;;  %v1538_v30 = vor.u32 %v1537_v56, %v1439_v19 }
 0x22c   : > { %v1437_v5 = vor.u32 %v1435_v59, %v1434_v8  ;;  %v1536_v47 = vor.u32 %v1535_v20, %v1432_v18 }
 0x22d   : > { %v5674_v12 = vsel %vm4941_vm5, 0, %v1444_v16  ;;  %v5700_v8 = vsel %vm4936_vm4, %v1538_v30, 0 }
 0x22e   : > { %v5662_v27 = vsel %vm4941_vm5, 0, %v1437_v5  ;;  %v5680_v23 = vsel %vm4936_vm4, %v1536_v47, 0 }
 0x22f   : > { %2461 = vmatmul.mubr.bf16.gmra.mrb[52].mxu1 %v5662_v27  ;;  %2613 = vmatprep.mubr.bf16.mxu0 %v5662_v27 }
 0x230   : > { %2468 = vmatprep.mubr.bf16.mxu1 %v5649_v28  ;;  %2614 = vmatmul.mubr.bf16.gmra.mrb[80].mxu0 %v5668_v17 }
 0x231   : > { %2621 = vmatprep.mubr.bf16.mxu0 %v5674_v12 }
 0x237   : > { %2469 = vmatmul.mubr.bf16.gmra.mrb[56].mxu1 %v5674_v12 }
 0x238   : > { %2622 = vmatmul.mubr.bf16.gmra.mrb[84].mxu0 %v5680_v23 }
 0x240   : > { %v4276_v26 = vpop.f32.mrb[20].mxu0 }
 0x241   : > { %v1280_v53 = vpop.f32.mrb[21].mxu0  ;;  %v1349_v37 = vmax.f32 %v4276_v26, 0.0 }
 0x242   : > { %v4277_v35 = vpop.f32.mrb[22].mxu0  ;;  %v1347_v44 = vmax.f32 %v1280_v53, 0.0 }
 0x243   : > { %v1350_v39 = vmax.f32 %v4277_v35, 0.0  ;;  %v1283_v41 = vpop.f32.mrb[23].mxu0 }
 0x244   : > { %v1348_v48 = vmax.f32 %v1283_v41, 0.0 }
 0x245   : > { %v5683_v40 = vpack.c.bf16 %v1350_v39, %v1349_v37 }
 0x246   : > { %v5685_v54 = vpack.c.bf16 %v1348_v48, %v1347_v44 }
 0x247   : > { %6220 = vst [vmem:[#allocation10_spill] sm:$0xff] %v5683_v40  ;;  %v1453_v42 = vshrl.u32 %v5683_v40, 16  ;;  %v1456_v63 = vshll.u32 %v5683_v40, 16 }
 0x248   : > { %2476 = vmatprep.mubr.bf16.mxu1 %v5685_v54  ;;  %v1446_v58 = vshrl.u32 %v5685_v54, 16  ;;  %v1449_v15 = vshll.u32 %v5685_v54, 16 }
 0x249   : > { %v1455_v61 = vrot.slane %v1453_v42, 7  ;;  %v1541_v44 = vrot.slane %v1456_v63, 1 }
 0x24a   : > { %v1448_v62 = vrot.slane %v1446_v58, 7  ;;  %v1539_v59 = vrot.slane %v1449_v15, 1 }
 0x24b   : > { %v1458_v18 = vor.u32 %v1456_v63, %v1455_v61  ;;  %v1542_v30 = vor.u32 %v1541_v44, %v1453_v42 }
 0x24c   : > { %v1451_v3 = vor.u32 %v1449_v15, %v1448_v62  ;;  %v1540_v25 = vor.u32 %v1539_v59, %v1446_v58 }
 0x24d   : > { %v5706_v19 = vsel %vm4941_vm5, 0, %v1458_v18  ;;  %v5732_v63 = vsel %vm4936_vm4, %v1542_v30, 0 }
 0x24e   : > { %v5694_v7 = vsel %vm4941_vm5, 0, %v1451_v3  ;;  %6222 = vst [vmem:[#allocation12_spill] sm:$0xff] %v5706_v19  ;;  %v5712_v13 = vsel %vm4936_vm4, %v1540_v25, 0 }
 0x24f   : > { %6221 = vst [vmem:[#allocation11_spill] sm:$0xff] %v5694_v7  ;;  %2477 = vmatmul.mubr.bf16.gmra.mrb[60].mxu1 %v5694_v7  ;;  %2629 = vmatprep.mubr.bf16.mxu0 %v5694_v7 }
 0x250   : > { %2484 = vmatprep.mubr.bf16.mxu1 %v5683_v40  ;;  %2630 = vmatmul.mubr.bf16.gmra.mrb[88].mxu0 %v5700_v8 }
 0x251   : > { %2637 = vmatprep.mubr.bf16.mxu0 %v5706_v19 }
 0x257   : > { %2485 = vmatmul.mubr.bf16.gmra.mrb[64].mxu1 %v5706_v19 }
 0x258   : > { %2638 = vmatmul.mubr.bf16.gmra.mrb[92].mxu0 %v5712_v13 }
 0x260   : > { %v4280_v5 = vpop.f32.mrb[24].mxu0 }
 0x261   : > { %v1296_v16 = vpop.f32.mrb[25].mxu0  ;;  %v1353_v47 = vmax.f32 %v4280_v5, 0.0 }
 0x262   : > { %v4281_v20 = vpop.f32.mrb[26].mxu0  ;;  %v1351_v35 = vmax.f32 %v1296_v16, 0.0 }
 0x263   : > { %v1354_v26 = vmax.f32 %v4281_v20, 0.0  ;;  %v1299_v53 = vpop.f32.mrb[27].mxu0 }
 0x264   : > { %v1352_v37 = vmax.f32 %v1299_v53, 0.0 }
 0x265   : > { %v5715_v39 = vpack.c.bf16 %v1354_v26, %v1353_v47 }
 0x266   : > { %v5717_v41 = vpack.c.bf16 %v1352_v37, %v1351_v35 }
 0x267   : > { %6223 = vst [vmem:[#allocation13_spill] sm:$0xff] %v5715_v39  ;;  %v1467_v48 = vshrl.u32 %v5715_v39, 16  ;;  %v1470_v15 = vshll.u32 %v5715_v39, 16 }
 0x268   : > { %6224 = vst [vmem:[#allocation14_spill] sm:$0xff] %v5717_v41  ;;  %2492 = vmatprep.mubr.bf16.mxu1 %v5717_v41  ;;  %v1460_v56 = vshrl.u32 %v5717_v41, 16  ;;  %v1463_v62 = vshll.u32 %v5717_v41, 16 }
 0x269   : > { %v1469_v58 = vrot.slane %v1467_v48, 7  ;;  %v1545_v0 = vrot.slane %v1470_v15, 1 }
 0x26a   : > { %v1462_v61 = vrot.slane %v1460_v56, 7  ;;  %v1543_v25 = vrot.slane %v1463_v62, 1 }
 0x26b   : > { %v1472_v18 = vor.u32 %v1470_v15, %v1469_v58 }
 0x26c   : > { %v1465_v3 = vor.u32 %v1463_v62, %v1462_v61  ;;  %v1544_v5 = vor.u32 %v1543_v25, %v1460_v56 }
 0x26d   : > { %v5738_v42 = vsel %vm4941_vm5, 0, %v1472_v18 }
 0x26e   : > { %v5726_v59 = vsel %vm4941_vm5, 0, %v1465_v3  ;;  %6226 = vst [vmem:[#allocation16_spill] sm:$0xff] %v5738_v42  ;;  %v5744_v16 = vsel %vm4936_vm4, %v1544_v5, 0 }
 0x26f   : > { %6225 = vst [vmem:[#allocation15_spill] sm:$0xff] %v5726_v59  ;;  %2493 = vmatmul.mubr.bf16.gmra.mrb[68].mxu1 %v5726_v59  ;;  %2645 = vmatprep.mubr.bf16.mxu0 %v5726_v59  ;;  %6227 = vst [vmem:[#allocation17_spill] sm:$0xff] %v5744_v16 }
 0x270   : > { %2500 = vmatprep.mubr.bf16.mxu1 %v5715_v39  ;;  %2646 = vmatmul.mubr.bf16.gmra.mrb[96].mxu0 %v5732_v63 }
 0x271   : > { %2653 = vmatprep.mubr.bf16.mxu0 %v5738_v42 }
 0x277   : > { %2501 = vmatmul.mubr.bf16.gmra.mrb[72].mxu1 %v5738_v42 }
 0x278   : > { %2654 = vmatmul.mubr.bf16.gmra.mrb[100].mxu0 %v5744_v16 }
 0x280   : > { %v4284_v20 = vpop.f32.mrb[28].mxu0 }
 0x281   : > { %v1312_v47 = vpop.f32.mrb[29].mxu0  ;;  %v1357_v35 = vmax.f32 %v4284_v20, 0.0 }
 0x282   : > { %v4285_v26 = vpop.f32.mrb[30].mxu0  ;;  %v3798_v53 = vpop.f32.mrb[20].mxu1  ;;  %v1355_v61 = vmax.f32 %v1312_v47, 0.0 }
 0x283   : > { %v1358_v37 = vmax.f32 %v4285_v26, 0.0  ;;  %v1315_v44 = vpop.f32.mrb[31].mxu0  ;;  %v3799_v58 = vpop.f32.mrb[21].mxu1 }
 0x284   : > { %v1356_v62 = vmax.f32 %v1315_v44, 0.0  ;;  %v3800_v30 = vadd.f32 %v3799_v58, %v3798_v53  ;;  %v3801_v56 = vpop.f32.mrb[22].mxu1 }
 0x285   : > { %v5747_v3 = vpack.c.bf16 %v1358_v37, %v1357_v35  ;;  %v3802_v18 = vpop.f32.mrb[23].mxu1 }
 0x286   : > { %v5749_v25 = vpack.c.bf16 %v1356_v62, %v1355_v61  ;;  %v3803_v5 = vadd.f32 %v3802_v18, %v3801_v56 }
 0x287   : > { %6228 = vst [vmem:[#allocation18_spill] sm:$0xff] %v5747_v3  ;;  %v1481_v42 = vshrl.u32 %v5747_v3, 16  ;;  %v1484_v39 = vshll.u32 %v5747_v3, 16  ;;  %v1546_v3 = vor.u32 %v1545_v0, %v1467_v48 }
 0x288   : > { %v4290_v59 = vpop.f32.mrb[32].mxu0  ;;  %2508 = vmatprep.mubr.bf16.mxu1 %v5749_v25  ;;  %v1474_v20 = vshrl.u32 %v5749_v25, 16  ;;  %v1477_v61 = vshll.u32 %v5749_v25, 16 }
 0x289   : > { %v5755_v47 = vadd.f32 %v4290_v59, %v3800_v30  ;;  %v1797_v26 = vpop.f32.mrb[33].mxu0  ;;  %v1483_v53 = vrot.slane %v1481_v42, 7  ;;  %v1549_v35 = vrot.slane %v1484_v39, 1  ;;  %v5776_v0 = vsel %vm4936_vm4, %v1546_v3, 0 }
 0x28a   : > { %v5758_v37 = vadd.f32 %v5605_v21, %v1797_v26  ;;  %v4291_v44 = vpop.f32.mrb[34].mxu0  ;;  %v3804_v58 = vpop.f32.mrb[24].mxu1  ;;  %v1476_v15 = vrot.slane %v1474_v20, 7  ;;  %v1547_v48 = vrot.slane %v1477_v61, 1 }
 0x28b   : > { %v5761_v62 = vadd.f32 %v4291_v44, %v3803_v5  ;;  %v3805_v56 = vpop.f32.mrb[25].mxu1  ;;  %v1800_v18 = vpop.f32.mrb[35].mxu0  ;;  %v5763_v41 = vor.u32 %v1549_v35, %v1481_v42  ;;  %v1486_v21 = vor.u32 %v1484_v39, %v1483_v53  ;;  %v4679_v44 = vld [vmem:[#allocation2 + $0x208] sm:$0xff]  }
 0x28c   : > { %v3806_v59 = vadd.f32 %v3805_v56, %v3804_v58  ;;  %v3807_v30 = vpop.f32.mrb[26].mxu1  ;;  %v5766_v19 = vadd.f32 %v5608_v1, %v1800_v18  ;;  %v1479_v16 = vor.u32 %v1477_v61, %v1476_v15  ;;  %v1548_v35 = vor.u32 %v1547_v48, %v1474_v20  ;;  %v4681_v15 = vld [vmem:[#allocation2 + $0x218] sm:$0xff]  }
 0x28d   : > { %v3808_v26 = vpop.f32.mrb[27].mxu1  ;;  %v5782_v1 = vsel %vm4941_vm5, 0, %v1486_v21 }
 0x28e   : > { %v3809_v40 = vadd.f32 %v3808_v26, %v3807_v30  ;;  %v5770_v7 = vsel %vm4941_vm5, 0, %v1479_v16 }
 0x28f   : > { %2509 = vmatmul.mubr.bf16.gmra.mrb[76].mxu1 %v5770_v7  ;;  %2661 = vmatprep.mubr.bf16.mxu0 %v5770_v7 }
 0x290   : > { %v4294_v42 = vpop.f32.mrb[36].mxu0  ;;  %2662 = vmatmul.mubr.bf16.gmra.mrb[104].mxu0 %v5776_v0  ;;  %2710 = vmatprep.mubr.bf16.mxu1 %v5549_v49  ;;  %v5792_v49 = vsel %vm4936_vm4, %v1548_v35, 0 }
 0x291   : > { %v1813_v39 = vpop.f32.mrb[37].mxu0  ;;  %2669 = vmatprep.mubr.bf16.mxu0 %v5782_v1 }
 0x292   : > { %v5785_v16 = vadd.f32 %v3806_v59, %v1813_v39  ;;  %v4295_v5 = vpop.f32.mrb[38].mxu0  ;;  %v4682_v59 = vld [vmem:[#allocation2 + $0x220] sm:$0xff]  }
 0x293   : > { %v1816_v53 = vpop.f32.mrb[39].mxu0 }
 0x294   : > { %v5787_v3 = vadd.f32 %v3809_v40, %v1816_v53  ;;  %v4680_v40 = vld [vmem:[#allocation2 + $0x210] sm:$0xff]   ;;  %v4683_v53 = vld [vmem:[#allocation2 + $0x228] sm:$0xff]  }
 0x297   : > { %2711 = vmatmul.mubr.bf16.vlgmr.msra.gmra.mrb[80].mxu1 %v5463_v52 }
 0x298   : > { %4321 = vmatpush3.bf16.msra.mxu1 %v5640_v29  ;;  %2670 = vmatmul.mubr.bf16.gmra.mrb[108].mxu0 %v5792_v49  ;;  %v5796_v11 = vpop.f32.mrb[40].mxu0 }
 0x299   : > { %2718 = vmatprep.mubr.bf16.mxu1 %v5559_v14  ;;  %2871 = vmatprep.mubr.bf16.mxu0 %v5459_v46  ;;  %v1829_v20 = vpop.f32.mrb[41].mxu0 }
 0x29a   : > { %v5800_v58 = vpop.f32.mrb[42].mxu0  ;;  %4322 = vmatprep.subr.bf16.mxu1 %v4679_v44 }
 0x29b   : > { %v1832_v52 = vpop.f32.mrb[43].mxu0 }
 0x29c   : > { %4323 = vmatpush3.bf16.msra.mxu1 %v4679_v44 }
 0x29d   : > { %4324 = vmatprep.subr.bf16.mxu1 %v4680_v40 }
 0x29f   : > { %2719 = vmatmul.mubr.bf16.gmra.mrb[84].mxu1 %v5459_v46 }
 0x2a0   : > { %2726 = vmatprep.mubr.bf16.mxu1 %v5575_v31  ;;  %2872 = vmatmul.mubr.bf16.vlgmr.msra.gmra.mrb[112].mxu0 %v5501_v10  ;;  %v5805_v29 = vpop.f32.mrb[44].mxu0 }
 0x2a1   : > { %2879 = vmatprep.mubr.bf16.mxu0 %v5514_v22  ;;  %v5808_v61 = vpop.f32.mrb[45].mxu0  ;;  %4325 = vmatpush3.bf16.msra.mxu1 %v4680_v40 }
 0x2a2   : > { %v3810_v56 = vpop.f32.mrb[28].mxu1  ;;  %v5810_v18 = vpop.f32.mrb[46].mxu0  ;;  %4326 = vmatprep.subr.bf16.mxu1 %v4681_v15 }
 0x2a3   : > { %v3811_v30 = vpop.f32.mrb[29].mxu1  ;;  %v5812_v21 = vpop.f32.mrb[47].mxu0 }
 0x2a4   : > { %v3812_v46 = vadd.f32 %v3811_v30, %v3810_v56  ;;  %v3813_v26 = vpop.f32.mrb[30].mxu1  ;;  %v4684_v30 = vld [vmem:[#allocation2 + $0x230] sm:$0xff]  }
 0x2a5   : > { %v3814_v48 = vpop.f32.mrb[31].mxu1  ;;  %4327 = vmatpush3.bf16.msra.mxu1 %v4681_v15 }
 0x2a6   : > { %v5814_v10 = vadd.f32 %v4294_v42, %v3812_v46  ;;  %v3815_v39 = vadd.f32 %v3814_v48, %v3813_v26  ;;  %4328 = vmatprep.subr.bf16.mxu1 %v4682_v59 }
 0x2a7   : > { %2727 = vmatmul.mubr.bf16.gmra.mrb[88].mxu1 %v5514_v22 }
 0x2a8   : > { %v5817_v35 = vadd.f32 %v4295_v5, %v3815_v39  ;;  %2734 = vmatprep.mubr.bf16.mxu1 %v5592_v55  ;;  %2880 = vmatmul.mubr.bf16.gmra.mrb[116].mxu0 %v5529_v32  ;;  %v3904_v44 = vpop.f32.mrb[48].mxu0 }
 0x2a9   : > { %2887 = vmatprep.mubr.bf16.mxu0 %v5510_v38  ;;  %v3905_v40 = vpop.f32.mrb[49].mxu0  ;;  %4329 = vmatpush3.bf16.msra.mxu1 %v4682_v59 }
 0x2aa   : > { %v3816_v56 = vpop.f32.mrb[32].mxu1  ;;  %v3906_v15 = vadd.f32 %v3905_v40, %v3904_v44  ;;  %v3907_v42 = vpop.f32.mrb[50].mxu0  ;;  %4330 = vmatprep.subr.bf16.mxu1 %v4683_v53  ;;  %v4685_v44 = vld [vmem:[#allocation2 + $0x238] sm:$0xff]  }
 0x2ab   : > { %v3817_v46 = vpop.f32.mrb[33].mxu1  ;;  %v3908_v26 = vpop.f32.mrb[51].mxu0 }
 0x2ac   : > { %v3818_v48 = vadd.f32 %v3817_v46, %v3816_v56  ;;  %v3819_v22 = vpop.f32.mrb[34].mxu1  ;;  %v5823_v5 = vadd.f32 %v3906_v15, %v5758_v37  ;;  %v3909_v39 = vadd.f32 %v3908_v26, %v3907_v42 }
 0x2ad   : > { %v3820_v55 = vpop.f32.mrb[35].mxu1  ;;  %4331 = vmatpush3.bf16.msra.mxu1 %v4683_v53 }
 0x2ae   : > { %v5825_v32 = vadd.f32 %v3818_v48, %v1829_v20  ;;  %v3821_v31 = vadd.f32 %v3820_v55, %v3819_v22  ;;  %v5828_v59 = vadd.f32 %v3909_v39, %v5766_v19  ;;  %4332 = vmatprep.subr.bf16.mxu1 %v4684_v30 }
 0x2af   : > { %2735 = vmatmul.mubr.bf16.gmra.mrb[92].mxu1 %v5510_v38 }
 0x2b0   : > { %v5831_v40 = vadd.f32 %v3821_v31, %v1832_v52  ;;  %v3910_v56 = vpop.f32.mrb[52].mxu0  ;;  %2742 = vmatprep.mubr.bf16.mxu1 %v5603_v57  ;;  %2888 = vmatmul.mubr.bf16.gmra.mrb[120].mxu0 %v5542_v51 }
 0x2b1   : > { %v3911_v37 = vpop.f32.mrb[53].mxu0  ;;  %2895 = vmatprep.mubr.bf16.mxu0 %v5564_v4  ;;  %4333 = vmatpush3.bf16.msra.mxu1 %v4684_v30 }
 0x2b2   : > { %v3912_v20 = vadd.f32 %v3911_v37, %v3910_v56  ;;  %v3913_v55 = vpop.f32.mrb[54].mxu0  ;;  %4334 = vmatprep.subr.bf16.mxu1 %v4685_v44 }
 0x2b3   : > { %v3914_v19 = vpop.f32.mrb[55].mxu0 }
 0x2b4   : > { %v5837_v53 = vadd.f32 %v3912_v20, %v5755_v47  ;;  %v3915_v15 = vadd.f32 %v3914_v19, %v3913_v55 }
 0x2b5   : > { %4335 = vmatpush3.bf16.msra.mxu1 %v4685_v44 }
 0x2b6   : > { %v5840_v38 = vadd.f32 %v3915_v15, %v5761_v62 }
 0x2b7   : > { %2743 = vmatmul.mubr.bf16.gmra.mrb[96].mxu1 %v5564_v4 }
 0x2b8   : > { %v3916_v31 = vpop.f32.mrb[56].mxu0  ;;  %2750 = vmatprep.mubr.bf16.mxu1 %v5631_v33  ;;  %2896 = vmatmul.mubr.bf16.gmra.mrb[124].mxu0 %v5582_v36 }
 0x2b9   : > { %v3917_v51 = vpop.f32.mrb[57].mxu0  ;;  %2903 = vmatprep.mubr.bf16.mxu0 %v5561_v34 }
 0x2ba   : > { %v3918_v52 = vadd.f32 %v3917_v51, %v3916_v31  ;;  %v3919_v42 = vpop.f32.mrb[58].mxu0 }
 0x2bb   : > { %v3920_v30 = vpop.f32.mrb[59].mxu0 }
 0x2bc   : > { %v5847_v47 = vadd.f32 %v3918_v52, %v5785_v16  ;;  %v3921_v46 = vadd.f32 %v3920_v30, %v3919_v42 }
 0x2be   : > { %v5850_v62 = vadd.f32 %v3921_v46, %v5787_v3 }
 0x2bf   : > { %2751 = vmatmul.mubr.bf16.gmra.mrb[100].mxu1 %v5561_v34 }
 0x2c0   : > { %v3922_v4 = vpop.f32.mrb[60].mxu0  ;;  %2758 = vmatprep.mubr.bf16.mxu1 %v5646_v43  ;;  %2904 = vmatmul.mubr.bf16.gmra.mrb[128].mxu0 %v5597_v50 }
 0x2c1   : > { %v3923_v36 = vpop.f32.mrb[61].mxu0  ;;  %2911 = vmatprep.mubr.bf16.mxu0 %v5612_v60 }
 0x2c2   : > { %v3924_v26 = vadd.f32 %v3923_v36, %v3922_v4  ;;  %v3822_v48 = vpop.f32.mrb[36].mxu1  ;;  %v3925_v22 = vpop.f32.mrb[62].mxu0 }
 0x2c3   : > { %v3823_v39 = vpop.f32.mrb[37].mxu1  ;;  %v3926_v16 = vpop.f32.mrb[63].mxu0 }
 0x2c4   : > { %v5857_v44 = vadd.f32 %v3924_v26, %v5814_v10  ;;  %v3824_v3 = vadd.f32 %v3823_v39, %v3822_v48  ;;  %v3927_v56 = vadd.f32 %v3926_v16, %v3925_v22  ;;  %v3825_v37 = vpop.f32.mrb[38].mxu1 }
 0x2c5   : > { %v3826_v34 = vpop.f32.mrb[39].mxu1 }
 0x2c6   : > { %v2431_v20 = vadd.f32 %v5796_v11, %v3824_v3  ;;  %v5861_v55 = vadd.f32 %v3927_v56, %v5817_v35  ;;  %v3827_v50 = vadd.f32 %v3826_v34, %v3825_v37 }
 0x2c7   : > { %2759 = vmatmul.mubr.bf16.gmra.mrb[104].mxu1 %v5612_v60 }
 0x2c8   : > { %v2434_v19 = vadd.f32 %v5800_v58, %v3827_v50  ;;  %v3928_v15 = vpop.f32.mrb[64].mxu0  ;;  %2766 = vmatprep.mubr.bf16.mxu1 %v5668_v17  ;;  %2912 = vmatmul.mubr.bf16.gmra.mrb[132].mxu0 %v5625_v24 }
 0x2c9   : > { %v3929_v10 = vpop.f32.mrb[65].mxu0  ;;  %2919 = vmatprep.mubr.bf16.mxu0 %v5610_v6 }
 0x2ca   : > { %v3930_v31 = vadd.f32 %v3929_v10, %v3928_v15  ;;  %v3828_v51 = vpop.f32.mrb[40].mxu1  ;;  %v3931_v52 = vpop.f32.mrb[66].mxu0 }
 0x2cb   : > { %v3829_v11 = vpop.f32.mrb[41].mxu1  ;;  %v3932_v42 = vpop.f32.mrb[67].mxu0 }
 0x2cc   : > { %v5869_v35 = vadd.f32 %v3930_v31, %v5825_v32  ;;  %v3830_v30 = vadd.f32 %v3829_v11, %v3828_v51  ;;  %v3933_v60 = vadd.f32 %v3932_v42, %v3931_v52  ;;  %v3831_v46 = vpop.f32.mrb[42].mxu1  ;;  %v6229_v31 = vld [vmem:[#allocation11_spill] sm:$0xff]  ;;  %v6230_v52 = vld [vmem:[#allocation10_spill] sm:$0xff] }
 0x2cd   : > { %v3832_v58 = vpop.f32.mrb[43].mxu1 }
 0x2ce   : > { %v2439_v4 = vadd.f32 %v3830_v30, %v5808_v61  ;;  %v5873_v36 = vadd.f32 %v3933_v60, %v5831_v40  ;;  %v3833_v24 = vadd.f32 %v3832_v58, %v3831_v46 }
 0x2cf   : > { %2767 = vmatmul.mubr.bf16.gmra.mrb[108].mxu1 %v5610_v6 }
 0x2d0   : > { %v2442_v26 = vadd.f32 %v3833_v24, %v5812_v21  ;;  %v3934_v48 = vpop.f32.mrb[68].mxu0  ;;  %2774 = vmatprep.mubr.bf16.mxu1 %v5680_v23  ;;  %2920 = vmatmul.mubr.bf16.gmra.mrb[136].mxu0 %v5637_v45 }
 0x2d1   : > { %v3935_v32 = vpop.f32.mrb[69].mxu0  ;;  %2927 = vmatprep.mubr.bf16.mxu0 %v5651_v2 }
 0x2d2   : > { %v3936_v22 = vadd.f32 %v3935_v32, %v3934_v48  ;;  %v3937_v39 = vpop.f32.mrb[70].mxu0 }
 0x2d3   : > { %v3938_v16 = vpop.f32.mrb[71].mxu0 }
 0x2d4   : > { %v5880_v61 = vadd.f32 %v3936_v22, %v2431_v20  ;;  %v3939_v40 = vadd.f32 %v3938_v16, %v3937_v39  ;;  %v6232_v22 = vld [vmem:[#allocation12_spill] sm:$0xff]  ;;  %v6233_v16 = vld [vmem:[#allocation14_spill] sm:$0xff] }
 0x2d6   : > { %v5882_v3 = vadd.f32 %v3939_v40, %v2434_v19  ;;  %v6234_v40 = vld [vmem:[#allocation15_spill] sm:$0xff] }
 0x2d7   : > { %2775 = vmatmul.mubr.bf16.gmra.mrb[112].mxu1 %v5651_v2 }
 0x2d8   : > { %2782 = vmatprep.mubr.bf16.mxu1 %v5700_v8  ;;  %2928 = vmatmul.mubr.bf16.gmra.mrb[140].mxu0 %v5662_v27 }
 0x2d9   : > { %2935 = vmatprep.mubr.bf16.mxu0 %v5649_v28 }
 0x2df   : > { %2783 = vmatmul.mubr.bf16.gmra.mrb[116].mxu1 %v5649_v28 }
 0x2e0   : > { %2790 = vmatprep.mubr.bf16.mxu1 %v5712_v13  ;;  %2936 = vmatmul.mubr.bf16.gmra.mrb[144].mxu0 %v5674_v12 }
 0x2e1   : > { %2943 = vmatprep.mubr.bf16.mxu0 %v5685_v54 }
 0x2e2   : > { %v3834_v6 = vpop.f32.mrb[44].mxu1 }
 0x2e3   : > { %v3835_v45 = vpop.f32.mrb[45].mxu1  ;;  %v3940_v21 = vpop.f32.mrb[72].mxu0 }
 0x2e4   : > { %v3836_v56 = vadd.f32 %v3835_v45, %v3834_v6  ;;  %v3837_v37 = vpop.f32.mrb[46].mxu1  ;;  %v3941_v2 = vpop.f32.mrb[73].mxu0  ;;  %v6235_v6 = vld [vmem:[#allocation13_spill] sm:$0xff]  ;;  %v6236_v45 = vld [vmem:[#allocation16_spill] sm:$0xff] }
 0x2e5   : > { %v3942_v34 = vadd.f32 %v3941_v2, %v3940_v21  ;;  %v3838_v20 = vpop.f32.mrb[47].mxu1  ;;  %v3943_v50 = vpop.f32.mrb[74].mxu0 }
 0x2e6   : > { %v2447_v27 = vadd.f32 %v5805_v29, %v3836_v56  ;;  %v3839_v19 = vadd.f32 %v3838_v20, %v3837_v37  ;;  %v3944_v15 = vpop.f32.mrb[75].mxu0 }
 0x2e7   : > { %v5893_v28 = vadd.f32 %v3942_v34, %v2439_v4  ;;  %v3945_v10 = vadd.f32 %v3944_v15, %v3943_v50  ;;  %2791 = vmatmul.mubr.bf16.gmra.mrb[120].mxu1 %v5685_v54 }
 0x2e8   : > { %v2450_v12 = vadd.f32 %v5810_v18, %v3839_v19  ;;  %2798 = vmatprep.mubr.bf16.mxu1 %v5732_v63  ;;  %2944 = vmatmul.mubr.bf16.gmra.mrb[148].mxu0 %v6229_v31 }
 0x2e9   : > { %v5899_v51 = vadd.f32 %v3945_v10, %v2442_v26  ;;  %2951 = vmatprep.mubr.bf16.mxu0 %v6230_v52  ;;  %v6231_v26 = vld [vmem:[#allocation17_spill] sm:$0xff] }
 0x2ea   : > { %v3840_v11 = vpop.f32.mrb[48].mxu1 }
 0x2eb   : > { %v3841_v42 = vpop.f32.mrb[49].mxu1  ;;  %v3946_v29 = vpop.f32.mrb[76].mxu0 }
 0x2ec   : > { %v3842_v30 = vadd.f32 %v3841_v42, %v3840_v11  ;;  %v3843_v60 = vpop.f32.mrb[50].mxu1  ;;  %v3947_v46 = vpop.f32.mrb[77].mxu0  ;;  %v6237_v42 = vld [vmem:[#allocation18_spill] sm:$0xff] }
 0x2ed   : > { %v3948_v58 = vadd.f32 %v3947_v46, %v3946_v29  ;;  %v3844_v4 = vpop.f32.mrb[51].mxu1  ;;  %v3949_v24 = vpop.f32.mrb[78].mxu0 }
 0x2ee   : > { %v3845_v54 = vadd.f32 %v3844_v4, %v3843_v60  ;;  %v3950_v48 = vpop.f32.mrb[79].mxu0 }
 0x2ef   : > { %v5902_v18 = vadd.f32 %v3948_v58, %v2447_v27  ;;  %v3951_v32 = vadd.f32 %v3950_v48, %v3949_v24  ;;  %2799 = vmatmul.mubr.bf16.gmra.mrb[124].mxu1 %v6230_v52  ;;  %v5924_v52 = vsel %vm4936_vm4, %v5763_v41, 0 }
 0x2f0   : > { %2806 = vmatprep.mubr.bf16.mxu1 %v6231_v26  ;;  %2952 = vmatmul.mubr.bf16.gmra.mrb[152].mxu0 %v6232_v22 }
 0x2f1   : > { %v5907_v39 = vadd.f32 %v3951_v32, %v2450_v12  ;;  %2959 = vmatprep.mubr.bf16.mxu0 %v6233_v16 }
 0x2f7   : > { %2807 = vmatmul.mubr.bf16.gmra.mrb[128].mxu1 %v6233_v16  ;;  %v6239_v16 = vld [vmem:[#allocation8_spill] sm:$0xff] }
 0x2f8   : > { %2814 = vmatprep.mubr.bf16.mxu1 %v5776_v0  ;;  %2960 = vmatmul.mubr.bf16.gmra.mrb[156].mxu0 %v6234_v40  ;;  %v6240_v40 = vld [vmem:[#allocation9_spill] sm:$0xff] }
 0x2f9   : > { %2967 = vmatprep.mubr.bf16.mxu0 %v6235_v6 }
 0x2ff   : > { %2815 = vmatmul.mubr.bf16.gmra.mrb[132].mxu1 %v6235_v6 }
 0x300   : > { %2822 = vmatprep.mubr.bf16.mxu1 %v5792_v49  ;;  %2968 = vmatmul.mubr.bf16.gmra.mrb[160].mxu0 %v6236_v45 }
 0x301   : > { %2975 = vmatprep.mubr.bf16.mxu0 %v5749_v25 }
 0x302   : > { %v3846_v21 = vpop.f32.mrb[52].mxu1 }
 0x303   : > { %v3847_v56 = vpop.f32.mrb[53].mxu1  ;;  %v3952_v37 = vpop.f32.mrb[80].mxu0 }
 0x304   : > { %v3848_v2 = vadd.f32 %v3847_v56, %v3846_v21  ;;  %v3849_v34 = vpop.f32.mrb[54].mxu1  ;;  %v3953_v20 = vpop.f32.mrb[81].mxu0 }
 0x305   : > { %v3954_v50 = vadd.f32 %v3953_v20, %v3952_v37  ;;  %v3850_v27 = vpop.f32.mrb[55].mxu1  ;;  %v3955_v19 = vpop.f32.mrb[82].mxu0 }
 0x306   : > { %v3851_v15 = vadd.f32 %v3850_v27, %v3849_v34  ;;  %v3956_v10 = vpop.f32.mrb[83].mxu0 }
 0x307   : > { %v5918_v12 = vadd.f32 %v3954_v50, %v3842_v30  ;;  %v3957_v31 = vadd.f32 %v3956_v10, %v3955_v19  ;;  %2823 = vmatmul.mubr.bf16.gmra.mrb[136].mxu1 %v5749_v25 }
 0x308   : > { %2830 = vmatprep.mubr.bf16.mxu1 %v5924_v52  ;;  %2976 = vmatmul.mubr.bf16.gmra.mrb[164].mxu0 %v5770_v7 }
 0x309   : > { %v5928_v11 = vadd.f32 %v3957_v31, %v3845_v54  ;;  %2983 = vmatprep.mubr.bf16.mxu0 %v6237_v42  ;;  %v6238_v54 = vmov 0  }
 0x30a   : > { %v3852_v29 = vpop.f32.mrb[56].mxu1 }
 0x30b   : > { %v3853_v60 = vpop.f32.mrb[57].mxu1  ;;  %v3958_v30 = vpop.f32.mrb[84].mxu0 }
 0x30c   : > { %v3854_v46 = vadd.f32 %v3853_v60, %v3852_v29  ;;  %v3855_v58 = vpop.f32.mrb[58].mxu1  ;;  %v3959_v4 = vpop.f32.mrb[85].mxu0 }
 0x30d   : > { %v3960_v25 = vadd.f32 %v3959_v4, %v3958_v30  ;;  %v3856_v24 = vpop.f32.mrb[59].mxu1  ;;  %v3961_v48 = vpop.f32.mrb[86].mxu0 }
 0x30e   : > { %v3857_v9 = vadd.f32 %v3856_v24, %v3855_v58  ;;  %v3962_v41 = vpop.f32.mrb[87].mxu0 }
 0x30f   : > { %v5931_v32 = vadd.f32 %v3960_v25, %v3848_v2  ;;  %v3963_v22 = vadd.f32 %v3962_v41, %v3961_v48  ;;  %2831 = vmatmul.mubr.bf16.gmra.mrb[140].mxu1 %v6237_v42 }
 0x310   : > { %2984 = vmatmul.mubr.bf16.gmra.mrb[168].mxu0 %v5782_v1  ;;  %4336 = vmatprep.mubr.bf16.mxu1 %v5559_v14 }
 0x311   : > { %v5936_v7 = vadd.f32 %v3963_v22, %v3851_v15  ;;  %2991 = vmatprep.mubr.bf16.mxu0 %v6238_v54 }
 0x317   : > { %4337 = vmatmul.mubr.bf16.vlgmr.msra.gmra.mrb[144].mxu1 %v6239_v16 }
 0x318   : > { %2992 = vmatmul.mubr.bf16.gmra.mrb[172].mxu0 %v6238_v54  ;;  %4340 = vmatprep.mubr.bf16.mxu1 %v6240_v40 }
 0x31f   : > { %4341 = vmatmul.mubr.bf16.gmra.mrb[148].mxu1 %v5603_v57 }
 0x320   : > { %4344 = vmatprep.mubr.bf16.mxu1 %v5631_v33 }
 0x322   : > { %v3858_v6 = vpop.f32.mrb[60].mxu1 }
 0x323   : > { %v3859_v45 = vpop.f32.mrb[61].mxu1  ;;  %v3964_v21 = vpop.f32.mrb[88].mxu0 }
 0x324   : > { %v3860_v1 = vadd.f32 %v3859_v45, %v3858_v6  ;;  %v3861_v56 = vpop.f32.mrb[62].mxu1  ;;  %v3965_v14 = vpop.f32.mrb[89].mxu0 }
 0x325   : > { %v3966_v37 = vadd.f32 %v3965_v14, %v3964_v21  ;;  %v3862_v2 = vpop.f32.mrb[63].mxu1  ;;  %v3967_v34 = vpop.f32.mrb[90].mxu0 }
 0x326   : > { %v3863_v20 = vadd.f32 %v3862_v2, %v3861_v56  ;;  %v3968_v50 = vpop.f32.mrb[91].mxu0 }
 0x327   : > { %v5944_v27 = vadd.f32 %v3966_v37, %v3854_v46  ;;  %v3969_v19 = vadd.f32 %v3968_v50, %v3967_v34  ;;  %4345 = vmatmul.mubr.bf16.gmra.mrb[152].mxu1 %v5646_v43 }
 0x328   : > { %4348 = vmatprep.mubr.bf16.mxu1 %v5668_v17 }
 0x329   : > { %v5948_v57 = vadd.f32 %v3969_v19, %v3857_v9 }
 0x32a   : > { %v3864_v33 = vpop.f32.mrb[64].mxu1 }
 0x32b   : > { %v3865_v15 = vpop.f32.mrb[65].mxu1  ;;  %v3970_v10 = vpop.f32.mrb[92].mxu0 }
 0x32c   : > { %v3866_v31 = vadd.f32 %v3865_v15, %v3864_v33  ;;  %v3867_v42 = vpop.f32.mrb[66].mxu1  ;;  %v3971_v29 = vpop.f32.mrb[93].mxu0 }
 0x32d   : > { %v3972_v60 = vadd.f32 %v3971_v29, %v3970_v10  ;;  %v3868_v30 = vpop.f32.mrb[67].mxu1  ;;  %v3973_v58 = vpop.f32.mrb[94].mxu0 }
 0x32e   : > { %v3869_v4 = vadd.f32 %v3868_v30, %v3867_v42  ;;  %v3974_v25 = vpop.f32.mrb[95].mxu0 }
 0x32f   : > { %v5950_v46 = vadd.f32 %v3972_v60, %v3860_v1  ;;  %v3975_v24 = vadd.f32 %v3974_v25, %v3973_v58  ;;  %4349 = vmatmul.mubr.bf16.gmra.mrb[156].mxu1 %v5680_v23 }
 0x330   : > { %4352 = vmatprep.mubr.bf16.mxu1 %v5700_v8 }
 0x331   : > { %v5954_v43 = vadd.f32 %v3975_v24, %v3863_v20 }
 0x337   : > { %4353 = vmatmul.mubr.bf16.gmra.mrb[0].mxu1 %v5712_v13 }
 0x338   : > { %4356 = vmatprep.mubr.bf16.mxu1 %v5732_v63 }
 0x33f   : > { %4357 = vmatmul.mubr.bf16.gmra.mrb[4].mxu1 %v6231_v26 }
 0x340   : > { %4360 = vmatprep.mubr.bf16.mxu1 %v5776_v0 }
 0x342   : > { %v3870_v17 = vpop.f32.mrb[68].mxu1 }
 0x343   : > { %v3871_v48 = vpop.f32.mrb[69].mxu1  ;;  %v3976_v9 = vpop.f32.mrb[96].mxu0 }
 0x344   : > { %v3872_v41 = vadd.f32 %v3871_v48, %v3870_v17  ;;  %v3873_v22 = vpop.f32.mrb[70].mxu1  ;;  %v3977_v16 = vpop.f32.mrb[97].mxu0 }
 0x345   : > { %v3978_v40 = vadd.f32 %v3977_v16, %v3976_v9  ;;  %v3874_v23 = vpop.f32.mrb[71].mxu1  ;;  %v3979_v6 = vpop.f32.mrb[98].mxu0 }
 0x346   : > { %v3875_v8 = vadd.f32 %v3874_v23, %v3873_v22  ;;  %v3980_v45 = vpop.f32.mrb[99].mxu0 }
 0x347   : > { %v5960_v21 = vadd.f32 %v3978_v40, %v3866_v31  ;;  %v3981_v13 = vadd.f32 %v3980_v45, %v3979_v6  ;;  %4361 = vmatmul.mubr.bf16.gmra.mrb[8].mxu1 %v5792_v49 }
 0x348   : > { %4364 = vmatprep.mubr.bf16.mxu1 %v5924_v52 }
 0x349   : > { %v5964_v63 = vadd.f32 %v3981_v13, %v3869_v4 }
 0x34a   : > { %v3876_v0 = vpop.f32.mrb[72].mxu1 }
 0x34b   : > { %v3877_v26 = vpop.f32.mrb[73].mxu1  ;;  %v3982_v1 = vpop.f32.mrb[100].mxu0 }
 0x34c   : > { %v3878_v56 = vadd.f32 %v3877_v26, %v3876_v0  ;;  %v3879_v14 = vpop.f32.mrb[74].mxu1  ;;  %v3983_v37 = vpop.f32.mrb[101].mxu0 }
 0x34d   : > { %v3984_v2 = vadd.f32 %v3983_v37, %v3982_v1  ;;  %v3880_v34 = vpop.f32.mrb[75].mxu1  ;;  %v3985_v20 = vpop.f32.mrb[102].mxu0 }
 0x34e   : > { %v3881_v50 = vadd.f32 %v3880_v34, %v3879_v14  ;;  %v3986_v19 = vpop.f32.mrb[103].mxu0 }
 0x34f   : > { %v5966_v33 = vadd.f32 %v3984_v2, %v3872_v41  ;;  %v3987_v15 = vadd.f32 %v3986_v19, %v3985_v20  ;;  %4365 = vmatmul.mubr.bf16.gmra.mrb[12].mxu1 %v6238_v54 }
 0x351   : > { %v5969_v49 = vadd.f32 %v3987_v15, %v3875_v8 }
 0x362   : > { %v3882_v52 = vpop.f32.mrb[76].mxu1 }
 0x363   : > { %v3883_v10 = vpop.f32.mrb[77].mxu1  ;;  %v3988_v31 = vpop.f32.mrb[104].mxu0 }
 0x364   : > { %v3884_v42 = vadd.f32 %v3883_v10, %v3882_v52  ;;  %v3885_v29 = vpop.f32.mrb[78].mxu1  ;;  %v3989_v60 = vpop.f32.mrb[105].mxu0 }
 0x365   : > { %v3990_v30 = vadd.f32 %v3989_v60, %v3988_v31  ;;  %v3886_v58 = vpop.f32.mrb[79].mxu1  ;;  %v3991_v4 = vpop.f32.mrb[106].mxu0 }
 0x366   : > { %v3887_v25 = vadd.f32 %v3886_v58, %v3885_v29  ;;  %v3992_v24 = vpop.f32.mrb[107].mxu0 }
 0x367   : > { %v5971_v17 = vadd.f32 %v3990_v30, %v3878_v56  ;;  %v3993_v48 = vadd.f32 %v3992_v24, %v3991_v4 }
 0x369   : > { %v5973_v9 = vadd.f32 %v3993_v48, %v3881_v50 }
 0x36a   : > { %v4016_v41 = vpop.f32.mrb[80].mxu1 }
 0x36b   : > { %v3994_v54 = vpop.f32.mrb[108].mxu0  ;;  %v4017_v22 = vpop.f32.mrb[81].mxu1 }
 0x36c   : > { %v4018_v16 = vadd.f32 %v4017_v22, %v4016_v41  ;;  %v3995_v40 = vpop.f32.mrb[109].mxu0  ;;  %v4019_v23 = vpop.f32.mrb[82].mxu1 }
 0x36d   : > { %v3996_v6 = vadd.f32 %v3995_v40, %v3994_v54  ;;  %v3997_v8 = vpop.f32.mrb[110].mxu0  ;;  %v4020_v45 = vpop.f32.mrb[83].mxu1 }
 0x36e   : > { %v2713_v13 = vadd.f32 %v4018_v16, %v5823_v5  ;;  %v4021_v0 = vadd.f32 %v4020_v45, %v4019_v23  ;;  %v3998_v26 = vpop.f32.mrb[111].mxu0 }
 0x36f   : > { %v5976_v1 = vadd.f32 %v3996_v6, %v3884_v42  ;;  %v3999_v56 = vadd.f32 %v3998_v26, %v3997_v8 }
 0x370   : > { %v2716_v14 = vadd.f32 %v4021_v0, %v5828_v59 }
 0x371   : > { %v5979_v37 = vadd.f32 %v3999_v56, %v3887_v25 }
 0x372   : > { %v4022_v2 = vpop.f32.mrb[84].mxu1 }
 0x373   : > { %v4023_v34 = vpop.f32.mrb[85].mxu1  ;;  %v4128_v20 = vpop.f32.mrb[112].mxu0 }
 0x374   : > { %v4024_v50 = vadd.f32 %v4023_v34, %v4022_v2  ;;  %v4025_v19 = vpop.f32.mrb[86].mxu1  ;;  %v4129_v15 = vpop.f32.mrb[113].mxu0 }
 0x375   : > { %v4130_v52 = vadd.f32 %v4129_v15, %v4128_v20  ;;  %v4026_v10 = vpop.f32.mrb[87].mxu1  ;;  %v4131_v31 = vpop.f32.mrb[114].mxu0 }
 0x376   : > { %v2721_v5 = vadd.f32 %v4024_v50, %v5837_v53  ;;  %v4027_v29 = vadd.f32 %v4026_v10, %v4025_v19  ;;  %v4132_v60 = vpop.f32.mrb[115].mxu0 }
 0x377   : > { %v4133_v42 = vadd.f32 %v4132_v60, %v4131_v31  ;;  %v5982_v30 = vadd.f32 %v4130_v52, %v2713_v13 }
 0x378   : > { %v2724_v59 = vadd.f32 %v4027_v29, %v5840_v38 }
 0x379   : > { %v5985_v58 = vadd.f32 %v4133_v42, %v2716_v14 }
 0x37a   : > { %v4028_v4 = vpop.f32.mrb[88].mxu1 }
 0x37b   : > { %v4029_v25 = vpop.f32.mrb[89].mxu1  ;;  %v4134_v24 = vpop.f32.mrb[116].mxu0 }
 0x37c   : > { %v4030_v48 = vadd.f32 %v4029_v25, %v4028_v4  ;;  %v4031_v41 = vpop.f32.mrb[90].mxu1  ;;  %v4135_v54 = vpop.f32.mrb[117].mxu0 }
 0x37d   : > { %v4136_v22 = vadd.f32 %v4135_v54, %v4134_v24  ;;  %v4032_v16 = vpop.f32.mrb[91].mxu1  ;;  %v4137_v40 = vpop.f32.mrb[118].mxu0 }
 0x37e   : > { %v2729_v53 = vadd.f32 %v4030_v48, %v5847_v47  ;;  %v4033_v23 = vadd.f32 %v4032_v16, %v4031_v41  ;;  %v4138_v6 = vpop.f32.mrb[119].mxu0 }
 0x37f   : > { %v4139_v8 = vadd.f32 %v4138_v6, %v4137_v40  ;;  %v5988_v45 = vadd.f32 %v4136_v22, %v2721_v5 }
 0x380   : > { %v2732_v38 = vadd.f32 %v4033_v23, %v5850_v62 }
 0x381   : > { %v5991_v13 = vadd.f32 %v4139_v8, %v2724_v59 }
 0x382   : > { %v4034_v0 = vpop.f32.mrb[92].mxu1 }
 0x383   : > { %v4035_v26 = vpop.f32.mrb[93].mxu1  ;;  %v4140_v56 = vpop.f32.mrb[120].mxu0 }
 0x384   : > { %v4036_v14 = vadd.f32 %v4035_v26, %v4034_v0  ;;  %v4037_v2 = vpop.f32.mrb[94].mxu1  ;;  %v4141_v34 = vpop.f32.mrb[121].mxu0 }
 0x385   : > { %v4142_v20 = vadd.f32 %v4141_v34, %v4140_v56  ;;  %v4038_v50 = vpop.f32.mrb[95].mxu1  ;;  %v4143_v19 = vpop.f32.mrb[122].mxu0 }
 0x386   : > { %v2737_v47 = vadd.f32 %v4036_v14, %v5857_v44  ;;  %v4039_v15 = vadd.f32 %v4038_v50, %v4037_v2  ;;  %v4144_v52 = vpop.f32.mrb[123].mxu0 }
 0x387   : > { %v4145_v10 = vadd.f32 %v4144_v52, %v4143_v19  ;;  %v5994_v31 = vadd.f32 %v4142_v20, %v2729_v53 }
 0x388   : > { %v2740_v62 = vadd.f32 %v4039_v15, %v5861_v55 }
 0x389   : > { %v5997_v5 = vadd.f32 %v4145_v10, %v2732_v38 }
 0x38a   : > { %v4040_v29 = vpop.f32.mrb[96].mxu1 }
 0x38b   : > { %v4041_v60 = vpop.f32.mrb[97].mxu1  ;;  %v4146_v42 = vpop.f32.mrb[124].mxu0 }
 0x38c   : > { %v4042_v59 = vadd.f32 %v4041_v60, %v4040_v29  ;;  %v4043_v4 = vpop.f32.mrb[98].mxu1  ;;  %v4147_v25 = vpop.f32.mrb[125].mxu0 }
 0x38d   : > { %v4148_v24 = vadd.f32 %v4147_v25, %v4146_v42  ;;  %v4044_v48 = vpop.f32.mrb[99].mxu1  ;;  %v4149_v41 = vpop.f32.mrb[126].mxu0 }
 0x38e   : > { %v2745_v44 = vadd.f32 %v4042_v59, %v5869_v35  ;;  %v4045_v54 = vadd.f32 %v4044_v48, %v4043_v4  ;;  %v4150_v22 = vpop.f32.mrb[127].mxu0 }
 0x38f   : > { %v4151_v16 = vadd.f32 %v4150_v22, %v4149_v41  ;;  %v6000_v40 = vadd.f32 %v4148_v24, %v2737_v47 }
 0x390   : > { %v2748_v55 = vadd.f32 %v4045_v54, %v5873_v36 }
 0x391   : > { %v6003_v53 = vadd.f32 %v4151_v16, %v2740_v62 }
 0x392   : > { %v4046_v23 = vpop.f32.mrb[100].mxu1 }
 0x393   : > { %v4047_v6 = vpop.f32.mrb[101].mxu1  ;;  %v4152_v8 = vpop.f32.mrb[128].mxu0 }
 0x394   : > { %v4048_v38 = vadd.f32 %v4047_v6, %v4046_v23  ;;  %v4049_v0 = vpop.f32.mrb[102].mxu1  ;;  %v4153_v26 = vpop.f32.mrb[129].mxu0 }
 0x395   : > { %v4154_v56 = vadd.f32 %v4153_v26, %v4152_v8  ;;  %v4050_v14 = vpop.f32.mrb[103].mxu1  ;;  %v4155_v2 = vpop.f32.mrb[130].mxu0 }
 0x396   : > { %v2753_v35 = vadd.f32 %v4048_v38, %v5880_v61  ;;  %v4051_v34 = vadd.f32 %v4050_v14, %v4049_v0  ;;  %v4156_v20 = vpop.f32.mrb[131].mxu0 }
 0x397   : > { %v4157_v50 = vadd.f32 %v4156_v20, %v4155_v2  ;;  %v6006_v19 = vadd.f32 %v4154_v56, %v2745_v44 }
 0x398   : > { %v2756_v36 = vadd.f32 %v4051_v34, %v5882_v3 }
 0x399   : > { %v6009_v47 = vadd.f32 %v4157_v50, %v2748_v55 }
 0x39a   : > { %v4052_v15 = vpop.f32.mrb[104].mxu1 }
 0x39b   : > { %v4053_v52 = vpop.f32.mrb[105].mxu1  ;;  %v4158_v10 = vpop.f32.mrb[132].mxu0 }
 0x39c   : > { %v4054_v62 = vadd.f32 %v4053_v52, %v4052_v15  ;;  %v4055_v29 = vpop.f32.mrb[106].mxu1  ;;  %v4159_v60 = vpop.f32.mrb[133].mxu0 }
 0x39d   : > { %v4160_v42 = vadd.f32 %v4159_v60, %v4158_v10  ;;  %v4056_v59 = vpop.f32.mrb[107].mxu1  ;;  %v4161_v4 = vpop.f32.mrb[134].mxu0 }
 0x39e   : > { %v2761_v61 = vadd.f32 %v4054_v62, %v5893_v28  ;;  %v4057_v25 = vadd.f32 %v4056_v59, %v4055_v29  ;;  %v4162_v24 = vpop.f32.mrb[135].mxu0 }
 0x39f   : > { %v4163_v48 = vadd.f32 %v4162_v24, %v4161_v4  ;;  %v6012_v41 = vadd.f32 %v4160_v42, %v2753_v35 }
 0x3a0   : > { %v2764_v3 = vadd.f32 %v4057_v25, %v5899_v51 }
 0x3a1   : > { %v6015_v44 = vadd.f32 %v4163_v48, %v2756_v36 }
 0x3a2   : > { %v4058_v54 = vpop.f32.mrb[108].mxu1 }
 0x3a3   : > { %v4059_v22 = vpop.f32.mrb[109].mxu1  ;;  %v4164_v16 = vpop.f32.mrb[136].mxu0 }
 0x3a4   : > { %v4060_v55 = vadd.f32 %v4059_v22, %v4058_v54  ;;  %v4061_v23 = vpop.f32.mrb[110].mxu1  ;;  %v4165_v6 = vpop.f32.mrb[137].mxu0 }
 0x3a5   : > { %v4166_v8 = vadd.f32 %v4165_v6, %v4164_v16  ;;  %v4062_v38 = vpop.f32.mrb[111].mxu1  ;;  %v4167_v0 = vpop.f32.mrb[138].mxu0 }
 0x3a6   : > { %v2769_v28 = vadd.f32 %v4060_v55, %v5902_v18  ;;  %v4063_v26 = vadd.f32 %v4062_v38, %v4061_v23  ;;  %v4168_v56 = vpop.f32.mrb[139].mxu0 }
 0x3a7   : > { %v4169_v14 = vadd.f32 %v4168_v56, %v4167_v0  ;;  %v6018_v2 = vadd.f32 %v4166_v8, %v2761_v61 }
 0x3a8   : > { %v2772_v51 = vadd.f32 %v4063_v26, %v5907_v39 }
 0x3a9   : > { %v6021_v35 = vadd.f32 %v4169_v14, %v2764_v3 }
 0x3aa   : > { %v4064_v34 = vpop.f32.mrb[112].mxu1 }
 0x3ab   : > { %v4065_v20 = vpop.f32.mrb[113].mxu1  ;;  %v4170_v50 = vpop.f32.mrb[140].mxu0 }
 0x3ac   : > { %v4066_v36 = vadd.f32 %v4065_v20, %v4064_v34  ;;  %v4067_v15 = vpop.f32.mrb[114].mxu1  ;;  %v4171_v52 = vpop.f32.mrb[141].mxu0 }
 0x3ad   : > { %v4172_v10 = vadd.f32 %v4171_v52, %v4170_v50  ;;  %v4068_v62 = vpop.f32.mrb[115].mxu1  ;;  %v4173_v29 = vpop.f32.mrb[142].mxu0 }
 0x3ae   : > { %v4455_v18 = vadd.f32 %v5918_v12, %v4066_v36  ;;  %v4069_v60 = vadd.f32 %v4068_v62, %v4067_v15  ;;  %v4174_v42 = vpop.f32.mrb[143].mxu0 }
 0x3af   : > { %v4175_v59 = vadd.f32 %v4174_v42, %v4173_v29  ;;  %v6024_v4 = vadd.f32 %v4172_v10, %v2769_v28 }
 0x3b0   : > { %v4463_v39 = vadd.f32 %v5928_v11, %v4069_v60 }
 0x3b1   : > { %v6027_v61 = vadd.f32 %v4175_v59, %v2772_v51 }
 0x3b2   : > { %v4070_v25 = vpop.f32.mrb[116].mxu1 }
 0x3b3   : > { %v4071_v24 = vpop.f32.mrb[117].mxu1  ;;  %v4176_v48 = vpop.f32.mrb[144].mxu0 }
 0x3b4   : > { %v4072_v3 = vadd.f32 %v4071_v24, %v4070_v25  ;;  %v4073_v54 = vpop.f32.mrb[118].mxu1  ;;  %v4177_v22 = vpop.f32.mrb[145].mxu0 }
 0x3b5   : > { %v4178_v16 = vadd.f32 %v4177_v22, %v4176_v48  ;;  %v4074_v55 = vpop.f32.mrb[119].mxu1  ;;  %v4179_v23 = vpop.f32.mrb[146].mxu0 }
 0x3b6   : > { %v4451_v12 = vadd.f32 %v5931_v32, %v4072_v3  ;;  %v4075_v6 = vadd.f32 %v4074_v55, %v4073_v54  ;;  %v4180_v8 = vpop.f32.mrb[147].mxu0 }
 0x3b7   : > { %v4181_v38 = vadd.f32 %v4180_v8, %v4179_v23  ;;  %v6030_v0 = vadd.f32 %v4455_v18, %v4178_v16 }
 0x3b8   : > { %v4459_v11 = vadd.f32 %v5936_v7, %v4075_v6 }
 0x3b9   : > { %v6033_v28 = vadd.f32 %v4463_v39, %v4181_v38 }
 0x3ba   : > { %v4076_v26 = vpop.f32.mrb[120].mxu1 }
 0x3bb   : > { %v4077_v56 = vpop.f32.mrb[121].mxu1  ;;  %v4182_v14 = vpop.f32.mrb[148].mxu0 }
 0x3bc   : > { %v4078_v51 = vadd.f32 %v4077_v56, %v4076_v26  ;;  %v4079_v34 = vpop.f32.mrb[122].mxu1  ;;  %v4183_v20 = vpop.f32.mrb[149].mxu0 }
 0x3bd   : > { %v4184_v50 = vadd.f32 %v4183_v20, %v4182_v14  ;;  %v4080_v36 = vpop.f32.mrb[123].mxu1  ;;  %v4185_v15 = vpop.f32.mrb[150].mxu0 }
 0x3be   : > { %v4471_v32 = vadd.f32 %v5944_v27, %v4078_v51  ;;  %v4081_v52 = vadd.f32 %v4080_v36, %v4079_v34  ;;  %v4186_v10 = vpop.f32.mrb[151].mxu0 }
 0x3bf   : > { %v4187_v62 = vadd.f32 %v4186_v10, %v4185_v15  ;;  %v6036_v29 = vadd.f32 %v4451_v12, %v4184_v50 }
 0x3c0   : > { %v4479_v7 = vadd.f32 %v5948_v57, %v4081_v52 }
 0x3c1   : > { %v6039_v18 = vadd.f32 %v4459_v11, %v4187_v62 }
 0x3c2   : > { %v4082_v60 = vpop.f32.mrb[124].mxu1 }
 0x3c3   : > { %v4083_v42 = vpop.f32.mrb[125].mxu1  ;;  %v4188_v59 = vpop.f32.mrb[152].mxu0 }
 0x3c4   : > { %v4084_v39 = vadd.f32 %v4083_v42, %v4082_v60  ;;  %v4085_v25 = vpop.f32.mrb[126].mxu1  ;;  %v4189_v24 = vpop.f32.mrb[153].mxu0 }
 0x3c5   : > { %v4190_v48 = vadd.f32 %v4189_v24, %v4188_v59  ;;  %v4086_v3 = vpop.f32.mrb[127].mxu1  ;;  %v4191_v54 = vpop.f32.mrb[154].mxu0 }
 0x3c6   : > { %v4467_v27 = vadd.f32 %v5950_v46, %v4084_v39  ;;  %v4087_v22 = vadd.f32 %v4086_v3, %v4085_v25  ;;  %v4192_v16 = vpop.f32.mrb[155].mxu0 }
 0x3c7   : > { %v4193_v55 = vadd.f32 %v4192_v16, %v4191_v54  ;;  %v6042_v23 = vadd.f32 %v4471_v32, %v4190_v48 }
 0x3c8   : > { %v4475_v57 = vadd.f32 %v5954_v43, %v4087_v22 }
 0x3c9   : > { %v6045_v12 = vadd.f32 %v4479_v7, %v4193_v55 }
 0x3ca   : > { %v4088_v6 = vpop.f32.mrb[128].mxu1 }
 0x3cb   : > { %v4089_v8 = vpop.f32.mrb[129].mxu1  ;;  %v4194_v38 = vpop.f32.mrb[156].mxu0 }
 0x3cc   : > { %v4090_v11 = vadd.f32 %v4089_v8, %v4088_v6  ;;  %v4091_v26 = vpop.f32.mrb[130].mxu1  ;;  %v4195_v56 = vpop.f32.mrb[157].mxu0 }
 0x3cd   : > { %v4196_v14 = vadd.f32 %v4195_v56, %v4194_v38  ;;  %v4092_v51 = vpop.f32.mrb[131].mxu1  ;;  %v4197_v34 = vpop.f32.mrb[158].mxu0 }
 0x3ce   : > { %v4487_v46 = vadd.f32 %v5960_v21, %v4090_v11  ;;  %v4093_v20 = vadd.f32 %v4092_v51, %v4091_v26  ;;  %v4198_v50 = vpop.f32.mrb[159].mxu0 }
 0x3cf   : > { %v4199_v36 = vadd.f32 %v4198_v50, %v4197_v34  ;;  %v6048_v15 = vadd.f32 %v4467_v27, %v4196_v14 }
 0x3d0   : > { %v4495_v43 = vadd.f32 %v5964_v63, %v4093_v20 }
 0x3d1   : > { %v6051_v32 = vadd.f32 %v4475_v57, %v4199_v36 }
 0x3d2   : > { %v4094_v52 = vpop.f32.mrb[132].mxu1 }
 0x3d3   : > { %v4095_v10 = vpop.f32.mrb[133].mxu1  ;;  %v4200_v62 = vpop.f32.mrb[160].mxu0 }
 0x3d4   : > { %v4096_v7 = vadd.f32 %v4095_v10, %v4094_v52  ;;  %v4097_v60 = vpop.f32.mrb[134].mxu1  ;;  %v4201_v42 = vpop.f32.mrb[161].mxu0 }
 0x3d5   : > { %v4202_v59 = vadd.f32 %v4201_v42, %v4200_v62  ;;  %v4098_v39 = vpop.f32.mrb[135].mxu1  ;;  %v4203_v25 = vpop.f32.mrb[162].mxu0 }
 0x3d6   : > { %v4483_v21 = vadd.f32 %v5966_v33, %v4096_v7  ;;  %v4099_v24 = vadd.f32 %v4098_v39, %v4097_v60  ;;  %v4204_v48 = vpop.f32.mrb[163].mxu0 }
 0x3d7   : > { %v4205_v3 = vadd.f32 %v4204_v48, %v4203_v25  ;;  %v6054_v54 = vadd.f32 %v4487_v46, %v4202_v59 }
 0x3d8   : > { %v4491_v63 = vadd.f32 %v5969_v49, %v4099_v24 }
 0x3d9   : > { %v6057_v27 = vadd.f32 %v4495_v43, %v4205_v3 }
 0x3da   : > { %v4100_v22 = vpop.f32.mrb[136].mxu1 }
 0x3db   : > { %v4101_v16 = vpop.f32.mrb[137].mxu1  ;;  %v4206_v55 = vpop.f32.mrb[164].mxu0 }
 0x3dc   : > { %v4102_v57 = vadd.f32 %v4101_v16, %v4100_v22  ;;  %v4103_v6 = vpop.f32.mrb[138].mxu1  ;;  %v4207_v8 = vpop.f32.mrb[165].mxu0 }
 0x3dd   : > { %v4208_v38 = vadd.f32 %v4207_v8, %v4206_v55  ;;  %v4104_v11 = vpop.f32.mrb[139].mxu1  ;;  %v4209_v26 = vpop.f32.mrb[166].mxu0 }
 0x3de   : > { %v4503_v33 = vadd.f32 %v5971_v17, %v4102_v57  ;;  %v4105_v56 = vadd.f32 %v4104_v11, %v4103_v6  ;;  %v4210_v14 = vpop.f32.mrb[167].mxu0 }
 0x3df   : > { %v4211_v51 = vadd.f32 %v4210_v14, %v4209_v26  ;;  %v6060_v34 = vadd.f32 %v4483_v21, %v4208_v38 }
 0x3e0   : > { %v4511_v49 = vadd.f32 %v5973_v9, %v4105_v56 }
 0x3e1   : > { %v6063_v46 = vadd.f32 %v4491_v63, %v4211_v51 }
 0x3e2   : > { %v4106_v20 = vpop.f32.mrb[140].mxu1 }
 0x3e3   : > { %v4107_v50 = vpop.f32.mrb[141].mxu1  ;;  %v4212_v36 = vpop.f32.mrb[168].mxu0 }
 0x3e4   : > { %v4108_v43 = vadd.f32 %v4107_v50, %v4106_v20  ;;  %v4109_v52 = vpop.f32.mrb[142].mxu1  ;;  %v4213_v10 = vpop.f32.mrb[169].mxu0 }
 0x3e5   : > { %v4214_v62 = vadd.f32 %v4213_v10, %v4212_v36  ;;  %v4110_v7 = vpop.f32.mrb[143].mxu1  ;;  %v4215_v60 = vpop.f32.mrb[170].mxu0 }
 0x3e6   : > { %v4499_v17 = vadd.f32 %v5976_v1, %v4108_v43  ;;  %v4111_v42 = vadd.f32 %v4110_v7, %v4109_v52  ;;  %v4216_v59 = vpop.f32.mrb[171].mxu0 }
 0x3e7   : > { %v4217_v39 = vadd.f32 %v4216_v59, %v4215_v60  ;;  %v6066_v25 = vadd.f32 %v4503_v33, %v4214_v62 }
 0x3e8   : > { %v4507_v9 = vadd.f32 %v5979_v37, %v4111_v42 }
 0x3e9   : > { %v6069_v21 = vadd.f32 %v4511_v49, %v4217_v39 }
 0x3ea   : > { %v4338_v24 = vpop.f32.mrb[144].mxu1 }
 0x3eb   : > { %v3043_v48 = vadd.f32 %v4338_v24, %v5988_v45  ;;  %v4218_v3 = vpop.f32.mrb[172].mxu0  ;;  %v3034_v63 = vpop.f32.mrb[145].mxu1 }
 0x3ec   : > { %v3035_v22 = vadd.f32 %v3034_v63, %v5982_v30  ;;  %v4219_v16 = vpop.f32.mrb[173].mxu0  ;;  %v4339_v1 = vpop.f32.mrb[146].mxu1 }
 0x3ed   : > { %v4220_v55 = vadd.f32 %v4219_v16, %v4218_v3  ;;  %v3046_v57 = vadd.f32 %v4339_v1, %v5991_v13  ;;  %v4221_v6 = vpop.f32.mrb[174].mxu0  ;;  %v3037_v8 = vpop.f32.mrb[147].mxu1  ;;  %v3163_v11 = vmax.f32 %v3043_v48, 0.0 }
 0x3ee   : > { %v3038_v37 = vadd.f32 %v3037_v8, %v5985_v58  ;;  %v4222_v38 = vpop.f32.mrb[175].mxu0  ;;  %v3161_v56 = vmax.f32 %v3035_v22, 0.0 }
 0x3ef   : > { %v3164_v26 = vmax.f32 %v3046_v57, 0.0  ;;  %v4223_v33 = vadd.f32 %v4222_v38, %v4221_v6  ;;  %v6078_v45 = vadd.f32 %v4499_v17, %v4220_v55 }
 0x3f0   : > { %v3162_v14 = vmax.f32 %v3038_v37, 0.0 }
 0x3f1   : > { %v3653_v30 = vpack.c.bf16 %v3164_v26, %v3163_v11  ;;  %v6080_v51 = vadd.f32 %v4507_v9, %v4223_v33 }
 0x3f2   : > { %v3648_v49 = vpack.c.bf16 %v3162_v14, %v3161_v56  ;;  %v4342_v20 = vpop.f32.mrb[148].mxu1 }
 0x3f3   : > { %3725 = vst [vmem:[%s6082_s7 + $0x8] sm:$0xff] %v3653_v30   ;;  %v3059_v58 = vadd.f32 %v4342_v20, %v6000_v40  ;;  %v3050_v13 = vpop.f32.mrb[149].mxu1 }
 0x3f4   : > { %3649 = vst [vmem:[%s6082_s7] sm:$0xff] %v3648_v49   ;;  %v3051_v50 = vadd.f32 %v3050_v13, %v5994_v31  ;;  %v4343_v36 = vpop.f32.mrb[150].mxu1 }
 0x3f5   : > { %v3062_v43 = vadd.f32 %v4343_v36, %v6003_v53  ;;  %v3053_v52 = vpop.f32.mrb[151].mxu1  ;;  %v3167_v62 = vmax.f32 %v3059_v58, 0.0 }
 0x3f6   : > { %v3054_v10 = vadd.f32 %v3053_v52, %v5997_v5  ;;  %v3165_v60 = vmax.f32 %v3051_v50, 0.0 }
 0x3f7   : > { %v3168_v7 = vmax.f32 %v3062_v43, 0.0 }
 0x3f8   : > { %v3166_v17 = vmax.f32 %v3054_v10, 0.0 }
 0x3f9   : > { %v3663_v42 = vpack.c.bf16 %v3168_v7, %v3167_v62 }
 0x3fa   : > { %v3658_v59 = vpack.c.bf16 %v3166_v17, %v3165_v60  ;;  %v4346_v39 = vpop.f32.mrb[152].mxu1 }
 0x3fb   : > { %3727 = vst [vmem:[%s6082_s7 + $0x18] sm:$0xff] %v3663_v42   ;;  %v3075_v40 = vadd.f32 %v4346_v39, %v6012_v41  ;;  %v3066_v9 = vpop.f32.mrb[153].mxu1 }
 0x3fc   : > { %3726 = vst [vmem:[%s6082_s7 + $0x10] sm:$0xff] %v3658_v59   ;;  %v3067_v31 = vadd.f32 %v3066_v9, %v6006_v19  ;;  %v4347_v53 = vpop.f32.mrb[154].mxu1 }
 0x3fd   : > { %v3078_v24 = vadd.f32 %v4347_v53, %v6015_v44  ;;  %v3069_v5 = vpop.f32.mrb[155].mxu1  ;;  %v3171_v3 = vmax.f32 %v3075_v40, 0.0 }
 0x3fe   : > { %v3070_v48 = vadd.f32 %v3069_v5, %v6009_v47  ;;  %v3169_v22 = vmax.f32 %v3067_v31, 0.0 }
 0x3ff   : > { %v3172_v63 = vmax.f32 %v3078_v24, 0.0 }
 0x400   : > { %v3170_v16 = vmax.f32 %v3070_v48, 0.0 }
 0x401   : > { %v3673_v1 = vpack.c.bf16 %v3172_v63, %v3171_v3 }
 0x402   : > { %v3668_v55 = vpack.c.bf16 %v3170_v16, %v3169_v22  ;;  %v4350_v57 = vpop.f32.mrb[156].mxu1 }
 0x403   : > { %3729 = vst [vmem:[%s6082_s7 + $0x28] sm:$0xff] %v3673_v1   ;;  %v3091_v41 = vadd.f32 %v4350_v57, %v6024_v4  ;;  %v3082_v6 = vpop.f32.mrb[157].mxu1 }
 0x404   : > { %3728 = vst [vmem:[%s6082_s7 + $0x20] sm:$0xff] %v3668_v55   ;;  %v3083_v19 = vadd.f32 %v3082_v6, %v6018_v2  ;;  %v4351_v44 = vpop.f32.mrb[158].mxu1 }
 0x405   : > { %v3094_v8 = vadd.f32 %v4351_v44, %v6027_v61  ;;  %v3085_v47 = vpop.f32.mrb[159].mxu1  ;;  %v3175_v38 = vmax.f32 %v3091_v41, 0.0 }
 0x406   : > { %v3086_v37 = vadd.f32 %v3085_v47, %v6021_v35  ;;  %v3173_v26 = vmax.f32 %v3083_v19, 0.0 }
 0x407   : > { %v3176_v11 = vmax.f32 %v3094_v8, 0.0 }
 0x408   : > { %v3174_v33 = vmax.f32 %v3086_v37, 0.0 }
 0x409   : > { %v3683_v56 = vpack.c.bf16 %v3176_v11, %v3175_v38 }
 0x40a   : > { %v3678_v14 = vpack.c.bf16 %v3174_v33, %v3173_v26  ;;  %v4354_v30 = vpop.f32.mrb[0].mxu1 }
 0x40b   : > { %3731 = vst [vmem:[%s6082_s7 + $0x38] sm:$0xff] %v3683_v56   ;;  %v4453_v4 = vadd.f32 %v6036_v29, %v4354_v30  ;;  %v3098_v49 = vpop.f32.mrb[1].mxu1 }
 0x40c   : > { %3730 = vst [vmem:[%s6082_s7 + $0x30] sm:$0xff] %v3678_v14   ;;  %v4457_v2 = vadd.f32 %v6030_v0, %v3098_v49  ;;  %v4355_v61 = vpop.f32.mrb[2].mxu1 }
 0x40d   : > { %v4461_v20 = vadd.f32 %v6039_v18, %v4355_v61  ;;  %v3101_v35 = vpop.f32.mrb[3].mxu1  ;;  %v3179_v13 = vmax.f32 %v4453_v4, 0.0 }
 0x40e   : > { %v4465_v58 = vadd.f32 %v6033_v28, %v3101_v35  ;;  %v3177_v36 = vmax.f32 %v4457_v2, 0.0 }
 0x40f   : > { %v3180_v50 = vmax.f32 %v4461_v20, 0.0 }
 0x410   : > { %v3178_v43 = vmax.f32 %v4465_v58, 0.0 }
 0x411   : > { %v3693_v52 = vpack.c.bf16 %v3180_v50, %v3179_v13 }
 0x412   : > { %v3688_v10 = vpack.c.bf16 %v3178_v43, %v3177_v36  ;;  %v4358_v62 = vpop.f32.mrb[4].mxu1 }
 0x413   : > { %3733 = vst [vmem:[%s6082_s7 + $0x48] sm:$0xff] %v3693_v52   ;;  %v4469_v29 = vadd.f32 %v6048_v15, %v4358_v62  ;;  %v3114_v7 = vpop.f32.mrb[5].mxu1 }
 0x414   : > { %3732 = vst [vmem:[%s6082_s7 + $0x40] sm:$0xff] %v3688_v10   ;;  %v4473_v0 = vadd.f32 %v6042_v23, %v3114_v7  ;;  %v4359_v18 = vpop.f32.mrb[6].mxu1 }
 0x415   : > { %v4477_v60 = vadd.f32 %v6051_v32, %v4359_v18  ;;  %v3117_v28 = vpop.f32.mrb[7].mxu1  ;;  %v3183_v42 = vmax.f32 %v4469_v29, 0.0 }
 0x416   : > { %v4481_v17 = vadd.f32 %v6045_v12, %v3117_v28  ;;  %v3181_v39 = vmax.f32 %v4473_v0, 0.0 }
 0x417   : > { %v3184_v59 = vmax.f32 %v4477_v60, 0.0 }
 0x418   : > { %v3182_v40 = vmax.f32 %v4481_v17, 0.0 }
 0x419   : > { %v3703_v9 = vpack.c.bf16 %v3184_v59, %v3183_v42 }
 0x41a   : > { %v3698_v31 = vpack.c.bf16 %v3182_v40, %v3181_v39  ;;  %v4362_v53 = vpop.f32.mrb[8].mxu1 }
 0x41b   : > { %3735 = vst [vmem:[%s6082_s7 + $0x58] sm:$0xff] %v3703_v9   ;;  %v4485_v15 = vadd.f32 %v6060_v34, %v4362_v53  ;;  %v3130_v24 = vpop.f32.mrb[9].mxu1 }
 0x41c   : > { %3734 = vst [vmem:[%s6082_s7 + $0x50] sm:$0xff] %v3698_v31   ;;  %v4489_v23 = vadd.f32 %v6054_v54, %v3130_v24  ;;  %v4363_v32 = vpop.f32.mrb[10].mxu1 }
 0x41d   : > { %v4493_v5 = vadd.f32 %v6063_v46, %v4363_v32  ;;  %v3133_v12 = vpop.f32.mrb[11].mxu1  ;;  %v3187_v3 = vmax.f32 %v4485_v15, 0.0 }
 0x41e   : > { %v4497_v48 = vadd.f32 %v6057_v27, %v3133_v12  ;;  %v3185_v22 = vmax.f32 %v4489_v23, 0.0 }
 0x41f   : > { %v3188_v63 = vmax.f32 %v4493_v5, 0.0 }
 0x420   : > { %v3186_v16 = vmax.f32 %v4497_v48, 0.0 }
 0x421   : > { %v3713_v1 = vpack.c.bf16 %v3188_v63, %v3187_v3 }
 0x422   : > { %v3708_v55 = vpack.c.bf16 %v3186_v16, %v3185_v22  ;;  %v4366_v34 = vpop.f32.mrb[12].mxu1 }
 0x423   : > { %3737 = vst [vmem:[%s6082_s7 + $0x68] sm:$0xff] %v3713_v1   ;;  %v4501_v57 = vadd.f32 %v6078_v45, %v4366_v34  ;;  %v3146_v41 = vpop.f32.mrb[13].mxu1 }
 0x424   : > { %3736 = vst [vmem:[%s6082_s7 + $0x60] sm:$0xff] %v3708_v55   ;;  %v4505_v54 = vadd.f32 %v6066_v25, %v3146_v41  ;;  %v4367_v46 = vpop.f32.mrb[14].mxu1 }
 0x425   : > { %v4509_v27 = vadd.f32 %v6080_v51, %v4367_v46  ;;  %v3149_v6 = vpop.f32.mrb[15].mxu1  ;;  %v3191_v44 = vmax.f32 %v4501_v57, 0.0 }
 0x426   : > { %v4513_v19 = vadd.f32 %v6069_v21, %v3149_v6  ;;  %v3189_v47 = vmax.f32 %v4505_v54, 0.0 }
 0x427   : > { %v3192_v8 = vmax.f32 %v4509_v27, 0.0 }
 0x428   : > { %v3190_v45 = vmax.f32 %v4513_v19, 0.0 }
 0x429   : > { %v3723_v37 = vpack.c.bf16 %v3192_v8, %v3191_v44 }
 0x42a   : > { %v3718_v25 = vpack.c.bf16 %v3190_v45, %v3189_v47 }
 0x42b   : > { %3739 = vst [vmem:[%s6082_s7 + $0x78] sm:$0xff] %v3723_v37  }
 0x42c   : > { %3738 = vst [vmem:[%s6082_s7 + $0x70] sm:$0xff] %v3718_v25  }
 0x42d   : > { %4735 = shalt.err (!%p4732_p7)
}
 0x42e   : > { %s4736_s27 = scalar_lea.hbm %s6131_s12, 2048  ;;  %s4740_s5 = scalar_lea.hbm %s6185_s4, 4096 }
 0x42f   : > { %p4737_p8 = scmp.ne.s32.totalorder %s6131_s12, %s4736_s27  ;;  %p4741_p1 = scmp.lt.u32.totalorder %s6131_s12, %s6185_s4 }
 0x430   : > { %p4742_p0 = scmp.lt.u32.totalorder %s4740_s5, %s4736_s27  ;;  %p4744_p6 = scmp.lt.u32.totalorder %s4736_s27, %s6131_s12 }
 0x431   : > { %p4738_p11 = pnand %p4737_p8, %p6241_p9 }
 0x432   : > { %p4743_p5 = por %p4742_p0, %p4741_p1 }
 0x433   : > { %p4739_p13 = pneg %p4738_p11 }
 0x434   : > { %p4745_p10 = por %p4744_p6, %p4743_p5 }
 0x436   : > { %p4746_p12 = pnand %p4745_p10, %p4739_p13 }
 0x438   : > { %4749 = shalt.err (!%p4746_p12)
}
 0x439   : > { %s4803_s7 = smov 64  }
 0x43a   : > { %4537 = dma.vmem_to_hbm [thread:$0]  (%p6241_p9), %s6133_s9, 2048, %s6131_s12, %s6139_s19, %s4803_s7, %s4803_s7, %s4794_s23  }
 0x43b PF: > { %p4549_p2 = scmp.ge.s32.totalorder %s4788_s18, 2  ;;  %s3382_s8 = sand.u32 1, %s4776_s15  }
 0x43c   : > { %p6242_p3 = scmp.ne.s32.totalorder %s6208_s26, 0  ;;  %s3383_s10 = scalar_lea.sflag [#allocation4], %s3382_s8 }
 0x43e   : > { %p4544_p4 = pnand %p4549_p2, %p6242_p3 }
 0x440   : > { %4771 = dma.done.wait (!%p4544_p4), %s3383_s10, 2048  }
 0x441   : > { %4773 = vsyncadd (!%p4544_p4), %s3383_s10, 4294965248  ;;  %p15_p7 = scmp.ge.s32.totalorder %s4854_s21, 4   ;;  %s6243_s15 = smov %s4780_s16 }
 0x442   : > { %s6244_s16 = smov %s4784_s17  ;;  %s6245_s17 = smov %s4865_s24 }
 0x443   : > { %s6246_s18 = smov %s4854_s21  ;;  %17 = sbr.rel (!%p15_p7) target bundleno = 4 (0x4), region = 76 }
 0x44a   :  { %3388 = vsyncpa [#allocation3], 1 }
 0x44b   :  { %3390 = vsyncpa [#allocation3 + $0x1], 1 }
 0x44c   :  { %3391 = vsyncpa [#allocation4], 1 }
 0x44d   :  { %3393 = vsyncpa [#allocation4 + $0x1], 1 }

</bundles_post_ra>
